<compile_context>
chip_gen: v7x
topology: tpu7x:2x2x1
jax: 0.10.0
libtpu: 0.0.40
codegen_flags: <defaults>
</compile_context>

<pallas_src>
import functools
import math

import jax
import jax.numpy as jnp
from jax import lax
from jax.experimental import pallas as pl
from jax.experimental.pallas import tpu as pltpu


def _attn_kernel(q_ref, k_ref, v_ref, o_ref, *, num_kv_tiles, tk, use_bf16_mxu):
    # q_ref: (TQ, D) query tile;  k_ref / v_ref: (S, D) full K/V;  o_ref: (D, TQ) (transposed).
    tq, d = q_ref.shape

    # Fold the sqrt(d) scale (the PyTorch qk.div(1/sqrt(d)) quirk) into the small q tile.
    q = q_ref[...].astype(jnp.float32) * jnp.float32(math.sqrt(d))

    mm_dtype = jnp.bfloat16 if use_bf16_mxu else jnp.float32
    q_mm = q.astype(mm_dtype)

    def kv_step(t, carry):
        acc, m, l = carry
        start = pl.multiple_of(t * tk, tk)
        k_t = k_ref[pl.ds(start, tk), :].astype(mm_dtype)       # (TK, D)
        v_t = v_ref[pl.ds(start, tk), :]                         # (TK, D)

        # s^T[kv, q] = sum_d k[kv, d] * q[q, d]   -> (TK, TQ), lane-dense N = TQ.
        s_t = lax.dot_general(
            k_t, q_mm,
            dimension_numbers=(((1,), (1,)), ((), ())),
            preferred_element_type=jnp.float32,
        )

        # Online softmax along the KV (sublane) axis; per-query stats live on lanes.
        m_new = jnp.maximum(m, jnp.max(s_t, axis=0, keepdims=True))   # (1, TQ)
        alpha = jnp.exp(m - m_new)                                     # (1, TQ)
        e_t = jnp.exp(s_t - m_new)                                     # (TK, TQ)
        l_new = alpha * l + jnp.sum(e_t, axis=0, keepdims=True)

        # o^T[d, q] += sum_kv v[kv, d] * e^T[kv, q]  -> (D, TQ), lane-dense N = TQ.
        pv = lax.dot_general(
            v_t.astype(mm_dtype), e_t.astype(mm_dtype),
            dimension_numbers=(((0,), (0,)), ((), ())),
            preferred_element_type=jnp.float32,
        )
        acc_new = alpha * acc + pv
        return acc_new, m_new, l_new

    acc0 = jnp.zeros((d, tq), jnp.float32)
    m0 = jnp.full((1, tq), -jnp.inf, jnp.float32)
    l0 = jnp.zeros((1, tq), jnp.float32)
    acc, _, l = lax.fori_loop(0, num_kv_tiles, kv_step, (acc0, m0, l0), unroll=True)

    # TODO(synk): Dropout(attention_probs_dropout_prob) is identity here
    # (dropout_p = 0.0 / eval mode), so no RNG mask is applied.

    # Deferred normalization: approx reciprocal on the EUP slot + one Newton step
    # (r <- r * (2 - l*r)) restores ~f32 accuracy for the 1e-4 tolerance.
    r = pl.reciprocal(l, approx=True)
    r = r * (jnp.float32(2.0) - l * r)
    o_ref[...] = (acc * r).astype(o_ref.dtype)


def sdpa_pallas(query, key, value, *, tq=256, tk=128, use_bf16_mxu=False):
    B, S, D = query.shape
    if S % tq != 0:
        tq = S
    if S % tk != 0:
        tk = S
    nq = S // tq
    num_kv_tiles = S // tk

    kernel = functools.partial(
        _attn_kernel, num_kv_tiles=num_kv_tiles, tk=tk, use_bf16_mxu=use_bf16_mxu
    )

    if B == 1:
        # Review item: drop the size-1 batch grid axis.
        grid = (nq,)
        q_spec = pl.BlockSpec((pl.Squeezed(), tq, D), lambda qi: (0, qi, 0))
        kv_spec = pl.BlockSpec((pl.Squeezed(), S, D), lambda qi: (0, 0, 0))
        o_spec = pl.BlockSpec((pl.Squeezed(), D, tq), lambda qi: (0, 0, qi))
        core_sem = (pltpu.CORE_PARALLEL,)
        safe_sem = (pltpu.PARALLEL,)
    else:
        grid = (B, nq)
        q_spec = pl.BlockSpec((pl.Squeezed(), tq, D), lambda b, qi: (b, qi, 0))
        kv_spec = pl.BlockSpec((pl.Squeezed(), S, D), lambda b, qi: (b, 0, 0))
        o_spec = pl.BlockSpec((pl.Squeezed(), D, tq), lambda b, qi: (b, 0, qi))
        core_sem = (pltpu.CORE_PARALLEL, pltpu.PARALLEL)
        safe_sem = (pltpu.PARALLEL, pltpu.PARALLEL)

    cost = pl.CostEstimate(
        flops=4 * B * S * S * D,          # QK^T and PV matmuls
        transcendentals=B * S * S,        # exp
        bytes_accessed=4 * 4 * B * S * D,  # q, k, v read + o written (f32)
    )

    def build(dim_sem):
        return pl.pallas_call(
            kernel,
            out_shape=jax.ShapeDtypeStruct((B, D, S), query.dtype),
            grid_spec=pltpu.PrefetchScalarGridSpec(
                num_scalar_prefetch=0,
                grid=grid,
                in_specs=[q_spec, kv_spec, kv_spec],
                out_specs=o_spec,
            ),
            compiler_params=pltpu.CompilerParams(dimension_semantics=dim_sem),
            cost_estimate=cost,
        )

    try:
        # v7x: shard the query-tile axis across the two TensorCores.
        out_t = jax.block_until_ready(build(core_sem)(query, key, value))
    except Exception:
        # Single-TC chips / runtimes that reject CORE_PARALLEL: plain parallel semantics.
        out_t = jax.block_until_ready(build(safe_sem)(query, key, value))

    # Kernel emits the lane-dense (B, D, S) slab; swap back to (B, S, D) in the wrapper.
    return jnp.swapaxes(out_t, 1, 2)


def sdpa_reference(query, key, value):
    d = key.shape[-1]
    qk = jnp.einsum("bsd,btd->bst", query, key)
    scaled = qk * jnp.float32(math.sqrt(d))  # PyTorch qk.div(1/sqrt(d)) quirk
    p = jax.nn.softmax(scaled, axis=-1)
    return jnp.einsum("bst,btd->bsd", p, value)


if __name__ == "__main__":
    B, S, D = 1, 512, 64  # matches the PyTorch tensors (1, 512, 64)
    k0 = jax.random.PRNGKey(0)
    kq, kk, kv = jax.random.split(k0, 3)
    query = jax.random.normal(kq, (B, S, D), dtype=jnp.float32)
    key = jax.random.normal(kk, (B, S, D), dtype=jnp.float32)
    value = jax.random.normal(kv, (B, S, D), dtype=jnp.float32)

    out = sdpa_pallas(query, key, value)
    out = jax.block_until_ready(out)

    ref = sdpa_reference(query, key, value)
    assert out.shape == (B, S, D)
    assert jnp.allclose(out, ref, atol=1e-4, rtol=1e-4), "mismatch vs reference"

    print("KERNEL_OK")
</pallas_src>

<mosaic_0001>
module attributes {stable_mosaic.version = 11 : i64} {
  func.func @_attn_kernel(%arg0: i32, %arg1: memref<1x256x64xf32, #tpu.memory_space<vmem>>, %arg2: memref<1x512x64xf32, #tpu.memory_space<vmem>>, %arg3: memref<1x512x64xf32, #tpu.memory_space<vmem>>, %arg4: memref<1x64x256xf32, #tpu.memory_space<vmem>>) attributes {dimension_semantics = [#tpu.dimension_semantics<core_parallel>], iteration_bounds = array<i64: 2>, scalar_prefetch = 0 : i64, scratch_operands = 0 : i64, tpu.core_type = #tpu.core_type<tc>, window_params = [{transform_indices = @transform_0, window_bounds = array<i64: 1, 256, 64>}, {pipeline_mode = #tpu.pipeline_mode<synchronous>, transform_indices = @transform_1, window_bounds = array<i64: 1, 512, 64>}, {pipeline_mode = #tpu.pipeline_mode<synchronous>, transform_indices = @transform_2, window_bounds = array<i64: 1, 512, 64>}, {transform_indices = @transform_3, window_bounds = array<i64: 1, 64, 256>}]} {
    %c0 = arith.constant 0 : index
    %c0_0 = arith.constant 0 : index
    %c0_1 = arith.constant 0 : index
    %0 = vector.load %arg1[%c0, %c0_0, %c0_1] : memref<1x256x64xf32, #tpu.memory_space<vmem>>, vector<1x256x64xf32>
    %1 = vector.shape_cast %0 : vector<1x256x64xf32> to vector<256x64xf32>
    %cst = arith.constant 8.000000e+00 : f32
    %2 = vector.broadcast %cst : f32 to vector<256x64xf32>
    %3 = arith.mulf %1, %2 : vector<256x64xf32>
    %cst_2 = arith.constant 0.000000e+00 : f32
    %4 = vector.broadcast %cst_2 : f32 to vector<64x256xf32>
    %cst_3 = arith.constant 0xFF800000 : f32
    %5 = vector.broadcast %cst_3 : f32 to vector<1x256xf32>
    %cst_4 = arith.constant 0.000000e+00 : f32
    %6 = vector.broadcast %cst_4 : f32 to vector<1x256xf32>
    %c0_i32 = arith.constant 0 : i32
    %c128_i32 = arith.constant 128 : i32
    %7 = arith.muli %c0_i32, %c128_i32 : i32
    %8 = tpu.assume_multiple %7, 128 : i32
    %c0_5 = arith.constant 0 : index
    %9 = arith.index_cast %8 : i32 to index
    %c0_6 = arith.constant 0 : index
    %10 = vector.load %arg2[%c0_5, %9, %c0_6] : memref<1x512x64xf32, #tpu.memory_space<vmem>>, vector<1x128x64xf32>
    %11 = vector.shape_cast %10 : vector<1x128x64xf32> to vector<128x64xf32>
    %c0_7 = arith.constant 0 : index
    %12 = arith.index_cast %8 : i32 to index
    %c0_8 = arith.constant 0 : index
    %13 = vector.load %arg3[%c0_7, %12, %c0_8] : memref<1x512x64xf32, #tpu.memory_space<vmem>>, vector<1x128x64xf32>
    %14 = vector.shape_cast %13 : vector<1x128x64xf32> to vector<128x64xf32>
    %cst_9 = arith.constant dense<0.000000e+00> : vector<128x256xf32>
    %15 = tpu.matmul %11, %3, %cst_9 {dimension_numbers = #tpu.dot_dimension_numbers<[1], [1], [0], [0], [0, 0, 1, 0], [], []>} : vector<128x64xf32>, vector<256x64xf32>, vector<128x256xf32> -> vector<128x256xf32>
    %cst_10 = arith.constant dense<0xFF800000> : vector<256xf32>
    %16 = vector.multi_reduction <maximumf>, %15, %cst_10 [0] : vector<128x256xf32> to vector<256xf32>
    %17 = vector.shape_cast %16 : vector<256xf32> to vector<1x256xf32>
    %18 = arith.maximumf %5, %17 : vector<1x256xf32>
    %19 = arith.subf %5, %18 : vector<1x256xf32>
    %20 = math.exp %19 : vector<1x256xf32>
    %21 = vector.broadcast %18 : vector<1x256xf32> to vector<128x256xf32>
    %22 = arith.subf %15, %21 : vector<128x256xf32>
    %23 = math.exp %22 : vector<128x256xf32>
    %24 = arith.mulf %20, %6 : vector<1x256xf32>
    %cst_11 = arith.constant dense<0.000000e+00> : vector<256xf32>
    %25 = vector.multi_reduction <add>, %23, %cst_11 [0] : vector<128x256xf32> to vector<256xf32>
    %26 = vector.shape_cast %25 : vector<256xf32> to vector<1x256xf32>
    %27 = arith.addf %24, %26 : vector<1x256xf32>
    %cst_12 = arith.constant dense<0.000000e+00> : vector<64x256xf32>
    %28 = tpu.matmul %14, %23, %cst_12 {dimension_numbers = #tpu.dot_dimension_numbers<[0], [0], [1], [1], [0, 1, 1, 1], [], []>} : vector<128x64xf32>, vector<128x256xf32>, vector<64x256xf32> -> vector<64x256xf32>
    %29 = vector.broadcast %20 : vector<1x256xf32> to vector<64x256xf32>
    %30 = arith.mulf %29, %4 : vector<64x256xf32>
    %31 = arith.addf %30, %28 : vector<64x256xf32>
    %c1_i32 = arith.constant 1 : i32
    %c128_i32_13 = arith.constant 128 : i32
    %32 = arith.muli %c1_i32, %c128_i32_13 : i32
    %33 = tpu.assume_multiple %32, 128 : i32
    %c0_14 = arith.constant 0 : index
    %34 = arith.index_cast %33 : i32 to index
    %c0_15 = arith.constant 0 : index
    %35 = vector.load %arg2[%c0_14, %34, %c0_15] : memref<1x512x64xf32, #tpu.memory_space<vmem>>, vector<1x128x64xf32>
    %36 = vector.shape_cast %35 : vector<1x128x64xf32> to vector<128x64xf32>
    %c0_16 = arith.constant 0 : index
    %37 = arith.index_cast %33 : i32 to index
    %c0_17 = arith.constant 0 : index
    %38 = vector.load %arg3[%c0_16, %37, %c0_17] : memref<1x512x64xf32, #tpu.memory_space<vmem>>, vector<1x128x64xf32>
    %39 = vector.shape_cast %38 : vector<1x128x64xf32> to vector<128x64xf32>
    %cst_18 = arith.constant dense<0.000000e+00> : vector<128x256xf32>
    %40 = tpu.matmul %36, %3, %cst_18 {dimension_numbers = #tpu.dot_dimension_numbers<[1], [1], [0], [0], [0, 0, 1, 0], [], []>} : vector<128x64xf32>, vector<256x64xf32>, vector<128x256xf32> -> vector<128x256xf32>
    %cst_19 = arith.constant dense<0xFF800000> : vector<256xf32>
    %41 = vector.multi_reduction <maximumf>, %40, %cst_19 [0] : vector<128x256xf32> to vector<256xf32>
    %42 = vector.shape_cast %41 : vector<256xf32> to vector<1x256xf32>
    %43 = arith.maximumf %18, %42 : vector<1x256xf32>
    %44 = arith.subf %18, %43 : vector<1x256xf32>
    %45 = math.exp %44 : vector<1x256xf32>
    %46 = vector.broadcast %43 : vector<1x256xf32> to vector<128x256xf32>
    %47 = arith.subf %40, %46 : vector<128x256xf32>
    %48 = math.exp %47 : vector<128x256xf32>
    %49 = arith.mulf %45, %27 : vector<1x256xf32>
    %cst_20 = arith.constant dense<0.000000e+00> : vector<256xf32>
    %50 = vector.multi_reduction <add>, %48, %cst_20 [0] : vector<128x256xf32> to vector<256xf32>
    %51 = vector.shape_cast %50 : vector<256xf32> to vector<1x256xf32>
    %52 = arith.addf %49, %51 : vector<1x256xf32>
    %cst_21 = arith.constant dense<0.000000e+00> : vector<64x256xf32>
    %53 = tpu.matmul %39, %48, %cst_21 {dimension_numbers = #tpu.dot_dimension_numbers<[0], [0], [1], [1], [0, 1, 1, 1], [], []>} : vector<128x64xf32>, vector<128x256xf32>, vector<64x256xf32> -> vector<64x256xf32>
    %54 = vector.broadcast %45 : vector<1x256xf32> to vector<64x256xf32>
    %55 = arith.mulf %54, %31 : vector<64x256xf32>
    %56 = arith.addf %55, %53 : vector<64x256xf32>
    %c2_i32 = arith.constant 2 : i32
    %c128_i32_22 = arith.constant 128 : i32
    %57 = arith.muli %c2_i32, %c128_i32_22 : i32
    %58 = tpu.assume_multiple %57, 128 : i32
    %c0_23 = arith.constant 0 : index
    %59 = arith.index_cast %58 : i32 to index
    %c0_24 = arith.constant 0 : index
    %60 = vector.load %arg2[%c0_23, %59, %c0_24] : memref<1x512x64xf32, #tpu.memory_space<vmem>>, vector<1x128x64xf32>
    %61 = vector.shape_cast %60 : vector<1x128x64xf32> to vector<128x64xf32>
    %c0_25 = arith.constant 0 : index
    %62 = arith.index_cast %58 : i32 to index
    %c0_26 = arith.constant 0 : index
    %63 = vector.load %arg3[%c0_25, %62, %c0_26] : memref<1x512x64xf32, #tpu.memory_space<vmem>>, vector<1x128x64xf32>
    %64 = vector.shape_cast %63 : vector<1x128x64xf32> to vector<128x64xf32>
    %cst_27 = arith.constant dense<0.000000e+00> : vector<128x256xf32>
    %65 = tpu.matmul %61, %3, %cst_27 {dimension_numbers = #tpu.dot_dimension_numbers<[1], [1], [0], [0], [0, 0, 1, 0], [], []>} : vector<128x64xf32>, vector<256x64xf32>, vector<128x256xf32> -> vector<128x256xf32>
    %cst_28 = arith.constant dense<0xFF800000> : vector<256xf32>
    %66 = vector.multi_reduction <maximumf>, %65, %cst_28 [0] : vector<128x256xf32> to vector<256xf32>
    %67 = vector.shape_cast %66 : vector<256xf32> to vector<1x256xf32>
    %68 = arith.maximumf %43, %67 : vector<1x256xf32>
    %69 = arith.subf %43, %68 : vector<1x256xf32>
    %70 = math.exp %69 : vector<1x256xf32>
    %71 = vector.broadcast %68 : vector<1x256xf32> to vector<128x256xf32>
    %72 = arith.subf %65, %71 : vector<128x256xf32>
    %73 = math.exp %72 : vector<128x256xf32>
    %74 = arith.mulf %70, %52 : vector<1x256xf32>
    %cst_29 = arith.constant dense<0.000000e+00> : vector<256xf32>
    %75 = vector.multi_reduction <add>, %73, %cst_29 [0] : vector<128x256xf32> to vector<256xf32>
    %76 = vector.shape_cast %75 : vector<256xf32> to vector<1x256xf32>
    %77 = arith.addf %74, %76 : vector<1x256xf32>
    %cst_30 = arith.constant dense<0.000000e+00> : vector<64x256xf32>
    %78 = tpu.matmul %64, %73, %cst_30 {dimension_numbers = #tpu.dot_dimension_numbers<[0], [0], [1], [1], [0, 1, 1, 1], [], []>} : vector<128x64xf32>, vector<128x256xf32>, vector<64x256xf32> -> vector<64x256xf32>
    %79 = vector.broadcast %70 : vector<1x256xf32> to vector<64x256xf32>
    %80 = arith.mulf %79, %56 : vector<64x256xf32>
    %81 = arith.addf %80, %78 : vector<64x256xf32>
    %c3_i32 = arith.constant 3 : i32
    %c128_i32_31 = arith.constant 128 : i32
    %82 = arith.muli %c3_i32, %c128_i32_31 : i32
    %83 = tpu.assume_multiple %82, 128 : i32
    %c0_32 = arith.constant 0 : index
    %84 = arith.index_cast %83 : i32 to index
    %c0_33 = arith.constant 0 : index
    %85 = vector.load %arg2[%c0_32, %84, %c0_33] : memref<1x512x64xf32, #tpu.memory_space<vmem>>, vector<1x128x64xf32>
    %86 = vector.shape_cast %85 : vector<1x128x64xf32> to vector<128x64xf32>
    %c0_34 = arith.constant 0 : index
    %87 = arith.index_cast %83 : i32 to index
    %c0_35 = arith.constant 0 : index
    %88 = vector.load %arg3[%c0_34, %87, %c0_35] : memref<1x512x64xf32, #tpu.memory_space<vmem>>, vector<1x128x64xf32>
    %89 = vector.shape_cast %88 : vector<1x128x64xf32> to vector<128x64xf32>
    %cst_36 = arith.constant dense<0.000000e+00> : vector<128x256xf32>
    %90 = tpu.matmul %86, %3, %cst_36 {dimension_numbers = #tpu.dot_dimension_numbers<[1], [1], [0], [0], [0, 0, 1, 0], [], []>} : vector<128x64xf32>, vector<256x64xf32>, vector<128x256xf32> -> vector<128x256xf32>
    %cst_37 = arith.constant dense<0xFF800000> : vector<256xf32>
    %91 = vector.multi_reduction <maximumf>, %90, %cst_37 [0] : vector<128x256xf32> to vector<256xf32>
    %92 = vector.shape_cast %91 : vector<256xf32> to vector<1x256xf32>
    %93 = arith.maximumf %68, %92 : vector<1x256xf32>
    %94 = arith.subf %68, %93 : vector<1x256xf32>
    %95 = math.exp %94 : vector<1x256xf32>
    %96 = vector.broadcast %93 : vector<1x256xf32> to vector<128x256xf32>
    %97 = arith.subf %90, %96 : vector<128x256xf32>
    %98 = math.exp %97 : vector<128x256xf32>
    %99 = arith.mulf %95, %77 : vector<1x256xf32>
    %cst_38 = arith.constant dense<0.000000e+00> : vector<256xf32>
    %100 = vector.multi_reduction <add>, %98, %cst_38 [0] : vector<128x256xf32> to vector<256xf32>
    %101 = vector.shape_cast %100 : vector<256xf32> to vector<1x256xf32>
    %102 = arith.addf %99, %101 : vector<1x256xf32>
    %cst_39 = arith.constant dense<0.000000e+00> : vector<64x256xf32>
    %103 = tpu.matmul %89, %98, %cst_39 {dimension_numbers = #tpu.dot_dimension_numbers<[0], [0], [1], [1], [0, 1, 1, 1], [], []>} : vector<128x64xf32>, vector<128x256xf32>, vector<64x256xf32> -> vector<64x256xf32>
    %104 = vector.broadcast %95 : vector<1x256xf32> to vector<64x256xf32>
    %105 = arith.mulf %104, %81 : vector<64x256xf32>
    %106 = arith.addf %105, %103 : vector<64x256xf32>
    %c4_i32 = arith.constant 4 : i32
    %107 = tpu.reciprocal %102 {approx = true} : vector<1x256xf32> -> vector<1x256xf32>
    %108 = arith.mulf %102, %107 : vector<1x256xf32>
    %cst_40 = arith.constant 2.000000e+00 : f32
    %109 = vector.broadcast %cst_40 : f32 to vector<1x256xf32>
    %110 = arith.subf %109, %108 : vector<1x256xf32>
    %111 = arith.mulf %107, %110 : vector<1x256xf32>
    %112 = vector.broadcast %111 : vector<1x256xf32> to vector<64x256xf32>
    %113 = arith.mulf %106, %112 : vector<64x256xf32>
    %c0_41 = arith.constant 0 : index
    %c0_42 = arith.constant 0 : index
    %c0_43 = arith.constant 0 : index
    %114 = vector.load %arg4[%c0_41, %c0_42, %c0_43] : memref<1x64x256xf32, #tpu.memory_space<vmem>>, vector<1x64x256xf32>
    %115 = vector.shape_cast %114 : vector<1x64x256xf32> to vector<64x256xf32>
    %116 = vector.shape_cast %113 : vector<64x256xf32> to vector<1x64x256xf32>
    tpu.vector_store %arg4[%c0_41, %c0_42, %c0_43], %116 {strides = array<i32>} : memref<1x64x256xf32, #tpu.memory_space<vmem>>, vector<1x64x256xf32>,
    return
  }
  func.func @transform_0(%arg0: i32) -> (i32, i32, i32) {
    %c0_i32 = arith.constant 0 : i32
    %c0_i32_0 = arith.constant 0 : i32
    %c0_i32_1 = arith.constant 0 : i32
    return %c0_i32, %arg0, %c0_i32_0 : i32, i32, i32
  }
  func.func @transform_1(%arg0: i32) -> (i32, i32, i32) {
    %c0_i32 = arith.constant 0 : i32
    %c0_i32_0 = arith.constant 0 : i32
    %c0_i32_1 = arith.constant 0 : i32
    %c0_i32_2 = arith.constant 0 : i32
    return %c0_i32, %c0_i32_0, %c0_i32_1 : i32, i32, i32
  }
  func.func @transform_2(%arg0: i32) -> (i32, i32, i32) {
    %c0_i32 = arith.constant 0 : i32
    %c0_i32_0 = arith.constant 0 : i32
    %c0_i32_1 = arith.constant 0 : i32
    %c0_i32_2 = arith.constant 0 : i32
    return %c0_i32, %c0_i32_0, %c0_i32_1 : i32, i32, i32
  }
  func.func @transform_3(%arg0: i32) -> (i32, i32, i32) {
    %c0_i32 = arith.constant 0 : i32
    %c0_i32_0 = arith.constant 0 : i32
    %c0_i32_1 = arith.constant 0 : i32
    return %c0_i32, %c0_i32_0, %arg0 : i32, i32, i32
  }
}

module attributes {stable_mosaic.version = 11 : i64} {
  func.func @_attn_kernel(%arg0: i32, %arg1: memref<1x256x64xf32, #tpu.memory_space<vmem>>, %arg2: memref<1x512x64xf32, #tpu.memory_space<vmem>>, %arg3: memref<1x512x64xf32, #tpu.memory_space<vmem>>, %arg4: memref<1x64x256xf32, #tpu.memory_space<vmem>>) attributes {dimension_semantics = [#tpu.dimension_semantics<parallel>], iteration_bounds = array<i64: 2>, scalar_prefetch = 0 : i64, scratch_operands = 0 : i64, tpu.core_type = #tpu.core_type<tc>, window_params = [{transform_indices = @transform_0, window_bounds = array<i64: 1, 256, 64>}, {pipeline_mode = #tpu.pipeline_mode<synchronous>, transform_indices = @transform_1, window_bounds = array<i64: 1, 512, 64>}, {pipeline_mode = #tpu.pipeline_mode<synchronous>, transform_indices = @transform_2, window_bounds = array<i64: 1, 512, 64>}, {transform_indices = @transform_3, window_bounds = array<i64: 1, 64, 256>}]} {
    %c0 = arith.constant 0 : index
    %c0_0 = arith.constant 0 : index
    %c0_1 = arith.constant 0 : index
    %0 = vector.load %arg1[%c0, %c0_0, %c0_1] : memref<1x256x64xf32, #tpu.memory_space<vmem>>, vector<1x256x64xf32>
    %1 = vector.shape_cast %0 : vector<1x256x64xf32> to vector<256x64xf32>
    %cst = arith.constant 8.000000e+00 : f32
    %2 = vector.broadcast %cst : f32 to vector<256x64xf32>
    %3 = arith.mulf %1, %2 : vector<256x64xf32>
    %cst_2 = arith.constant 0.000000e+00 : f32
    %4 = vector.broadcast %cst_2 : f32 to vector<64x256xf32>
    %cst_3 = arith.constant 0xFF800000 : f32
    %5 = vector.broadcast %cst_3 : f32 to vector<1x256xf32>
    %cst_4 = arith.constant 0.000000e+00 : f32
    %6 = vector.broadcast %cst_4 : f32 to vector<1x256xf32>
    %c0_i32 = arith.constant 0 : i32
    %c128_i32 = arith.constant 128 : i32
    %7 = arith.muli %c0_i32, %c128_i32 : i32
    %8 = tpu.assume_multiple %7, 128 : i32
    %c0_5 = arith.constant 0 : index
    %9 = arith.index_cast %8 : i32 to index
    %c0_6 = arith.constant 0 : index
    %10 = vector.load %arg2[%c0_5, %9, %c0_6] : memref<1x512x64xf32, #tpu.memory_space<vmem>>, vector<1x128x64xf32>
    %11 = vector.shape_cast %10 : vector<1x128x64xf32> to vector<128x64xf32>
    %c0_7 = arith.constant 0 : index
    %12 = arith.index_cast %8 : i32 to index
    %c0_8 = arith.constant 0 : index
    %13 = vector.load %arg3[%c0_7, %12, %c0_8] : memref<1x512x64xf32, #tpu.memory_space<vmem>>, vector<1x128x64xf32>
    %14 = vector.shape_cast %13 : vector<1x128x64xf32> to vector<128x64xf32>
    %cst_9 = arith.constant dense<0.000000e+00> : vector<128x256xf32>
    %15 = tpu.matmul %11, %3, %cst_9 {dimension_numbers = #tpu.dot_dimension_numbers<[1], [1], [0], [0], [0, 0, 1, 0], [], []>} : vector<128x64xf32>, vector<256x64xf32>, vector<128x256xf32> -> vector<128x256xf32>
    %cst_10 = arith.constant dense<0xFF800000> : vector<256xf32>
    %16 = vector.multi_reduction <maximumf>, %15, %cst_10 [0] : vector<128x256xf32> to vector<256xf32>
    %17 = vector.shape_cast %16 : vector<256xf32> to vector<1x256xf32>
    %18 = arith.maximumf %5, %17 : vector<1x256xf32>
    %19 = arith.subf %5, %18 : vector<1x256xf32>
    %20 = math.exp %19 : vector<1x256xf32>
    %21 = vector.broadcast %18 : vector<1x256xf32> to vector<128x256xf32>
    %22 = arith.subf %15, %21 : vector<128x256xf32>
    %23 = math.exp %22 : vector<128x256xf32>
    %24 = arith.mulf %20, %6 : vector<1x256xf32>
    %cst_11 = arith.constant dense<0.000000e+00> : vector<256xf32>
    %25 = vector.multi_reduction <add>, %23, %cst_11 [0] : vector<128x256xf32> to vector<256xf32>
    %26 = vector.shape_cast %25 : vector<256xf32> to vector<1x256xf32>
    %27 = arith.addf %24, %26 : vector<1x256xf32>
    %cst_12 = arith.constant dense<0.000000e+00> : vector<64x256xf32>
    %28 = tpu.matmul %14, %23, %cst_12 {dimension_numbers = #tpu.dot_dimension_numbers<[0], [0], [1], [1], [0, 1, 1, 1], [], []>} : vector<128x64xf32>, vector<128x256xf32>, vector<64x256xf32> -> vector<64x256xf32>
    %29 = vector.broadcast %20 : vector<1x256xf32> to vector<64x256xf32>
    %30 = arith.mulf %29, %4 : vector<64x256xf32>
    %31 = arith.addf %30, %28 : vector<64x256xf32>
    %c1_i32 = arith.constant 1 : i32
    %c128_i32_13 = arith.constant 128 : i32
    %32 = arith.muli %c1_i32, %c128_i32_13 : i32
    %33 = tpu.assume_multiple %32, 128 : i32
    %c0_14 = arith.constant 0 : index
    %34 = arith.index_cast %33 : i32 to index
    %c0_15 = arith.constant 0 : index
    %35 = vector.load %arg2[%c0_14, %34, %c0_15] : memref<1x512x64xf32, #tpu.memory_space<vmem>>, vector<1x128x64xf32>
    %36 = vector.shape_cast %35 : vector<1x128x64xf32> to vector<128x64xf32>
    %c0_16 = arith.constant 0 : index
    %37 = arith.index_cast %33 : i32 to index
    %c0_17 = arith.constant 0 : index
    %38 = vector.load %arg3[%c0_16, %37, %c0_17] : memref<1x512x64xf32, #tpu.memory_space<vmem>>, vector<1x128x64xf32>
    %39 = vector.shape_cast %38 : vector<1x128x64xf32> to vector<128x64xf32>
    %cst_18 = arith.constant dense<0.000000e+00> : vector<128x256xf32>
    %40 = tpu.matmul %36, %3, %cst_18 {dimension_numbers = #tpu.dot_dimension_numbers<[1], [1], [0], [0], [0, 0, 1, 0], [], []>} : vector<128x64xf32>, vector<256x64xf32>, vector<128x256xf32> -> vector<128x256xf32>
    %cst_19 = arith.constant dense<0xFF800000> : vector<256xf32>
    %41 = vector.multi_reduction <maximumf>, %40, %cst_19 [0] : vector<128x256xf32> to vector<256xf32>
    %42 = vector.shape_cast %41 : vector<256xf32> to vector<1x256xf32>
    %43 = arith.maximumf %18, %42 : vector<1x256xf32>
    %44 = arith.subf %18, %43 : vector<1x256xf32>
    %45 = math.exp %44 : vector<1x256xf32>
    %46 = vector.broadcast %43 : vector<1x256xf32> to vector<128x256xf32>
    %47 = arith.subf %40, %46 : vector<128x256xf32>
    %48 = math.exp %47 : vector<128x256xf32>
    %49 = arith.mulf %45, %27 : vector<1x256xf32>
    %cst_20 = arith.constant dense<0.000000e+00> : vector<256xf32>
    %50 = vector.multi_reduction <add>, %48, %cst_20 [0] : vector<128x256xf32> to vector<256xf32>
    %51 = vector.shape_cast %50 : vector<256xf32> to vector<1x256xf32>
    %52 = arith.addf %49, %51 : vector<1x256xf32>
    %cst_21 = arith.constant dense<0.000000e+00> : vector<64x256xf32>
    %53 = tpu.matmul %39, %48, %cst_21 {dimension_numbers = #tpu.dot_dimension_numbers<[0], [0], [1], [1], [0, 1, 1, 1], [], []>} : vector<128x64xf32>, vector<128x256xf32>, vector<64x256xf32> -> vector<64x256xf32>
    %54 = vector.broadcast %45 : vector<1x256xf32> to vector<64x256xf32>
    %55 = arith.mulf %54, %31 : vector<64x256xf32>
    %56 = arith.addf %55, %53 : vector<64x256xf32>
    %c2_i32 = arith.constant 2 : i32
    %c128_i32_22 = arith.constant 128 : i32
    %57 = arith.muli %c2_i32, %c128_i32_22 : i32
    %58 = tpu.assume_multiple %57, 128 : i32
    %c0_23 = arith.constant 0 : index
    %59 = arith.index_cast %58 : i32 to index
    %c0_24 = arith.constant 0 : index
    %60 = vector.load %arg2[%c0_23, %59, %c0_24] : memref<1x512x64xf32, #tpu.memory_space<vmem>>, vector<1x128x64xf32>
    %61 = vector.shape_cast %60 : vector<1x128x64xf32> to vector<128x64xf32>
    %c0_25 = arith.constant 0 : index
    %62 = arith.index_cast %58 : i32 to index
    %c0_26 = arith.constant 0 : index
    %63 = vector.load %arg3[%c0_25, %62, %c0_26] : memref<1x512x64xf32, #tpu.memory_space<vmem>>, vector<1x128x64xf32>
    %64 = vector.shape_cast %63 : vector<1x128x64xf32> to vector<128x64xf32>
    %cst_27 = arith.constant dense<0.000000e+00> : vector<128x256xf32>
    %65 = tpu.matmul %61, %3, %cst_27 {dimension_numbers = #tpu.dot_dimension_numbers<[1], [1], [0], [0], [0, 0, 1, 0], [], []>} : vector<128x64xf32>, vector<256x64xf32>, vector<128x256xf32> -> vector<128x256xf32>
    %cst_28 = arith.constant dense<0xFF800000> : vector<256xf32>
    %66 = vector.multi_reduction <maximumf>, %65, %cst_28 [0] : vector<128x256xf32> to vector<256xf32>
    %67 = vector.shape_cast %66 : vector<256xf32> to vector<1x256xf32>
    %68 = arith.maximumf %43, %67 : vector<1x256xf32>
    %69 = arith.subf %43, %68 : vector<1x256xf32>
    %70 = math.exp %69 : vector<1x256xf32>
    %71 = vector.broadcast %68 : vector<1x256xf32> to vector<128x256xf32>
    %72 = arith.subf %65, %71 : vector<128x256xf32>
    %73 = math.exp %72 : vector<128x256xf32>
    %74 = arith.mulf %70, %52 : vector<1x256xf32>
    %cst_29 = arith.constant dense<0.000000e+00> : vector<256xf32>
    %75 = vector.multi_reduction <add>, %73, %cst_29 [0] : vector<128x256xf32> to vector<256xf32>
    %76 = vector.shape_cast %75 : vector<256xf32> to vector<1x256xf32>
    %77 = arith.addf %74, %76 : vector<1x256xf32>
    %cst_30 = arith.constant dense<0.000000e+00> : vector<64x256xf32>
    %78 = tpu.matmul %64, %73, %cst_30 {dimension_numbers = #tpu.dot_dimension_numbers<[0], [0], [1], [1], [0, 1, 1, 1], [], []>} : vector<128x64xf32>, vector<128x256xf32>, vector<64x256xf32> -> vector<64x256xf32>
    %79 = vector.broadcast %70 : vector<1x256xf32> to vector<64x256xf32>
    %80 = arith.mulf %79, %56 : vector<64x256xf32>
    %81 = arith.addf %80, %78 : vector<64x256xf32>
    %c3_i32 = arith.constant 3 : i32
    %c128_i32_31 = arith.constant 128 : i32
    %82 = arith.muli %c3_i32, %c128_i32_31 : i32
    %83 = tpu.assume_multiple %82, 128 : i32
    %c0_32 = arith.constant 0 : index
    %84 = arith.index_cast %83 : i32 to index
    %c0_33 = arith.constant 0 : index
    %85 = vector.load %arg2[%c0_32, %84, %c0_33] : memref<1x512x64xf32, #tpu.memory_space<vmem>>, vector<1x128x64xf32>
    %86 = vector.shape_cast %85 : vector<1x128x64xf32> to vector<128x64xf32>
    %c0_34 = arith.constant 0 : index
    %87 = arith.index_cast %83 : i32 to index
    %c0_35 = arith.constant 0 : index
    %88 = vector.load %arg3[%c0_34, %87, %c0_35] : memref<1x512x64xf32, #tpu.memory_space<vmem>>, vector<1x128x64xf32>
    %89 = vector.shape_cast %88 : vector<1x128x64xf32> to vector<128x64xf32>
    %cst_36 = arith.constant dense<0.000000e+00> : vector<128x256xf32>
    %90 = tpu.matmul %86, %3, %cst_36 {dimension_numbers = #tpu.dot_dimension_numbers<[1], [1], [0], [0], [0, 0, 1, 0], [], []>} : vector<128x64xf32>, vector<256x64xf32>, vector<128x256xf32> -> vector<128x256xf32>
    %cst_37 = arith.constant dense<0xFF800000> : vector<256xf32>
    %91 = vector.multi_reduction <maximumf>, %90, %cst_37 [0] : vector<128x256xf32> to vector<256xf32>
    %92 = vector.shape_cast %91 : vector<256xf32> to vector<1x256xf32>
    %93 = arith.maximumf %68, %92 : vector<1x256xf32>
    %94 = arith.subf %68, %93 : vector<1x256xf32>
    %95 = math.exp %94 : vector<1x256xf32>
    %96 = vector.broadcast %93 : vector<1x256xf32> to vector<128x256xf32>
    %97 = arith.subf %90, %96 : vector<128x256xf32>
    %98 = math.exp %97 : vector<128x256xf32>
    %99 = arith.mulf %95, %77 : vector<1x256xf32>
    %cst_38 = arith.constant dense<0.000000e+00> : vector<256xf32>
    %100 = vector.multi_reduction <add>, %98, %cst_38 [0] : vector<128x256xf32> to vector<256xf32>
    %101 = vector.shape_cast %100 : vector<256xf32> to vector<1x256xf32>
    %102 = arith.addf %99, %101 : vector<1x256xf32>
    %cst_39 = arith.constant dense<0.000000e+00> : vector<64x256xf32>
    %103 = tpu.matmul %89, %98, %cst_39 {dimension_numbers = #tpu.dot_dimension_numbers<[0], [0], [1], [1], [0, 1, 1, 1], [], []>} : vector<128x64xf32>, vector<128x256xf32>, vector<64x256xf32> -> vector<64x256xf32>
    %104 = vector.broadcast %95 : vector<1x256xf32> to vector<64x256xf32>
    %105 = arith.mulf %104, %81 : vector<64x256xf32>
    %106 = arith.addf %105, %103 : vector<64x256xf32>
    %c4_i32 = arith.constant 4 : i32
    %107 = tpu.reciprocal %102 {approx = true} : vector<1x256xf32> -> vector<1x256xf32>
    %108 = arith.mulf %102, %107 : vector<1x256xf32>
    %cst_40 = arith.constant 2.000000e+00 : f32
    %109 = vector.broadcast %cst_40 : f32 to vector<1x256xf32>
    %110 = arith.subf %109, %108 : vector<1x256xf32>
    %111 = arith.mulf %107, %110 : vector<1x256xf32>
    %112 = vector.broadcast %111 : vector<1x256xf32> to vector<64x256xf32>
    %113 = arith.mulf %106, %112 : vector<64x256xf32>
    %c0_41 = arith.constant 0 : index
    %c0_42 = arith.constant 0 : index
    %c0_43 = arith.constant 0 : index
    %114 = vector.load %arg4[%c0_41, %c0_42, %c0_43] : memref<1x64x256xf32, #tpu.memory_space<vmem>>, vector<1x64x256xf32>
    %115 = vector.shape_cast %114 : vector<1x64x256xf32> to vector<64x256xf32>
    %116 = vector.shape_cast %113 : vector<64x256xf32> to vector<1x64x256xf32>
    tpu.vector_store %arg4[%c0_41, %c0_42, %c0_43], %116 {strides = array<i32>} : memref<1x64x256xf32, #tpu.memory_space<vmem>>, vector<1x64x256xf32>,
    return
  }
  func.func @transform_0(%arg0: i32) -> (i32, i32, i32) {
    %c0_i32 = arith.constant 0 : i32
    %c0_i32_0 = arith.constant 0 : i32
    %c0_i32_1 = arith.constant 0 : i32
    return %c0_i32, %arg0, %c0_i32_0 : i32, i32, i32
  }
  func.func @transform_1(%arg0: i32) -> (i32, i32, i32) {
    %c0_i32 = arith.constant 0 : i32
    %c0_i32_0 = arith.constant 0 : i32
    %c0_i32_1 = arith.constant 0 : i32
    %c0_i32_2 = arith.constant 0 : i32
    return %c0_i32, %c0_i32_0, %c0_i32_1 : i32, i32, i32
  }
  func.func @transform_2(%arg0: i32) -> (i32, i32, i32) {
    %c0_i32 = arith.constant 0 : i32
    %c0_i32_0 = arith.constant 0 : i32
    %c0_i32_1 = arith.constant 0 : i32
    %c0_i32_2 = arith.constant 0 : i32
    return %c0_i32, %c0_i32_0, %c0_i32_1 : i32, i32, i32
  }
  func.func @transform_3(%arg0: i32) -> (i32, i32, i32) {
    %c0_i32 = arith.constant 0 : i32
    %c0_i32_0 = arith.constant 0 : i32
    %c0_i32_1 = arith.constant 0 : i32
    return %c0_i32, %c0_i32_0, %arg0 : i32, i32, i32
  }
}

</mosaic_0001>

<bundles_post_ra>
// kernel: tpu_custom_call.1
= control target key start
LH: loop header
LB: loop body
LE: loop exit
PB: predicated region body
PF: predicated region fallthrough
CT: control target
= control target key end

     0   :  { %8 = vsyncpa [#allocation3], 0  ;;  %s6521_s0 = inlined_call_operand.vmem [shape: f32[1,512,64], index: 0, kind: input, shape index: {}]   ;;  %s6522_s1 = inlined_call_operand.vmem [shape: f32[1,512,64], index: 1, kind: input, shape index: {}]   ;;  %s6523_s2 = inlined_call_operand.vmem [shape: f32[1,512,64], index: 2, kind: input, shape index: {}]   ;;  %s6524_s3 = inlined_call_operand.hbm [shape: f32[1,64,512], index: 3, kind: output, shape index: {}]  }
   0x1   :  { %10 = vsyncpa [#allocation3 + $0x1], 0  ;;  %s4162_s12 = smov 0   ;;  %s4164_s13 = smov 0  }
   0x2   :  { %s4166_s14 = smov 0   ;;  %s4168_s15 = smov 0  }
   0x3 LB: > { %s4183_s16 = sadd.s32 4294967295, %s4135_s15   ;;  %s2877_s17 = sadd.s32 4294967294, %s4135_s15   ;;  %s4135_s15 = sphi %s4168_s15, %s6725_s15   ;;  %s4131_s14 = sphi %s4166_s14, %s6724_s14   ;;  %s4127_s13 = sphi %s4164_s13, %s6723_s13   ;;  %s4123_s12 = sphi %s4162_s12, %s6722_s12  }
   0x4   : > { %s4187_s18 = sadd.s32 1, %s4135_s15   ;;  %s91_s19 = sadd.s32 1, %s4131_s14 }
   0x5   : > { %s88_s20 = ssub.s32 %s4135_s15, %s4187_s18  ;;  %p101_p0 = scmp.ne.s32.totalorder %s4131_s14, %s4127_s13 }
   0x6   : > { %p89_p1 = scmp.eq.s32.totalorder %s88_s20, 0  ;;  %p102_p2 = scmp.eq.s32.totalorder %s4183_s16, 1 }
   0x7   : > { %p107_p3 = scmp.ne.s32.totalorder %s4127_s13, %s4123_s12  ;;  %p108_p4 = scmp.eq.s32.totalorder %s2877_s17, 1 }
   0x8   : > { %s4198_s21 = scalar_select %p89_p1, %s4131_s14, %s91_s19  }
   0x9   : > { %p4200_p5 = por %p102_p2, %p101_p0  ;;  %p4204_p6 = por %p108_p4, %p107_p3 }
   0xa   : > { %p2880_p7 = scmp.ge.s32.totalorder %s4135_s15, 1  ;;  %p141_p8 = scmp.lt.s32.totalorder %s4135_s15, 3 }
   0xc   : > { %p142_p9 = pnand %p2880_p7, %p141_p8 }
   0xe   : > { %145 = sbr.rel (%p142_p9) target bundleno = 1629 (0x65d), region = 32 }
  0x15   : > { %s2882_s24 = sshll.u32 %s4183_s16, 5  ;;  %vm268_vm0 = vcmask 523264   ;;  %v4214_v0 = vld [vmem:[%s6522_s1] sm:$0xff]  ;;  %v6577_v10 = vmov 0  ;;  %s162_s6 = sand.u32 1, %s4127_s13  }
  0x16   : > { %p166_p10 = scmp.lt.s32.totalorder %s2882_s24, 63  ;;  %3210 = vmatprep.mubr.msk.f32.mxu0 %vm268_vm0, %v4214_v0  ;;  %vm4231_vm1 = vmpackc.low %vm268_vm0, %vm268_vm0  ;;  %v252_v26 = vld [vmem:[%s6523_s2] sm:$0xff]  ;;  %s2881_s7 = sshll.u32 %s162_s6, 7 }
  0x17   : > { %v6578_v10 = vsel %vm4231_vm1, 4294967295, %v6577_v10  ;;  %764 = vxpose.xlu0.b32.start [1/16] (narrow) %v252_v26, 64  ;;  %v238_v26 = vld [vmem:[%s6522_s1 + $0x10] sm:$0xff]  ;;  %s6423_s8 = scalar_lea.vmem [#allocation2], %s2881_s7  ;;  %s3177_s9 = sshll.u32 %s4183_s16, 8 }
  0x18   : > { %s6727_s24 = smov (!%p166_p10, %s2882_s24), 63  ;;  %6579 = vst [vmem:[#allocation5_spill] sm:$0xff] %v6578_v10  ;;  %s2815_s10 = sshll.u32 %s6423_s8, 4  ;;  %s6473_s10 = int_to_ptr.vmem [resolvable:$true] %s2815_s10 }
  0x19   : > { %s2883_s27 = sshll.u32 %s6727_s24, 3  ;;  %s6470_s19 = scalar_lea.hbm %s6524_s3, %s3177_s9 }
  0x1a   : > { %s4221_s30 = scalar_lea.vmem %s6521_s0, %s2883_s27  ;;  %s6480_s16 = scalar_lea.sflag [#allocation3], %s162_s6 }
  0x1b   : > { %v188_v1 = vld [vmem:[%s4221_s30 + $0x80] sm:$0xff]  ;;  %v189_v2 = vld [vmem:[%s4221_s30 + $0x88] sm:$0xff]  ;;  %v190_v8 = vld [vmem:[%s4221_s30 + $0x90] sm:$0xff]  ;;  %s4073_s20 = scalar_lea.vmem %s6473_s10, 2048  ;;  %s4138_s24 = smov [#allocation2]  }
  0x1c   : > { %v172_v3 = vld [vmem:[%s4221_s30] sm:$0xff]  ;;  %v220_v4 = vmul.f32 8.0, %v188_v1  ;;  %v221_v5 = vmul.f32 8.0, %v189_v2  ;;  %v173_v6 = vld [vmem:[%s4221_s30 + $0x8] sm:$0xff]  ;;  %v191_v9 = vld [vmem:[%s4221_s30 + $0x98] sm:$0xff]  ;;  %v222_v12 = vmul.f32 8.0, %v190_v8  ;;  %p4074_p11 = scmp.ne.s32.totalorder %s6473_s10, %s4073_s20 }
  0x1d   : > { %v204_v7 = vmul.f32 8.0, %v172_v3  ;;  %v205_v11 = vmul.f32 8.0, %v173_v6  ;;  %v223_v13 = vmul.f32 8.0, %v191_v9  ;;  %v174_v15 = vld [vmem:[%s4221_s30 + $0x10] sm:$0xff]  ;;  %v175_v16 = vld [vmem:[%s4221_s30 + $0x18] sm:$0xff]  ;;  %v192_v19 = vld [vmem:[%s4221_s30 + $0xa0] sm:$0xff] }
  0x1e   : > { %v4235_v14 = vpack.c.bf16 %v221_v5, %v220_v4  ;;  %v193_v20 = vld [vmem:[%s4221_s30 + $0xa8] sm:$0xff]  ;;  %v206_v21 = vmul.f32 8.0, %v174_v15  ;;  %v207_v22 = vmul.f32 8.0, %v175_v16  ;;  %v224_v23 = vmul.f32 8.0, %v192_v19  ;;  %v176_v28 = vld [vmem:[%s4221_s30 + $0x20] sm:$0xff]  ;;  %v194_v30 = vld [vmem:[%s4221_s30 + $0xb0] sm:$0xff]  ;;  %p4075_p12 = pnand %p4074_p11, %p4200_p5 }
  0x1f   : > { %v4239_v17 = vpack.c.bf16 %v205_v11, %v204_v7  ;;  %v4241_v18 = vpack.c.bf16 %v223_v13, %v222_v12  ;;  %v225_v24 = vmul.f32 8.0, %v193_v20  ;;  %v177_v29 = vld [vmem:[%s4221_s30 + $0x28] sm:$0xff]  ;;  %v195_v31 = vld [vmem:[%s4221_s30 + $0xb8] sm:$0xff]  ;;  %v208_v32 = vmul.f32 8.0, %v176_v28  ;;  %v178_v38 = vld [vmem:[%s4221_s30 + $0x30] sm:$0xff]  ;;  %s4077_s25 = sshll.u32 %s4138_s24, 4  ;;  %s4078_s25 = int_to_ptr.vmem [resolvable:$false] %s4077_s25 }
  0x20   : > { %6580 = vst [vmem:[#allocation6_spill] sm:$0xff] %v4235_v14  ;;  %3436 = vmatprep.subr.msk.bf16.mxu0 %vm4231_vm1, %v4235_v14  ;;  %v4254_v25 = vpack.c.bf16 %v207_v22, %v206_v21  ;;  %v209_v33 = vmul.f32 8.0, %v177_v29  ;;  %v226_v34 = vmul.f32 8.0, %v194_v30  ;;  %v227_v35 = vmul.f32 8.0, %v195_v31  ;;  %v179_v39 = vld [vmem:[%s4221_s30 + $0x38] sm:$0xff]  ;;  %v196_v40 = vld [vmem:[%s4221_s30 + $0xc0] sm:$0xff]  ;;  %p4076_p13 = pneg %p4075_p12  ;;  %p4080_p0 = scmp.lt.s32.totalorder %s6473_s10, %s4078_s25 }
  0x21   : > { %6581 = vst [vmem:[#allocation7_spill] sm:$0xff] %v4239_v17  ;;  %6582 = vst [vmem:[#allocation8_spill] sm:$0xff] %v4241_v18  ;;  %3439 = vmatpush3.bf16.xpose.msk.msra.mxu0 %vm4231_vm1, %v4239_v17  ;;  %v4259_v27 = vpack.c.bf16 %v225_v24, %v224_v23  ;;  %v197_v41 = vld [vmem:[%s4221_s30 + $0xc8] sm:$0xff]  ;;  %v210_v42 = vmul.f32 8.0, %v178_v38  ;;  %v211_v43 = vmul.f32 8.0, %v179_v39  ;;  %v228_v44 = vmul.f32 8.0, %v196_v40 }
  0x22   : > { %3442 = vmatprep.subr.msk.bf16.mxu0 %vm4231_vm1, %v4241_v18  ;;  %6583 = vst [vmem:[#allocation9_spill] sm:$0xff] %v4254_v25  ;;  %v4271_v36 = vpack.c.bf16 %v209_v33, %v208_v32  ;;  %v4273_v37 = vpack.c.bf16 %v227_v35, %v226_v34  ;;  %v229_v45 = vmul.f32 8.0, %v197_v41  ;;  %v180_v48 = vld [vmem:[%s4221_s30 + $0x40] sm:$0xff]  ;;  %v181_v49 = vld [vmem:[%s4221_s30 + $0x48] sm:$0xff]  ;;  %v198_v50 = vld [vmem:[%s4221_s30 + $0xd0] sm:$0xff]  ;;  %s4079_s26 = scalar_lea.vmem %s4078_s25, 4096 }
  0x23   : > { %6584 = vst [vmem:[#allocation10_spill] sm:$0xff] %v4259_v27  ;;  %v4285_v46 = vpack.c.bf16 %v211_v43, %v210_v42  ;;  %v199_v51 = vld [vmem:[%s4221_s30 + $0xd8] sm:$0xff]  ;;  %v212_v52 = vmul.f32 8.0, %v180_v48  ;;  %v213_v53 = vmul.f32 8.0, %v181_v49  ;;  %v230_v54 = vmul.f32 8.0, %v198_v50  ;;  %v182_v58 = vld [vmem:[%s4221_s30 + $0x50] sm:$0xff]  ;;  %p4081_p1 = scmp.lt.s32.totalorder %s4079_s26, %s4073_s20 }
  0x24   : > { %6585 = vst [vmem:[#allocation11_spill] sm:$0xff] %v4271_v36  ;;  %6586 = vst [vmem:[#allocation12_spill] sm:$0xff] %v4273_v37  ;;  %v4287_v47 = vpack.c.bf16 %v229_v45, %v228_v44  ;;  %v231_v55 = vmul.f32 8.0, %v199_v51  ;;  %v183_v59 = vld [vmem:[%s4221_s30 + $0x58] sm:$0xff]  ;;  %v200_v60 = vld [vmem:[%s4221_s30 + $0xe0] sm:$0xff]  ;;  %v214_v62 = vmul.f32 8.0, %v182_v58 }
  0x25   : > { %6587 = vst [vmem:[#allocation13_spill] sm:$0xff] %v4285_v46  ;;  %v4299_v56 = vpack.c.bf16 %v213_v53, %v212_v52  ;;  %v201_v61 = vld [vmem:[%s4221_s30 + $0xe8] sm:$0xff]  ;;  %v215_v63 = vmul.f32 8.0, %v183_v59  ;;  %v232_v1 = vmul.f32 8.0, %v200_v60  ;;  %v184_v5 = vld [vmem:[%s4221_s30 + $0x60] sm:$0xff]  ;;  %v202_v7 = vld [vmem:[%s4221_s30 + $0xf0] sm:$0xff]  ;;  %p4082_p2 = por %p4081_p1, %p4080_p0 }
  0x26   : > { %6588 = vst [vmem:[#allocation14_spill] sm:$0xff] %v4287_v47  ;;  %v4301_v57 = vpack.c.bf16 %v231_v55, %v230_v54  ;;  %v233_v2 = vmul.f32 8.0, %v201_v61  ;;  %v185_v6 = vld [vmem:[%s4221_s30 + $0x68] sm:$0xff]  ;;  %v203_v8 = vld [vmem:[%s4221_s30 + $0xf8] sm:$0xff]  ;;  %v216_v9 = vmul.f32 8.0, %v184_v5  ;;  %v234_v12 = vmul.f32 8.0, %v202_v7 }
  0x27   : > { %6589 = vst [vmem:[#allocation15_spill] sm:$0xff] %v4299_v56  ;;  %v4313_v3 = vpack.c.bf16 %v215_v63, %v214_v62  ;;  %v217_v11 = vmul.f32 8.0, %v185_v6  ;;  %v235_v13 = vmul.f32 8.0, %v203_v8  ;;  %v186_v19 = vld [vmem:[%s4221_s30 + $0x70] sm:$0xff]  ;;  %v187_v20 = vld [vmem:[%s4221_s30 + $0x78] sm:$0xff]  ;;  %v237_v24 = vld [vmem:[%s6522_s1 + $0x8] sm:$0xff]  ;;  %p4083_p3 = pnand %p4082_p2, %p4076_p13 }
  0x28   : > { %6590 = vst [vmem:[#allocation16_spill] sm:$0xff] %v4301_v57  ;;  %v4315_v4 = vpack.c.bf16 %v233_v2, %v232_v1  ;;  %v218_v21 = vmul.f32 8.0, %v186_v19  ;;  %v219_v22 = vmul.f32 8.0, %v187_v20  ;;  %v239_v28 = vld [vmem:[%s6522_s1 + $0x18] sm:$0xff]  ;;  %v241_v29 = vld [vmem:[%s6522_s1 + $0x28] sm:$0xff]  ;;  %v242_v30 = vld [vmem:[%s6522_s1 + $0x30] sm:$0xff] }
  0x29   : > { %3445 = vmatpush3.bf16.xpose.msk.msra.mxu0 %vm4231_vm1, %v4254_v25  ;;  %6591 = vst [vmem:[#allocation17_spill] sm:$0xff] %v4313_v3  ;;  %v4327_v15 = vpack.c.bf16 %v217_v11, %v216_v9  ;;  %v4329_v16 = vpack.c.bf16 %v235_v13, %v234_v12  ;;  %v243_v31 = vld [vmem:[%s6522_s1 + $0x38] sm:$0xff]  ;;  %v244_v32 = vld [vmem:[%s6522_s1 + $0x40] sm:$0xff]  ;;  %v245_v33 = vld [vmem:[%s6522_s1 + $0x48] sm:$0xff] }
  0x2a   : > { %3448 = vmatprep.subr.msk.bf16.mxu0 %vm4231_vm1, %v4259_v27  ;;  %6592 = vst [vmem:[#allocation18_spill] sm:$0xff] %v4315_v4  ;;  %v4339_v23 = vpack.c.bf16 %v219_v22, %v218_v21  ;;  %v246_v34 = vld [vmem:[%s6522_s1 + $0x50] sm:$0xff]  ;;  %v247_v35 = vld [vmem:[%s6522_s1 + $0x58] sm:$0xff]  ;;  %v248_v38 = vld [vmem:[%s6522_s1 + $0x60] sm:$0xff]  ;;  %v6525_v22 = vmov 0.0  }
  0x2b   : > { %6593 = vst [vmem:[#allocation19_spill] sm:$0xff] %v4327_v15  ;;  %6594 = vst [vmem:[#allocation20_spill] sm:$0xff] %v4329_v16  ;;  %v249_v39 = vld [vmem:[%s6522_s1 + $0x68] sm:$0xff]  ;;  %v250_v40 = vld [vmem:[%s6522_s1 + $0x70] sm:$0xff]  ;;  %860 = vmatprep.mubr.f32.mxu1 %v6525_v22 }
  0x2c   : > { %6595 = vst [vmem:[#allocation21_spill] sm:$0xff] %v4339_v23  ;;  %v251_v41 = vld [vmem:[%s6522_s1 + $0x78] sm:$0xff]  ;;  %v253_v42 = vld [vmem:[%s6523_s2 + $0x8] sm:$0xff]  ;;  %v254_v43 = vld [vmem:[%s6523_s2 + $0x10] sm:$0xff] }
  0x2d   : > { %765 = vxpose.xlu0.b32.cont [2/16] (narrow) %v253_v42, 64  ;;  %v255_v44 = vld [vmem:[%s6523_s2 + $0x18] sm:$0xff]  ;;  %v256_v45 = vld [vmem:[%s6523_s2 + $0x20] sm:$0xff]  ;;  %v257_v48 = vld [vmem:[%s6523_s2 + $0x28] sm:$0xff] }
  0x2e   : > { %v258_v49 = vld [vmem:[%s6523_s2 + $0x30] sm:$0xff]  ;;  %v259_v50 = vld [vmem:[%s6523_s2 + $0x38] sm:$0xff]  ;;  %v260_v51 = vld [vmem:[%s6523_s2 + $0x40] sm:$0xff] }
  0x2f   : > { %v261_v52 = vld [vmem:[%s6523_s2 + $0x48] sm:$0xff]  ;;  %v262_v53 = vld [vmem:[%s6523_s2 + $0x50] sm:$0xff]  ;;  %v263_v54 = vld [vmem:[%s6523_s2 + $0x58] sm:$0xff] }
  0x30   : > { %v264_v55 = vld [vmem:[%s6523_s2 + $0x60] sm:$0xff]  ;;  %v265_v58 = vld [vmem:[%s6523_s2 + $0x68] sm:$0xff]  ;;  %v266_v59 = vld [vmem:[%s6523_s2 + $0x70] sm:$0xff] }
  0x31   : > { %3451 = vmatpush3.bf16.xpose.msk.msra.mxu0 %vm4231_vm1, %v4271_v36  ;;  %766 = vxpose.xlu0.b32.cont [3/16] (narrow) %v254_v43, 64  ;;  %v267_v60 = vld [vmem:[%s6523_s2 + $0x78] sm:$0xff] }
  0x32   : > { %3454 = vmatprep.subr.msk.bf16.mxu0 %vm4231_vm1, %v4273_v37 }
  0x35   : > { %767 = vxpose.xlu0.b32.cont [4/16] (narrow) %v255_v44, 64 }
  0x39   : > { %3457 = vmatpush3.bf16.xpose.msk.msra.mxu0 %vm4231_vm1, %v4285_v46  ;;  %768 = vxpose.xlu0.b32.cont [5/16] (narrow) %v256_v45, 64 }
  0x3a   : > { %3460 = vmatprep.subr.msk.bf16.mxu0 %vm4231_vm1, %v4287_v47 }
  0x3d   : > { %769 = vxpose.xlu0.b32.cont [6/16] (narrow) %v257_v48, 64 }
  0x41   : > { %3463 = vmatpush3.bf16.xpose.msk.msra.mxu0 %vm4231_vm1, %v4299_v56  ;;  %770 = vxpose.xlu0.b32.cont [7/16] (narrow) %v258_v49, 64 }
  0x42   : > { %3466 = vmatprep.subr.msk.bf16.mxu0 %vm4231_vm1, %v4301_v57 }
  0x45   : > { %771 = vxpose.xlu0.b32.cont [8/16] (narrow) %v259_v50, 64 }
  0x49   : > { %3469 = vmatpush3.bf16.xpose.msk.msra.mxu0 %vm4231_vm1, %v4313_v3  ;;  %772 = vxpose.xlu0.b32.cont [9/16] (narrow) %v260_v51, 64 }
  0x4a   : > { %3472 = vmatprep.subr.msk.bf16.mxu0 %vm4231_vm1, %v4315_v4 }
  0x4d   : > { %773 = vxpose.xlu0.b32.cont [10/16] (narrow) %v261_v52, 64 }
  0x51   : > { %3475 = vmatpush3.bf16.xpose.msk.msra.mxu0 %vm4231_vm1, %v4327_v15  ;;  %774 = vxpose.xlu0.b32.cont [11/16] (narrow) %v262_v53, 64 }
  0x52   : > { %3478 = vmatprep.subr.msk.bf16.mxu0 %vm4231_vm1, %v4329_v16 }
  0x55   : > { %775 = vxpose.xlu0.b32.cont [12/16] (narrow) %v263_v54, 64 }
  0x59   : > { %3481 = vmatpush3.bf16.xpose.msk.msra.mxu0 %vm4231_vm1, %v4339_v23  ;;  %776 = vxpose.xlu0.b32.cont [13/16] (narrow) %v264_v55, 64 }
  0x5d   : > { %777 = vxpose.xlu0.b32.cont [14/16] (narrow) %v265_v58, 64 }
  0x60   : > { %3211 = vmatmul.mubr.msk.f32.vlgmr.msra.gmra.mrb[0].mxu0 %vm268_vm0, %v4214_v0  ;;  %v240_v0 = vld [vmem:[%s6522_s1 + $0x20] sm:$0xff] }
  0x61   : > { %3212 = vmatprep.mubr.msk.f32.mxu0 %vm268_vm0, %v237_v24  ;;  %778 = vxpose.xlu0.b32.cont [15/16] (narrow) %v266_v59, 64 }
  0x64   : > { %3213 = vmatmul.mubr.msk.f32.gmra.mrb[2].mxu0 %vm268_vm0, %v237_v24 }
  0x65   : > { %3214 = vmatprep.mubr.msk.f32.mxu0 %vm268_vm0, %v238_v26  ;;  %779 = vxpose.xlu0.b32.end [16/16] (narrow) %v267_v60, 64 }
  0x68   : > { %3215 = vmatmul.mubr.msk.f32.gmra.mrb[4].mxu0 %vm268_vm0, %v238_v26 }
  0x69   : > { %3216 = vmatprep.mubr.msk.f32.mxu0 %vm268_vm0, %v239_v28 }
  0x6c   : > { %3217 = vmatmul.mubr.msk.f32.gmra.mrb[6].mxu0 %vm268_vm0, %v239_v28 }
  0x6d   : > { %3218 = vmatprep.mubr.msk.f32.mxu0 %vm268_vm0, %v240_v0 }
  0x70   : > { %3219 = vmatmul.mubr.msk.f32.gmra.mrb[8].mxu0 %vm268_vm0, %v240_v0 }
  0x71   : > { %3220 = vmatprep.mubr.msk.f32.mxu0 %vm268_vm0, %v241_v29 }
  0x74   : > { %3221 = vmatmul.mubr.msk.f32.gmra.mrb[10].mxu0 %vm268_vm0, %v241_v29 }
  0x75   : > { %3222 = vmatprep.mubr.msk.f32.mxu0 %vm268_vm0, %v242_v30 }
  0x78   : > { %3223 = vmatmul.mubr.msk.f32.gmra.mrb[12].mxu0 %vm268_vm0, %v242_v30 }
  0x79   : > { %3224 = vmatprep.mubr.msk.f32.mxu0 %vm268_vm0, %v243_v31 }
  0x7c   : > { %3225 = vmatmul.mubr.msk.f32.gmra.mrb[14].mxu0 %vm268_vm0, %v243_v31 }
  0x7d   : > { %3226 = vmatprep.mubr.msk.f32.mxu0 %vm268_vm0, %v244_v32 }
  0x80   : > { %3227 = vmatmul.mubr.msk.f32.gmra.mrb[16].mxu0 %vm268_vm0, %v244_v32 }
  0x81   : > { %3228 = vmatprep.mubr.msk.f32.mxu0 %vm268_vm0, %v245_v33 }
  0x84   : > { %3229 = vmatmul.mubr.msk.f32.gmra.mrb[18].mxu0 %vm268_vm0, %v245_v33 }
  0x85   : > { %3230 = vmatprep.mubr.msk.f32.mxu0 %vm268_vm0, %v246_v34 }
  0x88   : > { %3231 = vmatmul.mubr.msk.f32.gmra.mrb[20].mxu0 %vm268_vm0, %v246_v34 }
  0x89   : > { %3232 = vmatprep.mubr.msk.f32.mxu0 %vm268_vm0, %v247_v35 }
  0x8c   : > { %3233 = vmatmul.mubr.msk.f32.gmra.mrb[22].mxu0 %vm268_vm0, %v247_v35 }
  0x8d   : > { %3234 = vmatprep.mubr.msk.f32.mxu0 %vm268_vm0, %v248_v38 }
  0x90   : > { %3235 = vmatmul.mubr.msk.f32.gmra.mrb[24].mxu0 %vm268_vm0, %v248_v38 }
  0x91   : > { %3236 = vmatprep.mubr.msk.f32.mxu0 %vm268_vm0, %v249_v39 }
  0x94   : > { %3237 = vmatmul.mubr.msk.f32.gmra.mrb[26].mxu0 %vm268_vm0, %v249_v39 }
  0x95   : > { %3238 = vmatprep.mubr.msk.f32.mxu0 %vm268_vm0, %v250_v40 }
  0x98   : > { %3239 = vmatmul.mubr.msk.f32.gmra.mrb[28].mxu0 %vm268_vm0, %v250_v40 }
  0x99   : > { %3240 = vmatprep.mubr.msk.f32.mxu0 %vm268_vm0, %v251_v41 }
  0x9c   : > { %3241 = vmatmul.mubr.msk.f32.gmra.mrb[30].mxu0 %vm268_vm0, %v251_v41 }
  0x9d   : > { %1456 = vmatprep.mubr.f32.mxu0 %v6525_v22 }
 0x133   : > { %v4466_v61 = vpop.f32.mrb[0].mxu0 }
 0x134   : > { %v4468_v62 = vpop.f32.mrb[1].mxu0 }
 0x137   : > { %v4470_v63 = vpop.f32.mrb[2].mxu0 }
 0x138   : > { %v4472_v1 = vpop.f32.mrb[3].mxu0 }
 0x13b   : > { %v4474_v2 = vpop.f32.mrb[4].mxu0 }
 0x13c   : > { %v574_v5 = vmax.f32 %v4466_v61, %v4474_v2  ;;  %v4478_v6 = vpop.f32.mrb[5].mxu0 }
 0x13d   : > { %v595_v7 = vmax.f32 %v4468_v62, %v4478_v6 }
 0x13f   : > { %v4482_v8 = vpop.f32.mrb[6].mxu0 }
 0x140   : > { %v575_v9 = vmax.f32 %v4470_v63, %v4482_v8  ;;  %v4486_v11 = vpop.f32.mrb[7].mxu0 }
 0x141   : > { %v596_v12 = vmax.f32 %v4472_v1, %v4486_v11 }
 0x143   : > { %v4490_v13 = vpop.f32.mrb[8].mxu0 }
 0x144   : > { %v576_v19 = vmax.f32 %v574_v5, %v4490_v13  ;;  %v4493_v20 = vpop.f32.mrb[9].mxu0 }
 0x145   : > { %v597_v21 = vmax.f32 %v595_v7, %v4493_v20 }
 0x147   : > { %v4498_v24 = vpop.f32.mrb[10].mxu0 }
 0x148   : > { %v577_v26 = vmax.f32 %v575_v9, %v4498_v24  ;;  %v4501_v28 = vpop.f32.mrb[11].mxu0 }
 0x149   : > { %v598_v0 = vmax.f32 %v596_v12, %v4501_v28 }
 0x14b   : > { %v4504_v29 = vpop.f32.mrb[12].mxu0 }
 0x14c   : > { %v578_v30 = vmax.f32 %v576_v19, %v4504_v29  ;;  %v4507_v31 = vpop.f32.mrb[13].mxu0 }
 0x14d   : > { %v599_v32 = vmax.f32 %v597_v21, %v4507_v31 }
 0x14f   : > { %v4510_v33 = vpop.f32.mrb[14].mxu0 }
 0x150   : > { %v579_v34 = vmax.f32 %v577_v26, %v4510_v33  ;;  %v4513_v35 = vpop.f32.mrb[15].mxu0 }
 0x151   : > { %v600_v38 = vmax.f32 %v598_v0, %v4513_v35 }
 0x153   : > { %v4516_v39 = vpop.f32.mrb[16].mxu0 }
 0x154   : > { %v580_v40 = vmax.f32 %v578_v30, %v4516_v39  ;;  %v4519_v41 = vpop.f32.mrb[17].mxu0 }
 0x155   : > { %v601_v42 = vmax.f32 %v599_v32, %v4519_v41 }
 0x157   : > { %v4522_v43 = vpop.f32.mrb[18].mxu0 }
 0x158   : > { %v581_v44 = vmax.f32 %v579_v34, %v4522_v43  ;;  %v4525_v45 = vpop.f32.mrb[19].mxu0 }
 0x159   : > { %v602_v48 = vmax.f32 %v600_v38, %v4525_v45 }
 0x15b   : > { %v4528_v49 = vpop.f32.mrb[20].mxu0 }
 0x15c   : > { %v582_v50 = vmax.f32 %v580_v40, %v4528_v49  ;;  %v4531_v51 = vpop.f32.mrb[21].mxu0 }
 0x15d   : > { %v603_v52 = vmax.f32 %v601_v42, %v4531_v51 }
 0x15f   : > { %v4534_v53 = vpop.f32.mrb[22].mxu0 }
 0x160   : > { %v583_v54 = vmax.f32 %v581_v44, %v4534_v53  ;;  %v4537_v55 = vpop.f32.mrb[23].mxu0 }
 0x161   : > { %v604_v58 = vmax.f32 %v602_v48, %v4537_v55 }
 0x163   : > { %v4540_v59 = vpop.f32.mrb[24].mxu0 }
 0x164   : > { %v584_v60 = vmax.f32 %v582_v50, %v4540_v59  ;;  %v4543_v5 = vpop.f32.mrb[25].mxu0 }
 0x165   : > { %v605_v7 = vmax.f32 %v603_v52, %v4543_v5 }
 0x167   : > { %v4546_v9 = vpop.f32.mrb[26].mxu0 }
 0x168   : > { %v585_v12 = vmax.f32 %v583_v54, %v4546_v9  ;;  %v4549_v19 = vpop.f32.mrb[27].mxu0 }
 0x169   : > { %v606_v21 = vmax.f32 %v604_v58, %v4549_v19 }
 0x16b   : > { %v4552_v26 = vpop.f32.mrb[28].mxu0 }
 0x16c   : > { %v586_v0 = vmax.f32 %v584_v60, %v4552_v26  ;;  %v4555_v30 = vpop.f32.mrb[29].mxu0 }
 0x16d   : > { %v607_v32 = vmax.f32 %v605_v7, %v4555_v30 }
 0x16f   : > { %v569_v34 = vpop.f32.mrb[30].mxu0 }
 0x170   : > { %v587_v38 = vmax.f32 %v585_v12, %v569_v34  ;;  %v571_v40 = vpop.f32.mrb[31].mxu0 }
 0x171   : > { %v608_v42 = vmax.f32 %v606_v21, %v571_v40 }
 0x172   : > { %v588_v44 = vmax.f32 %v586_v0, %v587_v38 }
 0x173   : > { %v609_v48 = vmax.f32 %v607_v32, %v608_v42 }
 0x174   : > { %v589_v50 = vrot.slane %v588_v44, 4 }
 0x175   : > { %v610_v52 = vrot.slane %v609_v48, 4 }
 0x176   : > { %v590_v54 = vmax.f32 %v588_v44, %v589_v50 }
 0x177   : > { %v611_v22 = vmax.f32 %v609_v48, %v610_v52 }
 0x178   : > { %v591_v23 = vrot.slane %v590_v54, 2 }
 0x179   : > { %v612_v58 = vrot.slane %v611_v22, 2 }
 0x17a   : > { %v592_v16 = vmax.f32 %v590_v54, %v591_v23 }
 0x17b   : > { %v613_v15 = vmax.f32 %v611_v22, %v612_v58 }
 0x17c   : > { %v593_v4 = vrot.slane %v592_v16, 1 }
 0x17d   : > { %v614_v60 = vrot.slane %v613_v15, 1 }
 0x17e   : > { %v4558_v3 = vmax.f32 %v592_v16, %v593_v4 }
 0x17f   : > { %v4560_v57 = vmax.f32 %v613_v15, %v614_v60 }
 0x180   : > { %v652_v7 = vsub.f32 %v569_v34, %v4558_v3 }
 0x181   : > { %v653_v12 = vsub.f32 %v571_v40, %v4560_v57  ;;  %v623_v0 = vsub.f32 %v4468_v62, %v4560_v57  ;;  %v625_v32 = vsub.f32 %v4472_v1, %v4560_v57  ;;  %v627_v23 = vsub.f32 %v4478_v6, %v4560_v57 }
 0x182   : > { %v714_v21 = vmul.f32 1.442695, %v652_v7  ;;  %v629_v4 = vsub.f32 %v4486_v11, %v4560_v57  ;;  %v631_v15 = vsub.f32 %v4493_v20, %v4560_v57  ;;  %v633_v16 = vsub.f32 %v4501_v28, %v4560_v57 }
 0x183   : > { %v716_v22 = vmul.f32 1.442695, %v653_v12  ;;  %v635_v34 = vsub.f32 %v4507_v31, %v4560_v57  ;;  %v656_v62 = vmul.f32 1.442695, %v623_v0  ;;  %v660_v38 = vmul.f32 1.442695, %v625_v32 }
 0x184   : > { %3797 = vpow2.f32 %v714_v21  ;;  %v664_v1 = vmul.f32 1.442695, %v627_v23  ;;  %v637_v6 = vsub.f32 %v4513_v35, %v4560_v57  ;;  %v668_v40 = vmul.f32 1.442695, %v629_v4 }
 0x185   : > { %3799 = vpow2.f32 %v716_v22  ;;  %v639_v11 = vsub.f32 %v4519_v41, %v4560_v57  ;;  %v672_v20 = vmul.f32 1.442695, %v631_v15  ;;  %v641_v28 = vsub.f32 %v4525_v45, %v4560_v57 }
 0x186   : > { %3801 = vpow2.f32 %v656_v62  ;;  %v676_v42 = vmul.f32 1.442695, %v633_v16  ;;  %v643_v31 = vsub.f32 %v4531_v51, %v4560_v57  ;;  %v680_v44 = vmul.f32 1.442695, %v635_v34 }
 0x187   : > { %3803 = vpow2.f32 %v660_v38  ;;  %v645_v48 = vsub.f32 %v4537_v55, %v4560_v57  ;;  %v684_v35 = vmul.f32 1.442695, %v637_v6  ;;  %v647_v41 = vsub.f32 %v4543_v5, %v4560_v57 }
 0x188   : > { %3805 = vpow2.f32 %v664_v1  ;;  %v688_v50 = vmul.f32 1.442695, %v639_v11  ;;  %v649_v45 = vsub.f32 %v4549_v19, %v4560_v57  ;;  %v692_v52 = vmul.f32 1.442695, %v641_v28 }
 0x189   : > { %3807 = vpow2.f32 %v668_v40  ;;  %v651_v51 = vsub.f32 %v4555_v30, %v4560_v57  ;;  %v696_v54 = vmul.f32 1.442695, %v643_v31  ;;  %v700_v58 = vmul.f32 1.442695, %v645_v48 }
 0x18a   : > { %3809 = vpow2.f32 %v672_v20  ;;  %v622_v55 = vsub.f32 %v4466_v61, %v4558_v3  ;;  %v704_v5 = vmul.f32 1.442695, %v647_v41  ;;  %v624_v7 = vsub.f32 %v4470_v63, %v4558_v3 }
 0x18b   : > { %3811 = vpow2.f32 %v676_v42  ;;  %v708_v12 = vmul.f32 1.442695, %v649_v45  ;;  %v626_v30 = vsub.f32 %v4474_v2, %v4558_v3  ;;  %v712_v0 = vmul.f32 1.442695, %v651_v51 }
 0x18c   : > { %3813 = vpow2.f32 %v680_v44  ;;  %v628_v61 = vsub.f32 %v4482_v8, %v4558_v3  ;;  %v630_v23 = vsub.f32 %v4490_v13, %v4558_v3  ;;  %v632_v63 = vsub.f32 %v4498_v24, %v4558_v3 }
 0x18d   : > { %3815 = vpow2.f32 %v684_v35  ;;  %v654_v22 = vmul.f32 1.442695, %v622_v55  ;;  %v658_v16 = vmul.f32 1.442695, %v624_v7  ;;  %v634_v8 = vsub.f32 %v4504_v29, %v4558_v3 }
 0x18e   : > { %v4596_v60 = vpop.eup %3797  ;;  %3817 = vpow2.f32 %v688_v50  ;;  %v636_v62 = vsub.f32 %v4510_v33, %v4558_v3  ;;  %v662_v13 = vmul.f32 1.442695, %v626_v30  ;;  %v666_v1 = vmul.f32 1.442695, %v628_v61 }
 0x18f   : > { %v4600_v19 = vpop.eup %3799  ;;  %3819 = vpow2.f32 %v692_v52  ;;  %v638_v11 = vsub.f32 %v4516_v39, %v4558_v3  ;;  %v640_v29 = vsub.f32 %v4522_v43, %v4558_v3  ;;  %v670_v33 = vmul.f32 1.442695, %v630_v23 }
 0x190   : > { %v3802_v21 = vpop.eup %3801  ;;  %3821 = vpow2.f32 %v696_v54  ;;  %v674_v42 = vmul.f32 1.442695, %v632_v63  ;;  %v642_v48 = vsub.f32 %v4528_v49, %v4558_v3  ;;  %v644_v39 = vsub.f32 %v4534_v53, %v4558_v3 }
 0x191   : > { %v3804_v32 = vpop.eup %3803  ;;  %3823 = vpow2.f32 %v700_v58  ;;  %v678_v43 = vmul.f32 1.442695, %v634_v8  ;;  %v682_v50 = vmul.f32 1.442695, %v636_v62  ;;  %v646_v51 = vsub.f32 %v4540_v59, %v4558_v3 }
 0x192   : > { %v4610_v4 = vpop.eup %3805  ;;  %3825 = vpow2.f32 %v704_v5  ;;  %v741_v15 = vadd.f32 %v3804_v32, %v3802_v21  ;;  %v3482_v2 = vpack.c.bf16 %v3804_v32, %v3802_v21  ;;  %v648_v49 = vsub.f32 %v4546_v9, %v4558_v3 }
 0x193   : > { %v4612_v34 = vpop.eup %3807  ;;  %3827 = vpow2.f32 %v708_v12  ;;  %v686_v53 = vmul.f32 1.442695, %v638_v11  ;;  %v690_v55 = vmul.f32 1.442695, %v640_v29  ;;  %v650_v12 = vsub.f32 %v4552_v26, %v4558_v3 }
 0x194   : > { %v4618_v38 = vpop.eup %3809  ;;  %3829 = vpow2.f32 %v712_v0  ;;  %v742_v24 = vadd.f32 %v4610_v4, %v741_v15  ;;  %3483 = vmatprep.subr.bf16.mxu1 %v3482_v2  ;;  %v3486_v6 = vpack.c.bf16 %v4612_v34, %v4610_v4  ;;  %v694_v59 = vmul.f32 1.442695, %v642_v48 }
 0x195   : > { %v4623_v40 = vpop.eup %3811  ;;  %3831 = vpow2.f32 %v654_v22  ;;  %v698_v21 = vmul.f32 1.442695, %v644_v39  ;;  %v702_v32 = vmul.f32 1.442695, %v646_v51  ;;  %v706_v26 = vmul.f32 1.442695, %v648_v49 }
 0x196   : > { %v4629_v20 = vpop.eup %3813  ;;  %v743_v28 = vadd.f32 %v4612_v34, %v742_v24  ;;  %3833 = vpow2.f32 %v658_v16  ;;  %v3490_v31 = vpack.c.bf16 %v4623_v40, %v4618_v38  ;;  %v710_v2 = vmul.f32 1.442695, %v650_v12 }
 0x197   : > { %v4634_v44 = vpop.eup %3815  ;;  %3835 = vpow2.f32 %v662_v13 }
 0x198   : > { %v4640_v35 = vpop.eup %3817  ;;  %v744_v41 = vadd.f32 %v4618_v38, %v743_v28  ;;  %3837 = vpow2.f32 %v666_v1  ;;  %v3494_v45 = vpack.c.bf16 %v4634_v44, %v4629_v20 }
 0x199   : > { %v4645_v52 = vpop.eup %3819  ;;  %3839 = vpow2.f32 %v670_v33 }
 0x19a   : > { %v4651_v54 = vpop.eup %3821  ;;  %v745_v58 = vadd.f32 %v4623_v40, %v744_v41  ;;  %3841 = vpow2.f32 %v674_v42  ;;  %v3498_v5 = vpack.c.bf16 %v4645_v52, %v4640_v35 }
 0x19b   : > { %v4656_v7 = vpop.eup %3823  ;;  %3843 = vpow2.f32 %v678_v43 }
 0x19c   : > { %v4660_v30 = vpop.eup %3825  ;;  %v746_v9 = vadd.f32 %v4629_v20, %v745_v58  ;;  %3845 = vpow2.f32 %v682_v50  ;;  %v3502_v0 = vpack.c.bf16 %v4656_v7, %v4651_v54 }
 0x19d   : > { %v4665_v61 = vpop.eup %3827  ;;  %3847 = vpow2.f32 %v686_v53 }
 0x19e   : > { %v4667_v23 = vpop.eup %3829  ;;  %v747_v63 = vadd.f32 %v4634_v44, %v746_v9  ;;  %3849 = vpow2.f32 %v690_v55  ;;  %v3506_v22 = vpack.c.bf16 %v4665_v61, %v4660_v30 }
 0x19f   : > { %v3832_v15 = vpop.eup %3831  ;;  %3851 = vpow2.f32 %v694_v59  ;;  %v3510_v16 = vpack.c.bf16 %v4600_v19, %v4667_v23 }
 0x1a0   : > { %v3834_v8 = vpop.eup %3833  ;;  %v748_v62 = vadd.f32 %v4640_v35, %v747_v63  ;;  %3853 = vpow2.f32 %v698_v21 }
 0x1a1   : > { %v3836_v13 = vpop.eup %3835  ;;  %3855 = vpow2.f32 %v702_v32  ;;  %v720_v24 = vadd.f32 %v3834_v8, %v3832_v15  ;;  %v3484_v1 = vpack.c.bf16 %v3834_v8, %v3832_v15 }
 0x1a2   : > { %v3838_v11 = vpop.eup %3837  ;;  %v749_v29 = vadd.f32 %v4645_v52, %v748_v62  ;;  %3857 = vpow2.f32 %v706_v26 }
 0x1a3   : > { %v3840_v33 = vpop.eup %3839  ;;  %3859 = vpow2.f32 %v710_v2  ;;  %v721_v28 = vadd.f32 %v3836_v13, %v720_v24  ;;  %3485 = vmatpush1.bf16.msra.mxu1 %v3484_v1  ;;  %v3488_v42 = vpack.c.bf16 %v3838_v11, %v3836_v13  ;;  %v780_v1 = vpop.trf.xlu0 }
 0x1a4   : > { %v3842_v48 = vpop.eup %3841  ;;  %v750_v39 = vadd.f32 %v4651_v54, %v749_v29  ;;  %3487 = vmatprep.subr.bf16.mxu1 %v3486_v6  ;;  %v6597_v54 = vmov 0.0  }
 0x1a5   : > { %v3844_v43 = vpop.eup %3843  ;;  %v722_v41 = vadd.f32 %v3838_v11, %v721_v28  ;;  %v3492_v50 = vpack.c.bf16 %v3842_v48, %v3840_v33  ;;  %v6602_v28 = vld [vmem:[#allocation20_spill] sm:$0xff] }
 0x1a6   : > { %v3846_v51 = vpop.eup %3845  ;;  %v751_v49 = vadd.f32 %v4656_v7, %v750_v39  ;;  %v2934_v39 = vld [vmem:[%s6522_s1 + $0x90] sm:$0xff] }
 0x1a7   : > { %v3848_v53 = vpop.eup %3847  ;;  %v723_v58 = vadd.f32 %v3840_v33, %v722_v41  ;;  %3489 = vmatpush1.bf16.msra.mxu1 %v3488_v42  ;;  %v3496_v55 = vpack.c.bf16 %v3846_v51, %v3844_v43  ;;  %v6603_v42 = vld [vmem:[#allocation21_spill] sm:$0xff] }
 0x1a8   : > { %v3850_v12 = vpop.eup %3849  ;;  %v752_v59 = vadd.f32 %v4660_v30, %v751_v49  ;;  %3491 = vmatprep.subr.bf16.mxu1 %v3490_v31  ;;  %v2936_v41 = vld [vmem:[%s6522_s1 + $0xa0] sm:$0xff]  ;;  %v2939_v49 = vld [vmem:[%s6522_s1 + $0xb8] sm:$0xff] }
 0x1a9   : > { %v3852_v9 = vpop.eup %3851  ;;  %v724_v4 = vadd.f32 %v3842_v48, %v723_v58  ;;  %v3500_v34 = vpack.c.bf16 %v3850_v12, %v3848_v53  ;;  %v2933_v48 = vld [vmem:[%s6522_s1 + $0x88] sm:$0xff] }
 0x1aa   : > { %v3854_v6 = vpop.eup %3853  ;;  %v753_v21 = vadd.f32 %v4665_v61, %v752_v59  ;;  %v6598_v61 = vld [vmem:[#allocation16_spill] sm:$0xff]  ;;  %v2941_v58 = vld [vmem:[%s6522_s1 + $0xc8] sm:$0xff]  ;;  %v2944_v59 = vld [vmem:[%s6522_s1 + $0xe0] sm:$0xff] }
 0x1ab   : > { %v3856_v32 = vpop.eup %3855  ;;  %v725_v63 = vadd.f32 %v3844_v43, %v724_v4  ;;  %3493 = vmatpush1.bf16.msra.mxu1 %v3492_v50  ;;  %v3504_v26 = vpack.c.bf16 %v3854_v6, %v3852_v9  ;;  %v2935_v43 = vld [vmem:[%s6522_s1 + $0x98] sm:$0xff]  ;;  %v2937_v50 = vld [vmem:[%s6522_s1 + $0xa8] sm:$0xff] }
 0x1ac   : > { %v3858_v15 = vpop.eup %3857  ;;  %v754_v2 = vadd.f32 %v4667_v23, %v753_v21  ;;  %3495 = vmatprep.subr.bf16.mxu1 %v3494_v45  ;;  %v781_v45 = vpop.trf.xlu0  ;;  %v6599_v23 = vld [vmem:[#allocation17_spill] sm:$0xff]  ;;  %v2945_v4 = vld [vmem:[%s6522_s1 + $0xe8] sm:$0xff] }
 0x1ad   : > { %v3860_v8 = vpop.eup %3859  ;;  %v726_v38 = vadd.f32 %v3846_v51, %v725_v63  ;;  %v3508_v40 = vpack.c.bf16 %v3858_v15, %v3856_v32  ;;  %v2938_v51 = vld [vmem:[%s6522_s1 + $0xb0] sm:$0xff]  ;;  %v3012_v21 = vld [vmem:[%s6522_s1 + $0x100] sm:$0xff] }
 0x1ae   : > { %v4691_v31 = vadd.f32 %v4600_v19, %v754_v2  ;;  %v3512_v62 = vpack.c.bf16 %v4596_v60, %v3860_v8  ;;  %v3014_v63 = vld [vmem:[%s6522_s1 + $0x110] sm:$0xff]  ;;  %v3017_v2 = vld [vmem:[%s6522_s1 + $0x128] sm:$0xff] }
 0x1af   : > { %v727_v13 = vadd.f32 %v3848_v53, %v726_v38  ;;  %3497 = vmatpush1.bf16.msra.mxu1 %v3496_v55  ;;  %v2940_v53 = vld [vmem:[%s6522_s1 + $0xc0] sm:$0xff]  ;;  %v2942_v55 = vld [vmem:[%s6522_s1 + $0xd0] sm:$0xff]  ;;  %v2949_v38 = vld [vmem:[%s6523_s2 + $0x88] sm:$0xff] }
 0x1b0   : > { %6596 = vst [vmem:[#allocation22_spill] sm:$0xff] %v4691_v31  ;;  %3499 = vmatprep.subr.bf16.mxu1 %v3498_v5  ;;  %v782_v52 = vpop.trf.xlu0 }
 0x1b1   : > { %v728_v24 = vadd.f32 %v3850_v12, %v727_v13  ;;  %v2943_v12 = vld [vmem:[%s6522_s1 + $0xd8] sm:$0xff]  ;;  %v3020_v13 = vld [vmem:[%s6522_s1 + $0x140] sm:$0xff] }
 0x1b3   : > { %v729_v11 = vadd.f32 %v3852_v9, %v728_v24  ;;  %3501 = vmatpush1.bf16.msra.mxu1 %v3500_v34  ;;  %v2948_v9 = vld [vmem:[%s6523_s2 + $0x80] sm:$0xff]  ;;  %v2946_v34 = vld [vmem:[%s6522_s1 + $0xf0] sm:$0xff]  ;;  %v2951_v24 = vld [vmem:[%s6523_s2 + $0x98] sm:$0xff] }
 0x1b4   : > { %3503 = vmatprep.subr.bf16.mxu1 %v3502_v0  ;;  %v783_v5 = vpop.trf.xlu0  ;;  %v2932_v0 = vld [vmem:[%s6522_s1 + $0x80] sm:$0xff]  ;;  %1360 = vxpose.xlu1.b32.start [1/16] (narrow) %v2948_v9, 64 }
 0x1b5   : > { %v730_v20 = vadd.f32 %v3854_v6, %v729_v11  ;;  %v2947_v6 = vld [vmem:[%s6522_s1 + $0xf8] sm:$0xff]  ;;  %v2952_v11 = vld [vmem:[%s6523_s2 + $0xa0] sm:$0xff] }
 0x1b7   : > { %v731_v44 = vadd.f32 %v3856_v32, %v730_v20  ;;  %3505 = vmatpush1.bf16.msra.mxu1 %v3504_v26  ;;  %v3013_v32 = vld [vmem:[%s6522_s1 + $0x108] sm:$0xff]  ;;  %v3015_v26 = vld [vmem:[%s6522_s1 + $0x118] sm:$0xff]  ;;  %v3022_v20 = vld [vmem:[%s6522_s1 + $0x150] sm:$0xff] }
 0x1b8   : > { %3507 = vmatprep.subr.bf16.mxu1 %v3506_v22  ;;  %v6600_v22 = vld [vmem:[#allocation18_spill] sm:$0xff]  ;;  %1361 = vxpose.xlu1.b32.cont [2/16] (narrow) %v2949_v38, 64  ;;  %v3030_v38 = vld [vmem:[%s6523_s2 + $0x110] sm:$0xff] }
 0x1b9   : > { %v732_v29 = vadd.f32 %v3858_v15, %v731_v44  ;;  %v3016_v15 = vld [vmem:[%s6522_s1 + $0x120] sm:$0xff]  ;;  %v2953_v44 = vld [vmem:[%s6523_s2 + $0xa8] sm:$0xff] }
 0x1bb   : > { %v733_v33 = vadd.f32 %v3860_v8, %v732_v29  ;;  %3509 = vmatpush1.bf16.msra.mxu1 %v3508_v40  ;;  %v3018_v8 = vld [vmem:[%s6522_s1 + $0x130] sm:$0xff]  ;;  %v3019_v40 = vld [vmem:[%s6522_s1 + $0x138] sm:$0xff] }
 0x1bc   : > { %3511 = vmatprep.subr.bf16.mxu1 %v3510_v16  ;;  %v6601_v16 = vld [vmem:[#allocation19_spill] sm:$0xff] }
 0x1bd   : > { %v4707_v35 = vadd.f32 %v4596_v60, %v733_v33  ;;  %v784_v60 = vpop.trf.xlu0  ;;  %v2954_v29 = vld [vmem:[%s6523_s2 + $0xb0] sm:$0xff]  ;;  %v3024_v33 = vld [vmem:[%s6522_s1 + $0x160] sm:$0xff] }
 0x1bf   : > { %3513 = vmatpush1.bf16.msra.mxu1 %v3512_v62  ;;  %v2950_v62 = vld [vmem:[%s6523_s2 + $0x90] sm:$0xff] }
 0x1c0   : > { %3516 = vmatprep.subr.msk.bf16.mxu1 %vm4231_vm1, %v4235_v14  ;;  %1362 = vxpose.xlu1.b32.cont [3/16] (narrow) %v2950_v62, 64  ;;  %v3032_v62 = vld [vmem:[%s6523_s2 + $0x120] sm:$0xff] }
 0x1c1   : > { %v785_v19 = vpop.trf.xlu0 }
 0x1c2   : > { %861 = vmatmul.mubr.f32.vlgmr.msra.gmra.mrb[0].mxu1 %v780_v1  ;;  %v3021_v1 = vld [vmem:[%s6522_s1 + $0x148] sm:$0xff] }
 0x1c3   : > { %866 = vmatprep.mubr.f32.mxu1 %v6597_v54 }
 0x1c4   : > { %1363 = vxpose.xlu1.b32.cont [4/16] (narrow) %v2951_v24, 64  ;;  %v3034_v24 = vld [vmem:[%s6523_s2 + $0x130] sm:$0xff] }
 0x1c5   : > { %v786_v7 = vpop.trf.xlu0 }
 0x1c6   : > { %867 = vmatmul.mubr.f32.gmra.mrb[2].mxu1 %v781_v45  ;;  %v3023_v45 = vld [vmem:[%s6522_s1 + $0x158] sm:$0xff] }
 0x1c7   : > { %872 = vmatprep.mubr.f32.mxu1 %v6597_v54 }
 0x1c8   : > { %3519 = vmatpush3.bf16.xpose.msk.msra.mxu1 %vm4231_vm1, %v4239_v17  ;;  %1364 = vxpose.xlu1.b32.cont [5/16] (narrow) %v2952_v11, 64 }
 0x1c9   : > { %3522 = vmatprep.subr.msk.bf16.mxu1 %vm4231_vm1, %v4241_v18  ;;  %v787_v30 = vpop.trf.xlu0 }
 0x1ca   : > { %873 = vmatmul.mubr.f32.gmra.mrb[4].mxu1 %v782_v52  ;;  %v2955_v52 = vld [vmem:[%s6523_s2 + $0xb8] sm:$0xff] }
 0x1cb   : > { %878 = vmatprep.mubr.f32.mxu1 %v6597_v54 }
 0x1cc   : > { %1365 = vxpose.xlu1.b32.cont [6/16] (narrow) %v2953_v44, 64 }
 0x1ce   : > { %879 = vmatmul.mubr.f32.gmra.mrb[6].mxu1 %v783_v5  ;;  %v3025_v5 = vld [vmem:[%s6522_s1 + $0x168] sm:$0xff] }
 0x1cf   : > { %884 = vmatprep.mubr.f32.mxu1 %v6597_v54 }
 0x1d0   : > { %3525 = vmatpush3.bf16.xpose.msk.msra.mxu1 %vm4231_vm1, %v4254_v25  ;;  %1366 = vxpose.xlu1.b32.cont [7/16] (narrow) %v2954_v29, 64  ;;  %v3037_v29 = vld [vmem:[%s6523_s2 + $0x148] sm:$0xff] }
 0x1d1   : > { %3528 = vmatprep.subr.msk.bf16.mxu1 %vm4231_vm1, %v4259_v27 }
 0x1d2   : > { %885 = vmatmul.mubr.f32.gmra.mrb[8].mxu1 %v784_v60  ;;  %v2956_v60 = vld [vmem:[%s6523_s2 + $0xc0] sm:$0xff] }
 0x1d3   : > { %890 = vmatprep.mubr.f32.mxu1 %v6597_v54 }
 0x1d4   : > { %1367 = vxpose.xlu1.b32.cont [8/16] (narrow) %v2955_v52, 64 }
 0x1d6   : > { %891 = vmatmul.mubr.f32.gmra.mrb[10].mxu1 %v785_v19  ;;  %v3026_v19 = vld [vmem:[%s6522_s1 + $0x170] sm:$0xff] }
 0x1d7   : > { %896 = vmatprep.mubr.f32.mxu1 %v6597_v54 }
 0x1d8   : > { %3531 = vmatpush3.bf16.xpose.msk.msra.mxu1 %vm4231_vm1, %v4271_v36  ;;  %1368 = vxpose.xlu1.b32.cont [9/16] (narrow) %v2956_v60, 64 }
 0x1d9   : > { %3534 = vmatprep.subr.msk.bf16.mxu1 %vm4231_vm1, %v4273_v37 }
 0x1da   : > { %897 = vmatmul.mubr.f32.gmra.mrb[12].mxu1 %v786_v7  ;;  %v2957_v7 = vld [vmem:[%s6523_s2 + $0xc8] sm:$0xff] }
 0x1db   : > { %902 = vmatprep.mubr.f32.mxu1 %v6597_v54 }
 0x1dc   : > { %1369 = vxpose.xlu1.b32.cont [10/16] (narrow) %v2957_v7, 64 }
 0x1de   : > { %903 = vmatmul.mubr.f32.gmra.mrb[14].mxu1 %v787_v30  ;;  %v3027_v30 = vld [vmem:[%s6522_s1 + $0x178] sm:$0xff] }
 0x1df   : > { %3274 = vmatprep.mubr.msk.f32.mxu1 %vm268_vm0, %v2932_v0 }
 0x1e0   : > { %3537 = vmatpush3.bf16.xpose.msk.msra.mxu1 %vm4231_vm1, %v4285_v46 }
 0x1e1   : > { %3540 = vmatprep.subr.msk.bf16.mxu1 %vm4231_vm1, %v4287_v47 }
 0x1e8   : > { %3543 = vmatpush3.bf16.xpose.msk.msra.mxu1 %vm4231_vm1, %v4299_v56 }
 0x1e9   : > { %3546 = vmatprep.subr.msk.bf16.mxu1 %vm4231_vm1, %v6598_v61 }
 0x1f0   : > { %3549 = vmatpush3.bf16.xpose.msk.msra.mxu1 %vm4231_vm1, %v6599_v23 }
 0x1f1   : > { %3552 = vmatprep.subr.msk.bf16.mxu1 %vm4231_vm1, %v6600_v22 }
 0x1f8   : > { %3555 = vmatpush3.bf16.xpose.msk.msra.mxu1 %vm4231_vm1, %v6601_v16 }
 0x1f9   : > { %3558 = vmatprep.subr.msk.bf16.mxu1 %vm4231_vm1, %v6602_v28 }
 0x200   : > { %3561 = vmatpush3.bf16.xpose.msk.msra.mxu1 %vm4231_vm1, %v6603_v42 }
 0x201   : > { %3596 = vmatprep.subr.msk.bf16.mxu1 %vm4231_vm1, %v4235_v14 }
 0x207   : > { %3275 = vmatmul.mubr.msk.f32.vlgmr.msra.gmra.mrb[16].mxu1 %vm268_vm0, %v2932_v0  ;;  %v2958_v0 = vld [vmem:[%s6523_s2 + $0xd0] sm:$0xff] }
 0x208   : > { %3599 = vmatpush3.bf16.xpose.msk.msra.mxu1 %vm4231_vm1, %v4239_v17  ;;  %3276 = vmatprep.mubr.msk.f32.mxu1 %vm268_vm0, %v2933_v48 }
 0x209   : > { %3602 = vmatprep.subr.msk.bf16.mxu1 %vm4231_vm1, %v4241_v18  ;;  %1370 = vxpose.xlu1.b32.cont [11/16] (narrow) %v2958_v0, 64  ;;  %v3039_v0 = vld [vmem:[%s6523_s2 + $0x158] sm:$0xff] }
 0x20b   : > { %3277 = vmatmul.mubr.msk.f32.gmra.mrb[18].mxu1 %vm268_vm0, %v2933_v48  ;;  %v2959_v48 = vld [vmem:[%s6523_s2 + $0xd8] sm:$0xff] }
 0x20c   : > { %3278 = vmatprep.mubr.msk.f32.mxu1 %vm268_vm0, %v2934_v39 }
 0x20d   : > { %1371 = vxpose.xlu1.b32.cont [12/16] (narrow) %v2959_v48, 64 }
 0x20f   : > { %3279 = vmatmul.mubr.msk.f32.gmra.mrb[20].mxu1 %vm268_vm0, %v2934_v39  ;;  %v2960_v39 = vld [vmem:[%s6523_s2 + $0xe0] sm:$0xff] }
 0x210   : > { %3605 = vmatpush3.bf16.xpose.msk.msra.mxu1 %vm4231_vm1, %v4254_v25  ;;  %3280 = vmatprep.mubr.msk.f32.mxu1 %vm268_vm0, %v2935_v43 }
 0x211   : > { %3608 = vmatprep.subr.msk.bf16.mxu1 %vm4231_vm1, %v4259_v27  ;;  %1372 = vxpose.xlu1.b32.cont [13/16] (narrow) %v2960_v39, 64 }
 0x213   : > { %3281 = vmatmul.mubr.msk.f32.gmra.mrb[22].mxu1 %vm268_vm0, %v2935_v43  ;;  %v2961_v43 = vld [vmem:[%s6523_s2 + $0xe8] sm:$0xff] }
 0x214   : > { %3282 = vmatprep.mubr.msk.f32.mxu1 %vm268_vm0, %v2936_v41 }
 0x215   : > { %1373 = vxpose.xlu1.b32.cont [14/16] (narrow) %v2961_v43, 64 }
 0x217   : > { %3283 = vmatmul.mubr.msk.f32.gmra.mrb[24].mxu1 %vm268_vm0, %v2936_v41  ;;  %v2962_v41 = vld [vmem:[%s6523_s2 + $0xf0] sm:$0xff] }
 0x218   : > { %3611 = vmatpush3.bf16.xpose.msk.msra.mxu1 %vm4231_vm1, %v4271_v36  ;;  %3284 = vmatprep.mubr.msk.f32.mxu1 %vm268_vm0, %v2937_v50 }
 0x219   : > { %3614 = vmatprep.subr.msk.bf16.mxu1 %vm4231_vm1, %v4273_v37  ;;  %1374 = vxpose.xlu1.b32.cont [15/16] (narrow) %v2962_v41, 64 }
 0x21b   : > { %3285 = vmatmul.mubr.msk.f32.gmra.mrb[26].mxu1 %vm268_vm0, %v2937_v50  ;;  %v2963_v50 = vld [vmem:[%s6523_s2 + $0xf8] sm:$0xff] }
 0x21c   : > { %3286 = vmatprep.mubr.msk.f32.mxu1 %vm268_vm0, %v2938_v51 }
 0x21d   : > { %1375 = vxpose.xlu1.b32.end [16/16] (narrow) %v2963_v50, 64  ;;  %v3040_v50 = vld [vmem:[%s6523_s2 + $0x160] sm:$0xff] }
 0x21f   : > { %3287 = vmatmul.mubr.msk.f32.gmra.mrb[28].mxu1 %vm268_vm0, %v2938_v51 }
 0x220   : > { %3617 = vmatpush3.bf16.xpose.msk.msra.mxu1 %vm4231_vm1, %v4285_v46  ;;  %3288 = vmatprep.mubr.msk.f32.mxu1 %vm268_vm0, %v2939_v49 }
 0x221   : > { %3620 = vmatprep.subr.msk.bf16.mxu1 %vm4231_vm1, %v4287_v47 }
 0x223   : > { %3289 = vmatmul.mubr.msk.f32.gmra.mrb[30].mxu1 %vm268_vm0, %v2939_v49 }
 0x224   : > { %3290 = vmatprep.mubr.msk.f32.mxu1 %vm268_vm0, %v2940_v53 }
 0x227   : > { %3291 = vmatmul.mubr.msk.f32.gmra.mrb[32].mxu1 %vm268_vm0, %v2940_v53 }
 0x228   : > { %3623 = vmatpush3.bf16.xpose.msk.msra.mxu1 %vm4231_vm1, %v4299_v56  ;;  %3292 = vmatprep.mubr.msk.f32.mxu1 %vm268_vm0, %v2941_v58 }
 0x229   : > { %3626 = vmatprep.subr.msk.bf16.mxu1 %vm4231_vm1, %v6598_v61 }
 0x22b   : > { %3293 = vmatmul.mubr.msk.f32.gmra.mrb[34].mxu1 %vm268_vm0, %v2941_v58 }
 0x22c   : > { %3294 = vmatprep.mubr.msk.f32.mxu1 %vm268_vm0, %v2942_v55 }
 0x22f   : > { %3295 = vmatmul.mubr.msk.f32.gmra.mrb[36].mxu1 %vm268_vm0, %v2942_v55 }
 0x230   : > { %3629 = vmatpush3.bf16.xpose.msk.msra.mxu1 %vm4231_vm1, %v6599_v23  ;;  %3296 = vmatprep.mubr.msk.f32.mxu1 %vm268_vm0, %v2943_v12 }
 0x231   : > { %3632 = vmatprep.subr.msk.bf16.mxu1 %vm4231_vm1, %v6600_v22 }
 0x233   : > { %3297 = vmatmul.mubr.msk.f32.gmra.mrb[38].mxu1 %vm268_vm0, %v2943_v12 }
 0x234   : > { %3298 = vmatprep.mubr.msk.f32.mxu1 %vm268_vm0, %v2944_v59 }
 0x237   : > { %3299 = vmatmul.mubr.msk.f32.gmra.mrb[40].mxu1 %vm268_vm0, %v2944_v59 }
 0x238   : > { %3635 = vmatpush3.bf16.xpose.msk.msra.mxu1 %vm4231_vm1, %v6601_v16  ;;  %3300 = vmatprep.mubr.msk.f32.mxu1 %vm268_vm0, %v2945_v4 }
 0x239   : > { %3638 = vmatprep.subr.msk.bf16.mxu1 %vm4231_vm1, %v6602_v28 }
 0x23b   : > { %3301 = vmatmul.mubr.msk.f32.gmra.mrb[42].mxu1 %vm268_vm0, %v2945_v4 }
 0x23c   : > { %3302 = vmatprep.mubr.msk.f32.mxu1 %vm268_vm0, %v2946_v34 }
 0x23f   : > { %3303 = vmatmul.mubr.msk.f32.gmra.mrb[44].mxu1 %vm268_vm0, %v2946_v34 }
 0x240   : > { %3641 = vmatpush3.bf16.xpose.msk.msra.mxu1 %vm4231_vm1, %v6603_v42  ;;  %3304 = vmatprep.mubr.msk.f32.mxu1 %vm268_vm0, %v2947_v6 }
 0x243   : > { %3305 = vmatmul.mubr.msk.f32.gmra.mrb[46].mxu1 %vm268_vm0, %v2947_v6 }
 0x244   : > { %3338 = vmatprep.mubr.msk.f32.mxu1 %vm268_vm0, %v3012_v21 }
 0x247   : > { %3339 = vmatmul.mubr.msk.f32.vlgmr.msra.gmra.mrb[48].mxu1 %vm268_vm0, %v3012_v21 }
 0x248   : > { %3340 = vmatprep.mubr.msk.f32.mxu1 %vm268_vm0, %v3013_v32 }
 0x24b   : > { %3341 = vmatmul.mubr.msk.f32.gmra.mrb[50].mxu1 %vm268_vm0, %v3013_v32 }
 0x24c   : > { %3342 = vmatprep.mubr.msk.f32.mxu1 %vm268_vm0, %v3014_v63 }
 0x24f   : > { %3343 = vmatmul.mubr.msk.f32.gmra.mrb[52].mxu1 %vm268_vm0, %v3014_v63 }
 0x250   : > { %3344 = vmatprep.mubr.msk.f32.mxu1 %vm268_vm0, %v3015_v26 }
 0x253   : > { %3345 = vmatmul.mubr.msk.f32.gmra.mrb[54].mxu1 %vm268_vm0, %v3015_v26 }
 0x254   : > { %3346 = vmatprep.mubr.msk.f32.mxu1 %vm268_vm0, %v3016_v15 }
 0x257   : > { %3347 = vmatmul.mubr.msk.f32.gmra.mrb[56].mxu1 %vm268_vm0, %v3016_v15 }
 0x258   : > { %3348 = vmatprep.mubr.msk.f32.mxu1 %vm268_vm0, %v3017_v2 }
 0x25b   : > { %3349 = vmatmul.mubr.msk.f32.gmra.mrb[58].mxu1 %vm268_vm0, %v3017_v2  ;;  %v3028_v2 = vld [vmem:[%s6523_s2 + $0x100] sm:$0xff] }
 0x25c   : > { %3350 = vmatprep.mubr.msk.f32.mxu1 %vm268_vm0, %v3018_v8  ;;  %1972 = vxpose.xlu0.b32.start [1/16] (narrow) %v3028_v2, 64 }
 0x25f   : > { %3351 = vmatmul.mubr.msk.f32.gmra.mrb[60].mxu1 %vm268_vm0, %v3018_v8  ;;  %v3029_v8 = vld [vmem:[%s6523_s2 + $0x108] sm:$0xff] }
 0x260   : > { %3352 = vmatprep.mubr.msk.f32.mxu1 %vm268_vm0, %v3019_v40  ;;  %1973 = vxpose.xlu0.b32.cont [2/16] (narrow) %v3029_v8, 64 }
 0x263   : > { %3353 = vmatmul.mubr.msk.f32.gmra.mrb[62].mxu1 %vm268_vm0, %v3019_v40  ;;  %v3031_v40 = vld [vmem:[%s6523_s2 + $0x118] sm:$0xff] }
 0x264   : > { %3354 = vmatprep.mubr.msk.f32.mxu1 %vm268_vm0, %v3020_v13  ;;  %1974 = vxpose.xlu0.b32.cont [3/16] (narrow) %v3030_v38, 64 }
 0x267   : > { %3355 = vmatmul.mubr.msk.f32.gmra.mrb[64].mxu1 %vm268_vm0, %v3020_v13  ;;  %v3033_v13 = vld [vmem:[%s6523_s2 + $0x128] sm:$0xff] }
 0x268   : > { %3356 = vmatprep.mubr.msk.f32.mxu1 %vm268_vm0, %v3021_v1  ;;  %1975 = vxpose.xlu0.b32.cont [4/16] (narrow) %v3031_v40, 64 }
 0x26b   : > { %3357 = vmatmul.mubr.msk.f32.gmra.mrb[66].mxu1 %vm268_vm0, %v3021_v1  ;;  %v3035_v1 = vld [vmem:[%s6523_s2 + $0x138] sm:$0xff] }
 0x26c   : > { %3358 = vmatprep.mubr.msk.f32.mxu1 %vm268_vm0, %v3022_v20  ;;  %1976 = vxpose.xlu0.b32.cont [5/16] (narrow) %v3032_v62, 64  ;;  %v3041_v62 = vld [vmem:[%s6523_s2 + $0x168] sm:$0xff] }
 0x26f   : > { %3359 = vmatmul.mubr.msk.f32.gmra.mrb[68].mxu1 %vm268_vm0, %v3022_v20  ;;  %v3036_v20 = vld [vmem:[%s6523_s2 + $0x140] sm:$0xff] }
 0x270   : > { %3360 = vmatprep.mubr.msk.f32.mxu1 %vm268_vm0, %v3023_v45  ;;  %1977 = vxpose.xlu0.b32.cont [6/16] (narrow) %v3033_v13, 64 }
 0x273   : > { %3361 = vmatmul.mubr.msk.f32.gmra.mrb[70].mxu1 %vm268_vm0, %v3023_v45 }
 0x274   : > { %3362 = vmatprep.mubr.msk.f32.mxu1 %vm268_vm0, %v3024_v33  ;;  %1978 = vxpose.xlu0.b32.cont [7/16] (narrow) %v3034_v24, 64 }
 0x277   : > { %3363 = vmatmul.mubr.msk.f32.gmra.mrb[72].mxu1 %vm268_vm0, %v3024_v33 }
 0x278   : > { %3364 = vmatprep.mubr.msk.f32.mxu1 %vm268_vm0, %v3025_v5  ;;  %1979 = vxpose.xlu0.b32.cont [8/16] (narrow) %v3035_v1, 64 }
 0x27b   : > { %3365 = vmatmul.mubr.msk.f32.gmra.mrb[74].mxu1 %vm268_vm0, %v3025_v5  ;;  %v3038_v5 = vld [vmem:[%s6523_s2 + $0x150] sm:$0xff] }
 0x27c   : > { %3366 = vmatprep.mubr.msk.f32.mxu1 %vm268_vm0, %v3026_v19  ;;  %1980 = vxpose.xlu0.b32.cont [9/16] (narrow) %v3036_v20, 64 }
 0x27f   : > { %3367 = vmatmul.mubr.msk.f32.gmra.mrb[76].mxu1 %vm268_vm0, %v3026_v19 }
 0x280   : > { %3368 = vmatprep.mubr.msk.f32.mxu1 %vm268_vm0, %v3027_v30  ;;  %1981 = vxpose.xlu0.b32.cont [10/16] (narrow) %v3037_v29, 64  ;;  %v3042_v29 = vld [vmem:[%s6523_s2 + $0x170] sm:$0xff] }
 0x283   : > { %3369 = vmatmul.mubr.msk.f32.gmra.mrb[78].mxu1 %vm268_vm0, %v3027_v30 }
 0x284   : > { %2680 = vmatprep.mubr.f32.mxu1 %v6597_v54  ;;  %1982 = vxpose.xlu0.b32.cont [11/16] (narrow) %v3038_v5, 64 }
 0x288   : > { %1983 = vxpose.xlu0.b32.cont [12/16] (narrow) %v3039_v0, 64  ;;  %v3043_v0 = vld [vmem:[%s6523_s2 + $0x178] sm:$0xff] }
 0x28c   : > { %1984 = vxpose.xlu0.b32.cont [13/16] (narrow) %v3040_v50, 64 }
 0x290   : > { %1985 = vxpose.xlu0.b32.cont [14/16] (narrow) %v3041_v62, 64 }
 0x294   : > { %1986 = vxpose.xlu0.b32.cont [15/16] (narrow) %v3042_v29, 64 }
 0x295   : > { %v5021_v51 = vpop.f32.mrb[0].mxu1 }
 0x296   : > { %v5023_v49 = vpop.f32.mrb[1].mxu1 }
 0x297   : > { %6604 = vst [vmem:[#allocation23_spill] sm:$0xff] %v5023_v49 }
 0x298   : > { %1987 = vxpose.xlu0.b32.end [16/16] (narrow) %v3043_v0, 64 }
 0x299   : > { %v5025_v53 = vpop.f32.mrb[2].mxu1 }
 0x29a   : > { %v5027_v58 = vpop.f32.mrb[3].mxu1 }
 0x29b   : > { %6605 = vst [vmem:[#allocation24_spill] sm:$0xff] %v5027_v58 }
 0x29d   : > { %v5029_v55 = vpop.f32.mrb[4].mxu1 }
 0x29e   : > { %v5031_v12 = vpop.f32.mrb[5].mxu1 }
 0x29f   : > { %6606 = vst [vmem:[#allocation25_spill] sm:$0xff] %v5031_v12 }
 0x2a1   : > { %v5033_v59 = vpop.f32.mrb[6].mxu1 }
 0x2a2   : > { %v5035_v9 = vpop.f32.mrb[7].mxu1 }
 0x2a3   : > { %6607 = vst [vmem:[#allocation26_spill] sm:$0xff] %v5035_v9 }
 0x2a5   : > { %v5037_v4 = vpop.f32.mrb[8].mxu1 }
 0x2a6   : > { %v5039_v34 = vpop.f32.mrb[9].mxu1 }
 0x2a7   : > { %6608 = vst [vmem:[#allocation27_spill] sm:$0xff] %v5039_v34 }
 0x2a9   : > { %v5041_v6 = vpop.f32.mrb[10].mxu1 }
 0x2aa   : > { %v5043_v21 = vpop.f32.mrb[11].mxu1 }
 0x2ab   : > { %6609 = vst [vmem:[#allocation28_spill] sm:$0xff] %v5043_v21 }
 0x2ad   : > { %v5045_v32 = vpop.f32.mrb[12].mxu1 }
 0x2ae   : > { %v5047_v63 = vpop.f32.mrb[13].mxu1 }
 0x2af   : > { %6610 = vst [vmem:[#allocation29_spill] sm:$0xff] %v5047_v63 }
 0x2b1   : > { %v5049_v26 = vpop.f32.mrb[14].mxu1 }
 0x2b2   : > { %6611 = vst [vmem:[#allocation30_spill] sm:$0xff] %v5049_v26  ;;  %v5051_v15 = vpop.f32.mrb[15].mxu1 }
 0x2b3   : > { %6612 = vst [vmem:[#allocation31_spill] sm:$0xff] %v5051_v15 }
 0x2da   : > { %v5077_v11 = vpop.f32.mrb[16].mxu1 }
 0x2db   : > { %v5082_v44 = vpop.f32.mrb[17].mxu1 }
 0x2de   : > { %v5084_v45 = vpop.f32.mrb[18].mxu1 }
 0x2df   : > { %v5089_v33 = vpop.f32.mrb[19].mxu1 }
 0x2e2   : > { %v5091_v52 = vpop.f32.mrb[20].mxu1 }
 0x2e3   : > { %v1168_v60 = vmax.f32 %v5077_v11, %v5091_v52  ;;  %v5098_v19 = vpop.f32.mrb[21].mxu1 }
 0x2e4   : > { %v1189_v7 = vmax.f32 %v5082_v44, %v5098_v19 }
 0x2e6   : > { %v5102_v30 = vpop.f32.mrb[22].mxu1 }
 0x2e7   : > { %v1169_v48 = vmax.f32 %v5084_v45, %v5102_v30  ;;  %v5109_v39 = vpop.f32.mrb[23].mxu1 }
 0x2e8   : > { %v1190_v43 = vmax.f32 %v5089_v33, %v5109_v39 }
 0x2ea   : > { %v5113_v41 = vpop.f32.mrb[24].mxu1 }
 0x2eb   : > { %v1170_v2 = vmax.f32 %v1168_v60, %v5113_v41  ;;  %v5119_v8 = vpop.f32.mrb[25].mxu1 }
 0x2ec   : > { %v1191_v38 = vmax.f32 %v1189_v7, %v5119_v8 }
 0x2ee   : > { %v5122_v40 = vpop.f32.mrb[26].mxu1 }
 0x2ef   : > { %v1171_v13 = vmax.f32 %v1169_v48, %v5122_v40  ;;  %v5128_v24 = vpop.f32.mrb[27].mxu1 }
 0x2f0   : > { %v1192_v1 = vmax.f32 %v1190_v43, %v5128_v24 }
 0x2f2   : > { %v5131_v20 = vpop.f32.mrb[28].mxu1 }
 0x2f3   : > { %v1172_v5 = vmax.f32 %v1170_v2, %v5131_v20  ;;  %v5137_v60 = vpop.f32.mrb[29].mxu1 }
 0x2f4   : > { %v1193_v7 = vmax.f32 %v1191_v38, %v5137_v60 }
 0x2f6   : > { %v5143_v48 = vpop.f32.mrb[30].mxu1 }
 0x2f7   : > { %v1173_v43 = vmax.f32 %v1171_v13, %v5143_v48  ;;  %v5146_v50 = vpop.f32.mrb[31].mxu1 }
 0x2f8   : > { %v1194_v62 = vmax.f32 %v1192_v1, %v5146_v50 }
 0x2fa   : > { %v5149_v15 = vpop.f32.mrb[32].mxu1 }
 0x2fb   : > { %v1174_v2 = vmax.f32 %v1172_v5, %v5149_v15  ;;  %v5152_v29 = vpop.f32.mrb[33].mxu1 }
 0x2fc   : > { %v1195_v38 = vmax.f32 %v1193_v7, %v5152_v29 }
 0x2fe   : > { %v5155_v63 = vpop.f32.mrb[34].mxu1 }
 0x2ff   : > { %v1175_v21 = vmax.f32 %v1173_v43, %v5155_v63  ;;  %v5158_v34 = vpop.f32.mrb[35].mxu1 }
 0x300   : > { %v1196_v13 = vmax.f32 %v1194_v62, %v5158_v34 }
 0x302   : > { %v5161_v9 = vpop.f32.mrb[36].mxu1 }
 0x303   : > { %v1176_v1 = vmax.f32 %v1174_v2, %v5161_v9  ;;  %v5164_v0 = vpop.f32.mrb[37].mxu1 }
 0x304   : > { %v1197_v5 = vmax.f32 %v1195_v38, %v5164_v0 }
 0x306   : > { %v5167_v12 = vpop.f32.mrb[38].mxu1 }
 0x307   : > { %v1177_v7 = vmax.f32 %v1175_v21, %v5167_v12  ;;  %v5170_v58 = vpop.f32.mrb[39].mxu1  ;;  %v735_v21 = vrot.slane %v4707_v35, 4 }
 0x308   : > { %v1198_v43 = vmax.f32 %v1196_v13, %v5170_v58  ;;  %v616_v13 = vsub.f32 -inf, %v4558_v3 }
 0x30a   : > { %v5173_v49 = vpop.f32.mrb[40].mxu1  ;;  %v618_v47 = vmul.f32 1.442695, %v616_v13 }
 0x30b   : > { %v1178_v62 = vmax.f32 %v1176_v1, %v5173_v49  ;;  %v5176_v42 = vpop.f32.mrb[41].mxu1 }
 0x30c   : > { %v1199_v2 = vmax.f32 %v1197_v5, %v5176_v42  ;;  %v736_v5 = vadd.f32 %v735_v21, %v4707_v35  ;;  %3861 = vpow2.f32 %v618_v47 }
 0x30e   : > { %v5179_v28 = vpop.f32.mrb[42].mxu1 }
 0x30f   : > { %v1179_v38 = vmax.f32 %v1177_v7, %v5179_v28  ;;  %v5182_v16 = vpop.f32.mrb[43].mxu1 }
 0x310   : > { %v1200_v22 = vmax.f32 %v1198_v43, %v5182_v16  ;;  %v737_v43 = vrot.slane %v736_v5, 2 }
 0x312   : > { %v5187_v23 = vpop.f32.mrb[44].mxu1 }
 0x313   : > { %v1180_v1 = vmax.f32 %v1178_v62, %v5187_v23  ;;  %v5190_v61 = vpop.f32.mrb[45].mxu1 }
 0x314   : > { %v1201_v56 = vmax.f32 %v1199_v2, %v5190_v61  ;;  %v738_v2 = vadd.f32 %v737_v43, %v736_v5 }
 0x316   : > { %v5194_v7 = vpop.f32.mrb[46].mxu1  ;;  %v739_v31 = vrot.slane %v738_v2, 1 }
 0x317   : > { %v1181_v46 = vmax.f32 %v1179_v38, %v5194_v7  ;;  %v5197_v37 = vpop.f32.mrb[47].mxu1 }
 0x318   : > { %v1202_v36 = vmax.f32 %v1200_v22, %v5197_v37 }
 0x319   : > { %v1182_v27 = vmax.f32 %v1180_v1, %v1181_v46 }
 0x31a   : > { %v1203_v25 = vmax.f32 %v1201_v56, %v1202_v36  ;;  %v5200_v62 = vpop.f32.mrb[48].mxu1  ;;  %v3862_v36 = vpop.eup %3861 }
 0x31b   : > { %v1183_v18 = vrot.slane %v1182_v27, 4  ;;  %v5202_v17 = vpop.f32.mrb[49].mxu1  ;;  %v5216_v43 = vmul.f32 0.0, %v3862_v36 }
 0x31c   : > { %6613 = vst [vmem:[#allocation32_spill] sm:$0xff] %v5202_v17  ;;  %v1204_v35 = vrot.slane %v1203_v25, 4 }
 0x31d   : > { %v1184_v21 = vmax.f32 %v1182_v27, %v1183_v18  ;;  %v740_v27 = vadd.f32 %v739_v31, %v738_v2 }
 0x31e   : > { %v1205_v13 = vmax.f32 %v1203_v25, %v1204_v35  ;;  %v5204_v10 = vpop.f32.mrb[50].mxu1 }
 0x31f   : > { %v1185_v38 = vrot.slane %v1184_v21, 2  ;;  %v5206_v14 = vpop.f32.mrb[51].mxu1  ;;  %v5230_v25 = vadd.f32 %v740_v27, %v5216_v43 }
 0x320   : > { %v1206_v54 = vrot.slane %v1205_v13, 2 }
 0x321   : > { %v1186_v22 = vmax.f32 %v1184_v21, %v1185_v38  ;;  %6616 = vst [vmem:[#allocation35_spill] sm:$0xff] %v5230_v25 }
 0x322   : > { %v1207_v47 = vmax.f32 %v1205_v13, %v1206_v54  ;;  %v5208_v46 = vpop.f32.mrb[52].mxu1 }
 0x323   : > { %v1187_v56 = vrot.slane %v1186_v22, 1  ;;  %v5212_v26 = vpop.f32.mrb[53].mxu1 }
 0x324   : > { %6614 = vst [vmem:[#allocation33_spill] sm:$0xff] %v5212_v26  ;;  %v1208_v18 = vrot.slane %v1207_v47, 1 }
 0x325   : > { %v1188_v5 = vmax.f32 %v1186_v22, %v1187_v56 }
 0x326   : > { %v5218_v35 = vpop.f32.mrb[54].mxu1  ;;  %v1209_v38 = vmax.f32 %v1207_v47, %v1208_v18 }
 0x327   : > { %v5221_v54 = vmax.f32 %v4558_v3, %v1188_v5  ;;  %v5225_v13 = vpop.f32.mrb[55].mxu1 }
 0x328   : > { %6615 = vst [vmem:[#allocation34_spill] sm:$0xff] %v5225_v13 }
 0x329   : > { %v1212_v31 = vsub.f32 %v4558_v3, %v5221_v54  ;;  %v1218_v2 = vsub.f32 %v5077_v11, %v5221_v54  ;;  %v1220_v22 = vsub.f32 %v5084_v45, %v5221_v54  ;;  %v1222_v36 = vsub.f32 %v5091_v52, %v5221_v54 }
 0x32a   : > { %v1224_v47 = vsub.f32 %v5102_v30, %v5221_v54  ;;  %v1226_v56 = vsub.f32 %v5113_v41, %v5221_v54  ;;  %v1228_v18 = vsub.f32 %v5122_v40, %v5221_v54  ;;  %v1230_v3 = vsub.f32 %v5131_v20, %v5221_v54  ;;  %v5248_v27 = vpop.f32.mrb[56].mxu1 }
 0x32b   : > { %6617 = vst [vmem:[#allocation36_spill] sm:$0xff] %v5248_v27  ;;  %v1214_v11 = vmul.f32 1.442695, %v1212_v31  ;;  %v1232_v45 = vsub.f32 %v5143_v48, %v5221_v54  ;;  %v1234_v52 = vsub.f32 %v5149_v15, %v5221_v54  ;;  %v1236_v30 = vsub.f32 %v5155_v63, %v5221_v54  ;;  %v5256_v5 = vpop.f32.mrb[57].mxu1 }
 0x32c   : > { %6618 = vst [vmem:[#allocation37_spill] sm:$0xff] %v5256_v5  ;;  %v1238_v41 = vsub.f32 %v5161_v9, %v5221_v54  ;;  %v1240_v40 = vsub.f32 %v5167_v12, %v5221_v54  ;;  %v1242_v20 = vsub.f32 %v5173_v49, %v5221_v54  ;;  %v1244_v48 = vsub.f32 %v5179_v28, %v5221_v54 }
 0x32d   : > { %v5268_v15 = vadd.f32 %v5021_v51, %v5216_v43  ;;  %v1246_v63 = vsub.f32 %v5187_v23, %v5221_v54  ;;  %v1248_v31 = vsub.f32 %v5194_v7, %v5221_v54  ;;  %v1250_v9 = vmul.f32 1.442695, %v1218_v2 }
 0x32e   : > { %3863 = vpow2.f32 %v1214_v11  ;;  %v1254_v1 = vmul.f32 1.442695, %v1220_v22  ;;  %v1258_v12 = vmul.f32 1.442695, %v1222_v36  ;;  %v1262_v21 = vmul.f32 1.442695, %v1224_v47 }
 0x32f   : > { %v5276_v49 = vadd.f32 %v5025_v53, %v5216_v43  ;;  %v5280_v28 = vadd.f32 %v5029_v55, %v5216_v43  ;;  %3865 = vpow2.f32 %v1250_v9  ;;  %v1266_v51 = vmul.f32 1.442695, %v1226_v56 }
 0x330   : > { %3867 = vpow2.f32 %v1254_v1  ;;  %v1270_v23 = vmul.f32 1.442695, %v1228_v18  ;;  %v1274_v25 = vmul.f32 1.442695, %v1230_v3  ;;  %v5283_v7 = vmax.f32 %v4560_v57, %v1209_v38  ;;  %v5289_v18 = vpop.f32.mrb[58].mxu1 }
 0x331   : > { %3869 = vpow2.f32 %v1258_v12  ;;  %v1278_v2 = vmul.f32 1.442695, %v1232_v45  ;;  %v1282_v22 = vmul.f32 1.442695, %v1234_v52  ;;  %v1286_v36 = vmul.f32 1.442695, %v1236_v30 }
 0x332   : > { %3871 = vpow2.f32 %v1262_v21  ;;  %v1290_v47 = vmul.f32 1.442695, %v1238_v41  ;;  %v1294_v53 = vmul.f32 1.442695, %v1240_v40  ;;  %v1298_v11 = vmul.f32 1.442695, %v1242_v20 }
 0x333   : > { %v5287_v55 = vadd.f32 %v5033_v59, %v5216_v43  ;;  %3873 = vpow2.f32 %v1266_v51  ;;  %v1302_v56 = vmul.f32 1.442695, %v1244_v48  ;;  %v1306_v1 = vmul.f32 1.442695, %v1246_v63  ;;  %v5295_v45 = vpop.f32.mrb[59].mxu1 }
 0x334   : > { %3875 = vpow2.f32 %v1270_v23  ;;  %v1310_v38 = vmul.f32 1.442695, %v1248_v31  ;;  %v1219_v3 = vsub.f32 %v5082_v44, %v5283_v7  ;;  %v1221_v21 = vsub.f32 %v5089_v33, %v5283_v7  ;;  %6619 = vst [vmem:[#allocation38_spill] sm:$0xff] %v5295_v45  ;;  %v5303_v41 = vpop.f32.mrb[60].mxu1 }
 0x335   : > { %3877 = vpow2.f32 %v1274_v25  ;;  %v1223_v59 = vsub.f32 %v5098_v19, %v5283_v7  ;;  %v1225_v52 = vsub.f32 %v5109_v39, %v5283_v7  ;;  %v1227_v30 = vsub.f32 %v5119_v8, %v5283_v7  ;;  %v5311_v40 = vpop.f32.mrb[61].mxu1 }
 0x336   : > { %3879 = vpow2.f32 %v1278_v2  ;;  %v1229_v44 = vsub.f32 %v5128_v24, %v5283_v7  ;;  %v1231_v33 = vsub.f32 %v5137_v60, %v5283_v7  ;;  %v1233_v25 = vsub.f32 %v5146_v50, %v5283_v7  ;;  %v5319_v20 = vpop.f32.mrb[62].mxu1 }
 0x337   : > { %3881 = vpow2.f32 %v1282_v22  ;;  %v1235_v19 = vsub.f32 %v5152_v29, %v5283_v7  ;;  %v1237_v39 = vsub.f32 %v5158_v34, %v5283_v7  ;;  %v1239_v8 = vsub.f32 %v5164_v0, %v5283_v7  ;;  %v5329_v48 = vpop.f32.mrb[63].mxu1 }
 0x338   : > { %v5321_v24 = vpop.eup %3863  ;;  %3883 = vpow2.f32 %v1286_v36  ;;  %v1241_v60 = vsub.f32 %v5170_v58, %v5283_v7  ;;  %v1243_v50 = vsub.f32 %v5176_v42, %v5283_v7  ;;  %v1245_v29 = vsub.f32 %v5182_v16, %v5283_v7  ;;  %6620 = vst [vmem:[#allocation39_spill] sm:$0xff] %v5329_v48 }
 0x339   : > { %v5331_v34 = vpop.eup %3865  ;;  %3885 = vpow2.f32 %v1290_v47  ;;  %v1252_v31 = vmul.f32 1.442695, %v1219_v3  ;;  %v1256_v58 = vmul.f32 1.442695, %v1221_v21  ;;  %v1260_v42 = vmul.f32 1.442695, %v1223_v59 }
 0x33a   : > { %v5337_v9 = vpop.eup %3867  ;;  %3887 = vpow2.f32 %v1294_v53  ;;  %v1264_v12 = vmul.f32 1.442695, %v1225_v52  ;;  %v1268_v23 = vmul.f32 1.442695, %v1227_v30  ;;  %v1272_v2 = vmul.f32 1.442695, %v1229_v44 }
 0x33b   : > { %v5339_v51 = vpop.eup %3869  ;;  %3889 = vpow2.f32 %v1298_v11  ;;  %v1316_v16 = vadd.f32 %v5337_v9, %v5331_v34  ;;  %v5343_v22 = vpop.f32.mrb[64].mxu1  ;;  %v1276_v47 = vmul.f32 1.442695, %v1231_v33  ;;  %v1280_v3 = vmul.f32 1.442695, %v1233_v25 }
 0x33c   : > { %v5345_v36 = vpop.eup %3871  ;;  %3891 = vpow2.f32 %v1302_v56  ;;  %v5347_v63 = vmul.f32 1.442695, %v1235_v19  ;;  %v5352_v11 = vmul.f32 1.442695, %v1237_v39  ;;  %v5354_v59 = vmul.f32 1.442695, %v1239_v8 }
 0x33d   : > { %v5349_v53 = vpop.eup %3873  ;;  %3893 = vpow2.f32 %v1306_v1  ;;  %v1317_v21 = vadd.f32 %v5339_v51, %v1316_v16  ;;  %v5356_v52 = vpop.f32.mrb[65].mxu1  ;;  %v5360_v44 = vmul.f32 1.442695, %v1241_v60  ;;  %v5362_v56 = vmul.f32 1.442695, %v1243_v50 }
 0x33e   : > { %6621 = vst [vmem:[#allocation40_spill] sm:$0xff] %v5356_v52  ;;  %v5358_v30 = vpop.eup %3875  ;;  %3895 = vpow2.f32 %v1310_v38  ;;  %v6622_v33 = vmax.f32 %v5200_v62, %v5208_v46  ;;  %v5368_v25 = vpop.f32.mrb[66].mxu1  ;;  %v5373_v8 = vmul.f32 1.442695, %v1245_v29  ;;  %v6623_v38 = vmax.f32 %v5202_v17, %v5212_v26 }
 0x33f   : > { %v5370_v19 = vpop.eup %3877  ;;  %v1318_v39 = vadd.f32 %v5345_v36, %v1317_v21  ;;  %v6624_v50 = vmax.f32 %v5204_v10, %v5218_v35  ;;  %v5383_v0 = vpop.f32.mrb[67].mxu1  ;;  %3897 = vpow2.f32 %v1252_v31  ;;  %v6626_v29 = vmax.f32 %v5206_v14, %v5225_v13 }
 0x340   : > { %v1782_v1 = vmax.f32 %v6622_v33, %v5248_v27  ;;  %v1803_v60 = vmax.f32 %v6623_v38, %v5256_v5  ;;  %6625 = vst [vmem:[#allocation41_spill] sm:$0xff] %v5383_v0  ;;  %v5385_v33 = vpop.eup %3879  ;;  %3899 = vpow2.f32 %v1256_v58 }
 0x341   : > { %v1783_v16 = vmax.f32 %v6624_v50, %v5289_v18  ;;  %v1804_v21 = vmax.f32 %v6626_v29, %v5295_v45  ;;  %v5394_v5 = vpop.eup %3881  ;;  %v1319_v26 = vadd.f32 %v5349_v53, %v1318_v39  ;;  %3901 = vpow2.f32 %v1260_v42 }
 0x342   : > { %v1784_v27 = vmax.f32 %v1782_v1, %v5303_v41  ;;  %v1805_v50 = vmax.f32 %v1803_v60, %v5311_v40  ;;  %v5399_v31 = vpop.eup %3883  ;;  %v5405_v38 = vpop.f32.mrb[68].mxu1  ;;  %3903 = vpow2.f32 %v1264_v12 }
 0x343   : > { %v1785_v17 = vmax.f32 %v1783_v16, %v5319_v20  ;;  %v1806_v13 = vmax.f32 %v1804_v21, %v5329_v48  ;;  %v5407_v45 = vpop.eup %3885  ;;  %v1320_v58 = vadd.f32 %v5358_v30, %v1319_v26  ;;  %v5414_v42 = vpop.f32.mrb[69].mxu1  ;;  %3905 = vpow2.f32 %v1268_v23 }
 0x344   : > { %v1786_v29 = vmax.f32 %v1784_v27, %v5343_v22  ;;  %v1807_v39 = vmax.f32 %v1805_v50, %v5356_v52  ;;  %6627 = vst [vmem:[#allocation42_spill] sm:$0xff] %v5414_v42  ;;  %v5416_v16 = vpop.eup %3887  ;;  %3907 = vpow2.f32 %v1272_v2  ;;  %v919_v23 = vadd.f32 %v5041_v6, %v5216_v43 }
 0x345   : > { %v5412_v60 = vmax.f32 %v1785_v17, %v5368_v25  ;;  %v5419_v27 = vmax.f32 %v1806_v13, %v5383_v0  ;;  %v5424_v26 = vpop.eup %3889  ;;  %v1321_v12 = vadd.f32 %v5370_v19, %v1320_v58  ;;  %3909 = vpow2.f32 %v1276_v47 }
 0x346   : > { %v1788_v21 = vmax.f32 %v1786_v29, %v5405_v38  ;;  %v1809_v17 = vmax.f32 %v1807_v39, %v5414_v42  ;;  %v5430_v52 = vpop.eup %3891  ;;  %v5432_v13 = vpop.f32.mrb[70].mxu1  ;;  %v5440_v58 = vmul.f32 %v5321_v24, %v5268_v15  ;;  %3911 = vpow2.f32 %v1280_v3 }
 0x347   : > { %v5442_v2 = vpop.eup %3893  ;;  %v1322_v39 = vadd.f32 %v5385_v33, %v1321_v12  ;;  %v1789_v47 = vmax.f32 %v5412_v60, %v5432_v13  ;;  %v5447_v50 = vpop.f32.mrb[71].mxu1  ;;  %3913 = vpow2.f32 %v5347_v63  ;;  %v5458_v29 = vmul.f32 %v5321_v24, %v5276_v49 }
 0x348   : > { %6628 = vst [vmem:[#allocation43_spill] sm:$0xff] %v5440_v58  ;;  %6629 = vst [vmem:[#allocation44_spill] sm:$0xff] %v5447_v50  ;;  %v5451_v1 = vpop.eup %3895  ;;  %v1810_v15 = vmax.f32 %v5419_v27, %v5447_v50  ;;  %v5462_v3 = vmul.f32 %v5321_v24, %v5280_v28  ;;  %3915 = vpow2.f32 %v5352_v11  ;;  %v5470_v63 = vmul.f32 %v5321_v24, %v5287_v55 }
 0x349   : > { %6630 = vst [vmem:[#allocation45_spill] sm:$0xff] %v5458_v29  ;;  %v1323_v60 = vadd.f32 %v5394_v5, %v1322_v39  ;;  %v3898_v27 = vpop.eup %3897  ;;  %v917_v49 = vadd.f32 %v5037_v4, %v5216_v43  ;;  %3917 = vpow2.f32 %v5354_v59  ;;  %v6633_v28 = vsub.f32 %v5190_v61, %v5283_v7 }
 0x34a   : > { %6631 = vst [vmem:[#allocation46_spill] sm:$0xff] %v5462_v3  ;;  %6632 = vst [vmem:[#allocation47_spill] sm:$0xff] %v5470_v63  ;;  %v5480_v39 = vpop.f32.mrb[72].mxu1  ;;  %v3900_v12 = vpop.eup %3899  ;;  %3919 = vpow2.f32 %v5360_v44  ;;  %v6634_v55 = vsub.f32 %v5197_v37, %v5283_v7  ;;  %v921_v44 = vadd.f32 %v5045_v32, %v5216_v43  ;;  %v6638_v32 = vld [vmem:[#allocation30_spill] sm:$0xff] }
 0x34b   : > { %v1308_v11 = vmul.f32 1.442695, %v6633_v28  ;;  %v1324_v3 = vadd.f32 %v5399_v31, %v1323_v60  ;;  %v5488_v63 = vmax.f32 %v1788_v21, %v5480_v39  ;;  %v5490_v6 = vpop.f32.mrb[73].mxu1  ;;  %v3902_v59 = vpop.eup %3901  ;;  %3921 = vpow2.f32 %v5362_v56 }
 0x34c   : > { %v1312_v4 = vmul.f32 1.442695, %v6634_v55  ;;  %6635 = vst [vmem:[#allocation48_spill] sm:$0xff] %v5490_v6  ;;  %v1337_v61 = vadd.f32 %v3900_v12, %v3898_v27  ;;  %v3562_v28 = vpack.c.bf16 %v3900_v12, %v3898_v27  ;;  %v5494_v29 = vmax.f32 %v1809_v17, %v5490_v6  ;;  %v3904_v60 = vpop.eup %3903 }
 0x34d   : > { %v1325_v37 = vadd.f32 %v5407_v45, %v1324_v3  ;;  %3923 = vpow2.f32 %v5373_v8  ;;  %v5501_v21 = vmul.f32 %v5321_v24, %v917_v49  ;;  %v3906_v55 = vpop.eup %3905  ;;  %v3566_v56 = vpack.c.bf16 %v3904_v60, %v3902_v59 }
 0x34e   : > { %3925 = vpow2.f32 %v1308_v11  ;;  %v1338_v58 = vadd.f32 %v3902_v59, %v1337_v61  ;;  %3563 = vmatprep.subr.bf16.mxu0 %v3562_v28  ;;  %v5503_v12 = vpop.f32.mrb[74].mxu1  ;;  %v5506_v17 = vmul.f32 %v5321_v24, %v919_v23  ;;  %v3908_v27 = vpop.eup %3907  ;;  %v923_v6 = vadd.f32 %v6638_v32, %v5216_v43 }
 0x34f   : > { %6636 = vst [vmem:[#allocation49_spill] sm:$0xff] %v5501_v21  ;;  %v1326_v3 = vadd.f32 %v5416_v16, %v1325_v37  ;;  %3927 = vpow2.f32 %v1312_v4  ;;  %v6639_v8 = vpack.c.bf16 %v5337_v9, %v5331_v34  ;;  %v1791_v49 = vmax.f32 %v1789_v47, %v5503_v12  ;;  %v5515_v11 = vpop.f32.mrb[75].mxu1  ;;  %v3910_v59 = vpop.eup %3909 }
 0x350   : > { %6637 = vst [vmem:[#allocation50_spill] sm:$0xff] %v5506_v17  ;;  %6640 = vst [vmem:[#allocation30_spill] sm:$0xff] %v5515_v11  ;;  %v1339_v61 = vadd.f32 %v3904_v60, %v1338_v58  ;;  %v3570_v23 = vpack.c.bf16 %v3908_v27, %v3906_v55  ;;  %v1812_v28 = vmax.f32 %v1810_v15, %v5515_v11  ;;  %v3912_v43 = vpop.eup %3911 }
 0x351   : > { %3565 = vmatpush1.bf16.msra.mxu0 %v6639_v8  ;;  %v5519_v17 = vmul.f32 %v5321_v24, %v921_v44  ;;  %v1327_v4 = vadd.f32 %v5424_v26, %v1326_v3  ;;  %v5523_v37 = vmul.f32 %v5321_v24, %v923_v6  ;;  %v3914_v34 = vpop.eup %3913  ;;  %v3574_v47 = vpack.c.bf16 %v3912_v43, %v3910_v59  ;;  %v6643_v8 = vld [vmem:[#allocation35_spill] sm:$0xff] }
 0x352   : > { %3567 = vmatprep.subr.bf16.mxu0 %v3566_v56  ;;  %v1340_v9 = vadd.f32 %v3906_v55, %v1339_v61  ;;  %v5525_v32 = vpop.f32.mrb[76].mxu1  ;;  %v5529_v58 = vmul.f32 %v5321_v24, %v6643_v8  ;;  %v3916_v60 = vpop.eup %3915  ;;  %v6644_v44 = vpack.c.bf16 %v5345_v36, %v5339_v51 }
 0x353   : > { %6641 = vst [vmem:[#allocation51_spill] sm:$0xff] %v5519_v17  ;;  %6642 = vst [vmem:[#allocation52_spill] sm:$0xff] %v5523_v37  ;;  %v1328_v15 = vadd.f32 %v5430_v52, %v1327_v4  ;;  %v1792_v6 = vmax.f32 %v5488_v63, %v5525_v32  ;;  %v5537_v56 = vpop.f32.mrb[77].mxu1  ;;  %v3918_v55 = vpop.eup %3917  ;;  %v3578_v61 = vpack.c.bf16 %v3916_v60, %v3914_v34 }
 0x354   : > { %6645 = vst [vmem:[#allocation35_spill] sm:$0xff] %v5537_v56  ;;  %v1341_v3 = vadd.f32 %v3908_v27, %v1340_v9  ;;  %v1813_v24 = vmax.f32 %v5494_v29, %v5537_v56  ;;  %v3920_v8 = vpop.eup %3919 }
 0x355   : > { %3569 = vmatpush1.bf16.msra.mxu0 %v6644_v44  ;;  %v1329_v37 = vadd.f32 %v5442_v2, %v1328_v15  ;;  %v3922_v4 = vpop.eup %3921  ;;  %v3582_v21 = vpack.c.bf16 %v3920_v8, %v3918_v55  ;;  %v6646_v44 = vpack.c.bf16 %v5358_v30, %v5349_v53  ;;  %v6648_v53 = vpack.c.bf16 %v5385_v33, %v5370_v19 }
 0x356   : > { %3571 = vmatprep.subr.bf16.mxu0 %v3570_v23  ;;  %v1342_v17 = vadd.f32 %v3910_v59, %v1341_v3  ;;  %v5542_v51 = vpop.f32.mrb[78].mxu1 }
 0x357   : > { %v3924_v36 = vpop.eup %3923  ;;  %v1330_v63 = vadd.f32 %v5451_v1, %v1329_v37  ;;  %v1793_v27 = vmax.f32 %v1791_v49, %v5542_v51  ;;  %v5549_v23 = vpop.f32.mrb[79].mxu1 }
 0x358   : > { %6647 = vst [vmem:[#allocation53_spill] sm:$0xff] %v5549_v23  ;;  %v3926_v29 = vpop.eup %3925  ;;  %v1343_v9 = vadd.f32 %v3912_v43, %v1342_v17  ;;  %v3586_v15 = vpack.c.bf16 %v3924_v36, %v3922_v4  ;;  %v1814_v59 = vmax.f32 %v1812_v28, %v5549_v23  ;;  %v1376_v28 = vpop.trf.xlu1 }
 0x359   : > { %3573 = vmatpush1.bf16.msra.mxu0 %v6646_v44  ;;  %v3928_v3 = vpop.eup %3927  ;;  %v1331_v56 = vrot.slane %v1330_v63, 4  ;;  %v1794_v11 = vmax.f32 %v1792_v6, %v1793_v27  ;;  %v6649_v44 = vld [vmem:[#allocation22_spill] sm:$0xff]  ;;  %v617_v6 = vsub.f32 -inf, %v4560_v57 }
 0x35a   : > { %3575 = vmatprep.subr.bf16.mxu0 %v3574_v47  ;;  %v1344_v50 = vadd.f32 %v3914_v34, %v1343_v9  ;;  %v3590_v42 = vpack.c.bf16 %v3928_v3, %v3926_v29  ;;  %v1815_v37 = vmax.f32 %v1813_v24, %v1814_v59  ;;  %v756_v17 = vrot.slane %v6649_v44, 4 }
 0x35b   : > { %v1332_v0 = vadd.f32 %v1331_v56, %v1330_v63  ;;  %v1795_v30 = vrot.slane %v1794_v11, 4  ;;  %v6650_v56 = vpack.c.bf16 %v5399_v31, %v5394_v5  ;;  %v1213_v5 = vsub.f32 %v4560_v57, %v5283_v7 }
 0x35c   : > { %v1345_v49 = vadd.f32 %v3916_v60, %v1344_v50  ;;  %v1816_v48 = vrot.slane %v1815_v37, 4  ;;  %v757_v33 = vadd.f32 %v756_v17, %v6649_v44  ;;  %v1377_v9 = vpop.trf.xlu1 }
 0x35d   : > { %3577 = vmatpush1.bf16.msra.mxu0 %v6648_v53  ;;  %v1333_v43 = vrot.slane %v1332_v0, 2  ;;  %v1796_v47 = vmax.f32 %v1794_v11, %v1795_v30  ;;  %v620_v11 = vmul.f32 1.442695, %v617_v6 }
 0x35e   : > { %3579 = vmatprep.subr.bf16.mxu0 %v3578_v61  ;;  %v1346_v23 = vadd.f32 %v3918_v55, %v1345_v49  ;;  %v1817_v61 = vmax.f32 %v1815_v37, %v1816_v48  ;;  %v6651_v55 = vpack.c.bf16 %v5416_v16, %v5407_v45  ;;  %v1216_v16 = vmul.f32 1.442695, %v1213_v5  ;;  %v6654_v49 = vld [vmem:[#allocation36_spill] sm:$0xff] }
 0x35f   : > { %v1334_v34 = vadd.f32 %v1333_v43, %v1332_v0  ;;  %v1797_v24 = vrot.slane %v1796_v47, 2  ;;  %3929 = vpow2.f32 %v620_v11 }
 0x360   : > { %v1347_v19 = vadd.f32 %v3920_v8, %v1346_v23  ;;  %v1818_v23 = vrot.slane %v1817_v61, 2  ;;  %v1378_v53 = vpop.trf.xlu1  ;;  %3931 = vpow2.f32 %v1216_v16 }
 0x361   : > { %3581 = vmatpush1.bf16.msra.mxu0 %v6650_v56  ;;  %v1335_v50 = vrot.slane %v1334_v34, 1  ;;  %v1798_v60 = vmax.f32 %v1796_v47, %v1797_v24 }
 0x362   : > { %3583 = vmatprep.subr.bf16.mxu0 %v3582_v21  ;;  %v1348_v63 = vadd.f32 %v3922_v4, %v1347_v19  ;;  %v758_v21 = vrot.slane %v757_v33, 2  ;;  %v6652_v4 = vpack.c.bf16 %v5430_v52, %v5424_v26 }
 0x363   : > { %v1336_v27 = vadd.f32 %v1335_v50, %v1334_v34  ;;  %v1799_v0 = vrot.slane %v1798_v60, 1  ;;  %v6655_v34 = vmov 0.0  }
 0x364   : > { %v1349_v31 = vadd.f32 %v3924_v36, %v1348_v63  ;;  %v759_v57 = vadd.f32 %v758_v21, %v757_v33  ;;  %v1379_v56 = vpop.trf.xlu1 }
 0x365   : > { %3585 = vmatpush1.bf16.msra.mxu0 %v6651_v55  ;;  %v1800_v8 = vmax.f32 %v1798_v60, %v1799_v0  ;;  %v5567_v59 = vadd.f32 %v1336_v27, %v5529_v58 }
 0x366   : > { %3587 = vmatprep.subr.bf16.mxu0 %v3586_v15  ;;  %v1350_v48 = vadd.f32 %v3926_v29, %v1349_v31  ;;  %v1819_v15 = vmax.f32 %v1817_v61, %v1818_v23  ;;  %v760_v17 = vrot.slane %v759_v57, 1 }
 0x367   : > { %v5573_v45 = vmax.f32 %v5221_v54, %v1800_v8 }
 0x368   : > { %v1351_v37 = vadd.f32 %v3928_v3, %v1350_v48  ;;  %v6653_v3 = vpack.c.bf16 %v5451_v1, %v5442_v2  ;;  %v761_v63 = vadd.f32 %v760_v17, %v759_v57 }
 0x369   : > { %3589 = vmatpush1.bf16.msra.mxu0 %v6652_v4  ;;  %v1824_v36 = vsub.f32 %v5221_v54, %v5573_v45  ;;  %v1830_v29 = vsub.f32 %v5200_v62, %v5573_v45  ;;  %v1832_v52 = vsub.f32 %v5204_v10, %v5573_v45  ;;  %v1834_v30 = vsub.f32 %v5208_v46, %v5573_v45  ;;  %v3930_v19 = vpop.eup %3929 }
 0x36a   : > { %3591 = vmatprep.subr.bf16.mxu0 %v3590_v42  ;;  %v1352_v58 = vrot.slane %v1351_v37, 4  ;;  %v1836_v42 = vsub.f32 %v5218_v35, %v5573_v45  ;;  %v1838_v44 = vsub.f32 %v6654_v49, %v5573_v45  ;;  %v1840_v62 = vsub.f32 %v5289_v18, %v5573_v45 }
 0x36b   : > { %v1826_v26 = vmul.f32 1.442695, %v1824_v36  ;;  %v1820_v10 = vrot.slane %v1819_v15, 1  ;;  %v1842_v46 = vsub.f32 %v5303_v41, %v5573_v45  ;;  %v1862_v47 = vmul.f32 1.442695, %v1830_v29  ;;  %v6657_v29 = vld [vmem:[#allocation33_spill] sm:$0xff] }
 0x36c   : > { %v1353_v54 = vadd.f32 %v1352_v58, %v1351_v37  ;;  %v1866_v35 = vmul.f32 1.442695, %v1832_v52  ;;  %v1844_v1 = vsub.f32 %v5319_v20, %v5573_v45  ;;  %v1870_v2 = vmul.f32 1.442695, %v1834_v30 }
 0x36d   : > { %3593 = vmatpush1.bf16.msra.mxu0 %v6653_v3  ;;  %3933 = vpow2.f32 %v1826_v26  ;;  %v1874_v6 = vmul.f32 1.442695, %v1836_v42  ;;  %v1846_v18 = vsub.f32 %v5343_v22, %v5573_v45  ;;  %v1878_v24 = vmul.f32 1.442695, %v1838_v44  ;;  %v6658_v26 = vld [vmem:[#allocation34_spill] sm:$0xff] }
 0x36e   : > { %v1354_v43 = vrot.slane %v1353_v54, 2  ;;  %3935 = vpow2.f32 %v1862_v47  ;;  %v1848_v41 = vsub.f32 %v5368_v25, %v5573_v45  ;;  %v1821_v33 = vmax.f32 %v1819_v15, %v1820_v10  ;;  %v6660_v44 = vld [vmem:[#allocation38_spill] sm:$0xff] }
 0x36f   : > { %3937 = vpow2.f32 %v1866_v35  ;;  %v1850_v20 = vsub.f32 %v5405_v38, %v5573_v45  ;;  %v1886_v60 = vmul.f32 1.442695, %v1842_v46  ;;  %v1852_v61 = vsub.f32 %v5432_v13, %v5573_v45  ;;  %v1380_v13 = vpop.trf.xlu1 }
 0x370   : > { %1457 = vmatmul.mubr.f32.vlgmr.msra.gmra.mrb[32].mxu0 %v1376_v28  ;;  %v1882_v28 = vmul.f32 1.442695, %v1840_v62  ;;  %v1355_v50 = vadd.f32 %v1354_v43, %v1353_v54  ;;  %3939 = vpow2.f32 %v1870_v2  ;;  %v1890_v22 = vmul.f32 1.442695, %v1844_v1  ;;  %v6659_v54 = vld [vmem:[#allocation37_spill] sm:$0xff]  ;;  %v6661_v43 = vld [vmem:[#allocation39_spill] sm:$0xff] }
 0x371   : > { %1462 = vmatprep.mubr.f32.mxu0 %v6655_v34  ;;  %3941 = vpow2.f32 %v1874_v6  ;;  %v5606_v11 = vmul.f32 0.0, %v3930_v19  ;;  %v1854_v25 = vsub.f32 %v5480_v39, %v5573_v45  ;;  %v1894_v27 = vmul.f32 1.442695, %v1846_v18  ;;  %v6662_v2 = vld [vmem:[#allocation40_spill] sm:$0xff] }
 0x372   : > { %3943 = vpow2.f32 %v1878_v24  ;;  %v1856_v38 = vsub.f32 %v5503_v12, %v5573_v45  ;;  %v1898_v55 = vmul.f32 1.442695, %v1848_v41  ;;  %v5613_v0 = vmax.f32 %v5283_v7, %v1821_v33  ;;  %v6663_v24 = vld [vmem:[#allocation41_spill] sm:$0xff] }
 0x373   : > { %3945 = vpow2.f32 %v1882_v28  ;;  %v1356_v5 = vrot.slane %v1355_v50, 1  ;;  %v1858_v31 = vsub.f32 %v5525_v32, %v5573_v45  ;;  %v1902_v21 = vmul.f32 1.442695, %v1850_v20  ;;  %v6656_v32 = vld [vmem:[#allocation32_spill] sm:$0xff]  ;;  %v1381_v42 = vpop.trf.xlu1 }
 0x374   : > { %1463 = vmatmul.mubr.f32.gmra.mrb[34].mxu0 %v1377_v9  ;;  %v5615_v9 = vpop.eup %3931  ;;  %3947 = vpow2.f32 %v1886_v60  ;;  %v1860_v39 = vsub.f32 %v5542_v51, %v5573_v45  ;;  %v1906_v12 = vmul.f32 1.442695, %v1852_v61  ;;  %v763_v8 = vadd.f32 %v761_v63, %v5606_v11 }
 0x375   : > { %1468 = vmatprep.mubr.f32.mxu0 %v6655_v34  ;;  %3949 = vpow2.f32 %v1890_v22  ;;  %v1910_v23 = vmul.f32 1.442695, %v1854_v25  ;;  %v1914_v4 = vmul.f32 1.442695, %v1856_v38  ;;  %v1831_v16 = vsub.f32 %v6656_v32, %v5613_v0 }
 0x376   : > { %3951 = vpow2.f32 %v1894_v27  ;;  %v1315_v37 = vmul.f32 %v5615_v9, %v763_v8  ;;  %v1357_v51 = vadd.f32 %v1356_v5, %v1355_v50  ;;  %v1918_v36 = vmul.f32 1.442695, %v1858_v31 }
 0x377   : > { %v5623_v48 = vpop.eup %3933  ;;  %3953 = vpow2.f32 %v1898_v55  ;;  %v1833_v15 = vsub.f32 %v5206_v14, %v5613_v0  ;;  %v1922_v58 = vmul.f32 1.442695, %v1860_v39  ;;  %v1835_v52 = vsub.f32 %v6657_v29, %v5613_v0  ;;  %v1382_v22 = vpop.trf.xlu1 }
 0x378   : > { %1469 = vmatmul.mubr.f32.gmra.mrb[36].mxu0 %v1378_v53  ;;  %v5628_v57 = vpop.eup %3935  ;;  %3955 = vpow2.f32 %v1902_v21  ;;  %v1837_v30 = vsub.f32 %v6658_v26, %v5613_v0  ;;  %v1839_v49 = vsub.f32 %v6659_v54, %v5613_v0  ;;  %v1841_v62 = vsub.f32 %v6660_v44, %v5613_v0  ;;  %v6664_v21 = vld [vmem:[#allocation42_spill] sm:$0xff]  ;;  %v6668_v54 = vld [vmem:[#allocation35_spill] sm:$0xff]  ;;  %v6669_v44 = vld [vmem:[#allocation53_spill] sm:$0xff] }
 0x379   : > { %1474 = vmatprep.mubr.f32.mxu0 %v6655_v34  ;;  %v5632_v53 = vpop.eup %3937  ;;  %3957 = vpow2.f32 %v1906_v12  ;;  %v1843_v17 = vsub.f32 %v5311_v40, %v5613_v0  ;;  %v1845_v46 = vsub.f32 %v6661_v43, %v5613_v0  ;;  %v1864_v47 = vmul.f32 1.442695, %v1831_v16  ;;  %v6665_v12 = vld [vmem:[#allocation44_spill] sm:$0xff] }
 0x37a   : > { %v5639_v3 = vpop.eup %3939  ;;  %3959 = vpow2.f32 %v1910_v23  ;;  %v1928_v14 = vadd.f32 %v5632_v53, %v5628_v57  ;;  %v1847_v6 = vsub.f32 %v6662_v2, %v5613_v0  ;;  %v1849_v40 = vsub.f32 %v6663_v24, %v5613_v0 }
 0x37b   : > { %v5647_v10 = vpop.eup %3941  ;;  %3961 = vpow2.f32 %v1914_v4  ;;  %v1872_v19 = vmul.f32 1.442695, %v1835_v52  ;;  %v1876_v41 = vmul.f32 1.442695, %v1837_v30  ;;  %v1880_v50 = vmul.f32 1.442695, %v1839_v49  ;;  %v1383_v43 = vpop.trf.xlu1 }
 0x37c   : > { %1475 = vmatmul.mubr.f32.gmra.mrb[38].mxu0 %v1379_v56  ;;  %v5653_v35 = vpop.eup %3943  ;;  %3963 = vpow2.f32 %v1918_v36  ;;  %v1929_v1 = vadd.f32 %v5639_v3, %v1928_v14  ;;  %v1868_v56 = vmul.f32 1.442695, %v1833_v15  ;;  %v1884_v20 = vmul.f32 1.442695, %v1841_v62  ;;  %v6667_v15 = vld [vmem:[#allocation30_spill] sm:$0xff] }
 0x37d   : > { %1480 = vmatprep.mubr.f32.mxu0 %v6655_v34  ;;  %v5658_v18 = vpop.eup %3945  ;;  %3965 = vpow2.f32 %v1922_v58  ;;  %v3644_v60 = vpack.c.bf16 %v5632_v53, %v5628_v57  ;;  %v3648_v63 = vpack.c.bf16 %v5647_v10, %v5639_v3  ;;  %v5676_v27 = vmul.f32 %v5623_v48, %v5567_v59 }
 0x37e   : > { %v5663_v28 = vpop.eup %3947  ;;  %v1930_v33 = vadd.f32 %v5647_v10, %v1929_v1  ;;  %3967 = vpow2.f32 %v1864_v47  ;;  %v3652_v25 = vpack.c.bf16 %v5658_v18, %v5653_v35  ;;  %v5683_v5 = vadd.f32 %v1357_v51, %v1315_v37  ;;  %v6666_v51 = vld [vmem:[#allocation48_spill] sm:$0xff] }
 0x37f   : > { %v5668_v61 = vpop.eup %3949  ;;  %3969 = vpow2.f32 %v1868_v56  ;;  %v1851_v39 = vsub.f32 %v6664_v21, %v5613_v0  ;;  %v1853_v59 = vsub.f32 %v6665_v12, %v5613_v0  ;;  %v1888_v8 = vmul.f32 1.442695, %v1843_v17 }
 0x380   : > { %1481 = vmatmul.mubr.f32.gmra.mrb[40].mxu0 %v1380_v13  ;;  %v5678_v38 = vpop.eup %3951  ;;  %v1931_v55 = vadd.f32 %v5653_v35, %v1930_v33  ;;  %v3656_v13 = vpack.c.bf16 %v5668_v61, %v5663_v28  ;;  %3971 = vpow2.f32 %v1872_v19  ;;  %v1892_v32 = vmul.f32 1.442695, %v1845_v46 }
 0x381   : > { %1486 = vmatprep.mubr.f32.mxu0 %v6655_v34  ;;  %v5685_v31 = vpop.eup %3953  ;;  %3973 = vpow2.f32 %v1876_v41  ;;  %v1855_v36 = vsub.f32 %v6666_v51, %v5613_v0  ;;  %v1857_v58 = vsub.f32 %v6667_v15, %v5613_v0  ;;  %v1896_v29 = vmul.f32 1.442695, %v1847_v6 }
 0x382   : > { %v5692_v23 = vpop.eup %3955  ;;  %v1932_v4 = vadd.f32 %v5658_v18, %v1931_v55  ;;  %v3660_v16 = vpack.c.bf16 %v5685_v31, %v5678_v38  ;;  %3975 = vpow2.f32 %v1880_v50  ;;  %v1900_v30 = vmul.f32 1.442695, %v1849_v40 }
 0x383   : > { %v5697_v37 = vpop.eup %3957  ;;  %3977 = vpow2.f32 %v1884_v20  ;;  %v1859_v49 = vsub.f32 %v6668_v54, %v5613_v0  ;;  %v1861_v62 = vsub.f32 %v6669_v44, %v5613_v0  ;;  %v1904_v17 = vmul.f32 1.442695, %v1851_v39 }
 0x384   : > { %1487 = vmatmul.mubr.f32.gmra.mrb[42].mxu0 %v1381_v42  ;;  %v5703_v52 = vpop.eup %3959  ;;  %v1933_v26 = vadd.f32 %v5663_v28, %v1932_v4  ;;  %v3664_v42 = vpack.c.bf16 %v5697_v37, %v5692_v23  ;;  %3979 = vpow2.f32 %v1888_v8  ;;  %v1908_v1 = vmul.f32 1.442695, %v1853_v59 }
 0x385   : > { %1492 = vmatprep.mubr.f32.mxu0 %v6655_v34  ;;  %v5708_v14 = vpop.eup %3961  ;;  %3981 = vpow2.f32 %v1892_v32  ;;  %v1912_v56 = vmul.f32 1.442695, %v1855_v36  ;;  %v1916_v40 = vmul.f32 1.442695, %v1857_v58  ;;  %v1920_v33 = vmul.f32 1.442695, %v1859_v49 }
 0x386   : > { %v5715_v46 = vpop.eup %3963  ;;  %v1934_v47 = vadd.f32 %v5668_v61, %v1933_v26  ;;  %v3668_v2 = vpack.c.bf16 %v5708_v14, %v5703_v52  ;;  %3983 = vpow2.f32 %v1896_v29  ;;  %v1825_v18 = vsub.f32 %v5283_v7, %v5613_v0 }
 0x387   : > { %v5720_v6 = vpop.eup %3965  ;;  %3985 = vpow2.f32 %v1900_v30 }
 0x388   : > { %1493 = vmatmul.mubr.f32.gmra.mrb[44].mxu0 %v1382_v22  ;;  %v1935_v24 = vadd.f32 %v5678_v38, %v1934_v47  ;;  %v3672_v19 = vpack.c.bf16 %v5720_v6, %v5715_v46  ;;  %v3968_v41 = vpop.eup %3967  ;;  %3987 = vpow2.f32 %v1904_v17  ;;  %v1924_v22 = vmul.f32 1.442695, %v1861_v62 }
 0x389   : > { %1498 = vmatprep.mubr.f32.mxu0 %v6655_v34  ;;  %v3970_v50 = vpop.eup %3969  ;;  %3989 = vpow2.f32 %v1908_v1  ;;  %v1828_v28 = vmul.f32 1.442695, %v1825_v18  ;;  %v3106_v18 = vld [vmem:[%s6522_s1 + $0x1f0] sm:$0xff] }
 0x38a   : > { %v1936_v20 = vadd.f32 %v5685_v31, %v1935_v24  ;;  %v3972_v55 = vpop.eup %3971  ;;  %3991 = vpow2.f32 %v1912_v56  ;;  %v1949_v21 = vadd.f32 %v3970_v50, %v3968_v41  ;;  %v3642_v39 = vpack.c.bf16 %v3970_v50, %v3968_v41 }
 0x38b   : > { %v3974_v12 = vpop.eup %3973  ;;  %3993 = vpow2.f32 %v1916_v40 }
 0x38c   : > { %1499 = vmatmul.mubr.f32.gmra.mrb[46].mxu0 %v1383_v43  ;;  %v1937_v59 = vadd.f32 %v5692_v23, %v1936_v20  ;;  %v3976_v8 = vpop.eup %3975  ;;  %3995 = vpow2.f32 %v1920_v33  ;;  %v1950_v4 = vadd.f32 %v3972_v55, %v1949_v21  ;;  %3643 = vmatprep.subr.bf16.mxu0 %v3642_v39  ;;  %v3646_v32 = vpack.c.bf16 %v3974_v12, %v3972_v55 }
 0x38d   : > { %2068 = vmatprep.mubr.f32.mxu0 %v6655_v34  ;;  %v3978_v51 = vpop.eup %3977  ;;  %3997 = vpow2.f32 %v1924_v22  ;;  %3645 = vmatpush1.bf16.msra.mxu0 %v3644_v60 }
 0x38e   : > { %v1938_v36 = vadd.f32 %v5697_v37, %v1937_v59  ;;  %v3980_v15 = vpop.eup %3979  ;;  %v1951_v58 = vadd.f32 %v3974_v12, %v1950_v4  ;;  %3647 = vmatprep.subr.bf16.mxu0 %v3646_v32  ;;  %v3650_v29 = vpack.c.bf16 %v3978_v51, %v3976_v8  ;;  %v1988_v12 = vpop.trf.xlu0  ;;  %3999 = vpow2.f32 %v1828_v28  ;;  %v6670_v37 = vld [vmem:[#allocation6_spill] sm:$0xff] }
 0x38f   : > { %v3982_v26 = vpop.eup %3981 }
 0x390   : > { %v1939_v30 = vadd.f32 %v5703_v52, %v1938_v36  ;;  %v3984_v54 = vpop.eup %3983  ;;  %v1952_v49 = vadd.f32 %v3976_v8, %v1951_v58  ;;  %v3654_v44 = vpack.c.bf16 %v3982_v26, %v3980_v15 }
 0x391   : > { %v3986_v62 = vpop.eup %3985  ;;  %3649 = vmatpush1.bf16.msra.mxu0 %v3648_v63 }
 0x392   : > { %v1940_v17 = vadd.f32 %v5708_v14, %v1939_v30  ;;  %v3988_v43 = vpop.eup %3987  ;;  %v1953_v57 = vadd.f32 %v3978_v51, %v1952_v49  ;;  %3651 = vmatprep.subr.bf16.mxu0 %v3650_v29  ;;  %v3658_v53 = vpack.c.bf16 %v3986_v62, %v3984_v54  ;;  %v1989_v61 = vpop.trf.xlu0  ;;  %v6675_v30 = vld [vmem:[#allocation9_spill] sm:$0xff]  ;;  %v6677_v49 = vld [vmem:[#allocation11_spill] sm:$0xff] }
 0x393   : > { %v3990_v60 = vpop.eup %3989 }
 0x394   : > { %v1941_v47 = vadd.f32 %v5715_v46, %v1940_v17  ;;  %v3992_v1 = vpop.eup %3991  ;;  %v1954_v56 = vadd.f32 %v3980_v15, %v1953_v57  ;;  %v3662_v24 = vpack.c.bf16 %v3990_v60, %v3988_v43  ;;  %v6672_v46 = vld [vmem:[#allocation7_spill] sm:$0xff]  ;;  %v3092_v17 = vld [vmem:[%s6522_s1 + $0x180] sm:$0xff]  ;;  %v6680_v57 = vld [vmem:[#allocation14_spill] sm:$0xff] }
 0x395   : > { %v3994_v40 = vpop.eup %3993  ;;  %3653 = vmatpush1.bf16.msra.mxu0 %v3652_v25 }
 0x396   : > { %v1942_v41 = vadd.f32 %v5720_v6, %v1941_v47  ;;  %v3996_v33 = vpop.eup %3995  ;;  %v1955_v3 = vadd.f32 %v3982_v26, %v1954_v56  ;;  %3655 = vmatprep.subr.bf16.mxu0 %v3654_v44  ;;  %v3666_v10 = vpack.c.bf16 %v3994_v40, %v3992_v1  ;;  %v1990_v31 = vpop.trf.xlu0  ;;  %v6678_v44 = vld [vmem:[#allocation12_spill] sm:$0xff]  ;;  %v6683_v47 = vld [vmem:[#allocation17_spill] sm:$0xff]  ;;  %v6685_v56 = vld [vmem:[#allocation19_spill] sm:$0xff] }
 0x397   : > { %v3998_v63 = vpop.eup %3997 }
 0x398   : > { %v1943_v50 = vrot.slane %v1942_v41, 4  ;;  %v1956_v20 = vadd.f32 %v3984_v54, %v1955_v3  ;;  %v3670_v22 = vpack.c.bf16 %v3998_v63, %v3996_v33  ;;  %v5766_v14 = vpop.eup %3999  ;;  %v6676_v54 = vld [vmem:[#allocation10_spill] sm:$0xff]  ;;  %v3095_v3 = vld [vmem:[%s6522_s1 + $0x198] sm:$0xff] }
 0x399   : > { %3657 = vmatpush1.bf16.msra.mxu0 %v3656_v13  ;;  %v1927_v6 = vmul.f32 %v5766_v14, %v5683_v5 }
 0x39a   : > { %v1944_v55 = vadd.f32 %v1943_v50, %v1942_v41  ;;  %v1957_v21 = vadd.f32 %v3986_v62, %v1956_v20  ;;  %3659 = vmatprep.subr.bf16.mxu0 %v3658_v53  ;;  %v1991_v36 = vpop.trf.xlu0  ;;  %v6681_v53 = vld [vmem:[#allocation15_spill] sm:$0xff]  ;;  %v3093_v41 = vld [vmem:[%s6522_s1 + $0x188] sm:$0xff]  ;;  %v3099_v20 = vld [vmem:[%s6522_s1 + $0x1b8] sm:$0xff] }
 0x39b   : > { %v3098_v50 = vld [vmem:[%s6522_s1 + $0x1b0] sm:$0xff] }
 0x39c   : > { %v1945_v39 = vrot.slane %v1944_v55, 2  ;;  %v1958_v59 = vadd.f32 %v3988_v43, %v1957_v21  ;;  %v6679_v43 = vld [vmem:[#allocation13_spill] sm:$0xff]  ;;  %v3102_v21 = vld [vmem:[%s6522_s1 + $0x1d0] sm:$0xff] }
 0x39d   : > { %3661 = vmatpush1.bf16.msra.mxu0 %v3660_v16 }
 0x39e   : > { %v1946_v35 = vadd.f32 %v1945_v39, %v1944_v55  ;;  %v1959_v25 = vadd.f32 %v3990_v60, %v1958_v59  ;;  %3663 = vmatprep.subr.bf16.mxu0 %v3662_v24  ;;  %v1992_v58 = vpop.trf.xlu0  ;;  %v6682_v60 = vld [vmem:[#allocation16_spill] sm:$0xff]  ;;  %v3101_v55 = vld [vmem:[%s6522_s1 + $0x1c8] sm:$0xff]  ;;  %v3108_v59 = vld [vmem:[%s6523_s2 + $0x180] sm:$0xff] }
 0x39f   : > { %v6686_v24 = vld [vmem:[#allocation20_spill] sm:$0xff]  ;;  %2584 = vxpose.xlu1.b32.start [1/16] (narrow) %v3108_v59, 64 }
 0x3a0   : > { %v1947_v8 = vrot.slane %v1946_v35, 1  ;;  %v1960_v4 = vadd.f32 %v3992_v1, %v1959_v25  ;;  %v6684_v1 = vld [vmem:[#allocation18_spill] sm:$0xff]  ;;  %v3103_v39 = vld [vmem:[%s6522_s1 + $0x1d8] sm:$0xff] }
 0x3a1   : > { %3665 = vmatpush1.bf16.msra.mxu0 %v3664_v42  ;;  %v3107_v25 = vld [vmem:[%s6522_s1 + $0x1f8] sm:$0xff] }
 0x3a2   : > { %v1948_v32 = vadd.f32 %v1947_v8, %v1946_v35  ;;  %v1961_v13 = vadd.f32 %v3994_v40, %v1960_v4  ;;  %3667 = vmatprep.subr.bf16.mxu0 %v3666_v10  ;;  %v1993_v26 = vpop.trf.xlu0  ;;  %v6687_v40 = vld [vmem:[#allocation21_spill] sm:$0xff]  ;;  %v3105_v35 = vld [vmem:[%s6522_s1 + $0x1e8] sm:$0xff]  ;;  %v6688_v8 = vld [vmem:[#allocation23_spill] sm:$0xff] }
 0x3a3   : > { %v3096_v10 = vld [vmem:[%s6522_s1 + $0x1a0] sm:$0xff]  ;;  %v910_v4 = vadd.f32 %v6688_v8, %v5606_v11 }
 0x3a4   : > { %v5754_v51 = vadd.f32 %v1948_v32, %v5676_v27  ;;  %v1962_v7 = vadd.f32 %v3996_v33, %v1961_v13  ;;  %v3094_v33 = vld [vmem:[%s6522_s1 + $0x190] sm:$0xff] }
 0x3a5   : > { %3669 = vmatpush1.bf16.msra.mxu0 %v3668_v2  ;;  %v1506_v28 = vmul.f32 %v5615_v9, %v910_v4  ;;  %v6700_v4 = vld [vmem:[#allocation29_spill] sm:$0xff] }
 0x3a6   : > { %v1963_v38 = vadd.f32 %v3998_v63, %v1962_v7  ;;  %3671 = vmatprep.subr.bf16.mxu0 %v3670_v22  ;;  %v1994_v5 = vpop.trf.xlu0  ;;  %v3097_v63 = vld [vmem:[%s6522_s1 + $0x1a8] sm:$0xff]  ;;  %v3100_v22 = vld [vmem:[%s6522_s1 + $0x1c0] sm:$0xff] }
 0x3a8   : > { %v1964_v16 = vrot.slane %v1963_v38, 4 }
 0x3a9   : > { %3673 = vmatpush1.bf16.msra.mxu0 %v3672_v19  ;;  %v6673_v19 = vld [vmem:[#allocation8_spill] sm:$0xff] }
 0x3aa   : > { %v1965_v23 = vadd.f32 %v1964_v16, %v1963_v38  ;;  %3676 = vmatprep.subr.msk.bf16.mxu0 %vm4231_vm1, %v6670_v37  ;;  %v1995_v62 = vpop.trf.xlu0  ;;  %v6690_v38 = vld [vmem:[#allocation24_spill] sm:$0xff] }
 0x3ac   : > { %v1966_v27 = vrot.slane %v1965_v23, 2  ;;  %2069 = vmatmul.mubr.f32.vlgmr.msra.gmra.mrb[48].mxu0 %v1988_v12  ;;  %v3104_v12 = vld [vmem:[%s6522_s1 + $0x1e0] sm:$0xff] }
 0x3ad   : > { %2074 = vmatprep.mubr.f32.mxu0 %v6655_v34 }
 0x3ae   : > { %v1967_v52 = vadd.f32 %v1966_v27, %v1965_v23  ;;  %v6691_v27 = vld [vmem:[#allocation45_spill] sm:$0xff] }
 0x3b0   : > { %v1968_v2 = vrot.slane %v1967_v52, 1  ;;  %2075 = vmatmul.mubr.f32.gmra.mrb[50].mxu0 %v1989_v61  ;;  %v6689_v61 = vld [vmem:[#allocation43_spill] sm:$0xff] }
 0x3b1   : > { %2080 = vmatprep.mubr.f32.mxu0 %v6655_v34 }
 0x3b2   : > { %v1969_v15 = vadd.f32 %v1968_v2, %v1967_v52  ;;  %3679 = vmatpush3.bf16.xpose.msk.msra.mxu0 %vm4231_vm1, %v6672_v46  ;;  %v6692_v2 = vld [vmem:[#allocation25_spill] sm:$0xff] }
 0x3b3   : > { %3682 = vmatprep.subr.msk.bf16.mxu0 %vm4231_vm1, %v6673_v19  ;;  %v3109_v19 = vld [vmem:[%s6523_s2 + $0x188] sm:$0xff] }
 0x3b4   : > { %2081 = vmatmul.mubr.f32.gmra.mrb[52].mxu0 %v1990_v31  ;;  %v5777_v29 = vadd.f32 %v1969_v15, %v1927_v6  ;;  %v912_v31 = vadd.f32 %v6690_v38, %v5606_v11  ;;  %v914_v15 = vadd.f32 %v6692_v2, %v5606_v11  ;;  %2585 = vxpose.xlu1.b32.cont [2/16] (narrow) %v3109_v19, 64  ;;  %v3113_v38 = vld [vmem:[%s6523_s2 + $0x1a8] sm:$0xff] }
 0x3b5   : > { %2086 = vmatprep.mubr.f32.mxu0 %v6655_v34 }
 0x3b6   : > { %6674 = vst [vmem:[#allocation22_spill] sm:$0xff] %v5777_v29  ;;  %v1508_v42 = vmul.f32 %v5615_v9, %v912_v31  ;;  %v6701_v31 = vld [vmem:[#allocation51_spill] sm:$0xff] }
 0x3b8   : > { %2087 = vmatmul.mubr.f32.gmra.mrb[54].mxu0 %v1991_v36 }
 0x3b9   : > { %2092 = vmatprep.mubr.f32.mxu0 %v6655_v34 }
 0x3ba   : > { %3685 = vmatpush3.bf16.xpose.msk.msra.mxu0 %vm4231_vm1, %v6675_v30  ;;  %v6693_v30 = vld [vmem:[#allocation46_spill] sm:$0xff] }
 0x3bb   : > { %3688 = vmatprep.subr.msk.bf16.mxu0 %vm4231_vm1, %v6676_v54 }
 0x3bc   : > { %2093 = vmatmul.mubr.f32.gmra.mrb[56].mxu0 %v1992_v58 }
 0x3bd   : > { %2098 = vmatprep.mubr.f32.mxu0 %v6655_v34 }
 0x3c0   : > { %2099 = vmatmul.mubr.f32.gmra.mrb[58].mxu0 %v1993_v26  ;;  %v1510_v26 = vmul.f32 %v5615_v9, %v914_v15 }
 0x3c1   : > { %2104 = vmatprep.mubr.f32.mxu0 %v6655_v34 }
 0x3c2   : > { %3691 = vmatpush3.bf16.xpose.msk.msra.mxu0 %vm4231_vm1, %v6677_v49  ;;  %v6694_v49 = vld [vmem:[#allocation26_spill] sm:$0xff] }
 0x3c3   : > { %3694 = vmatprep.subr.msk.bf16.mxu0 %vm4231_vm1, %v6678_v44  ;;  %v916_v44 = vadd.f32 %v6694_v49, %v5606_v11 }
 0x3c4   : > { %2105 = vmatmul.mubr.f32.gmra.mrb[60].mxu0 %v1994_v5 }
 0x3c5   : > { %2110 = vmatprep.mubr.f32.mxu0 %v6655_v34 }
 0x3c8   : > { %2111 = vmatmul.mubr.f32.gmra.mrb[62].mxu0 %v1995_v62 }
 0x3c9   : > { %3402 = vmatprep.mubr.msk.f32.mxu0 %vm268_vm0, %v3092_v17 }
 0x3ca   : > { %3697 = vmatpush3.bf16.xpose.msk.msra.mxu0 %vm4231_vm1, %v6679_v43  ;;  %v3110_v43 = vld [vmem:[%s6523_s2 + $0x190] sm:$0xff] }
 0x3cb   : > { %3700 = vmatprep.subr.msk.bf16.mxu0 %vm4231_vm1, %v6680_v57  ;;  %2586 = vxpose.xlu1.b32.cont [3/16] (narrow) %v3110_v43, 64  ;;  %v3118_v43 = vld [vmem:[%s6523_s2 + $0x1d0] sm:$0xff] }
 0x3d2   : > { %3703 = vmatpush3.bf16.xpose.msk.msra.mxu0 %vm4231_vm1, %v6681_v53  ;;  %v1512_v53 = vmul.f32 %v5615_v9, %v916_v44  ;;  %v3117_v44 = vld [vmem:[%s6523_s2 + $0x1c8] sm:$0xff] }
 0x3d3   : > { %3706 = vmatprep.subr.msk.bf16.mxu0 %vm4231_vm1, %v6682_v60  ;;  %v6695_v60 = vld [vmem:[#allocation47_spill] sm:$0xff] }
 0x3da   : > { %3709 = vmatpush3.bf16.xpose.msk.msra.mxu0 %vm4231_vm1, %v6683_v47 }
 0x3db   : > { %3712 = vmatprep.subr.msk.bf16.mxu0 %vm4231_vm1, %v6684_v1 }
 0x3e2   : > { %3715 = vmatpush3.bf16.xpose.msk.msra.mxu0 %vm4231_vm1, %v6685_v56  ;;  %v6696_v56 = vld [vmem:[#allocation27_spill] sm:$0xff] }
 0x3e3   : > { %3718 = vmatprep.subr.msk.bf16.mxu0 %vm4231_vm1, %v6686_v24  ;;  %v918_v24 = vadd.f32 %v6696_v56, %v5606_v11 }
 0x3ea   : > { %3721 = vmatpush3.bf16.xpose.msk.msra.mxu0 %vm4231_vm1, %v6687_v40 }
 0x3f1   : > { %3403 = vmatmul.mubr.msk.f32.vlgmr.msra.gmra.mrb[64].mxu0 %vm268_vm0, %v3092_v17 }
 0x3f2   : > { %3404 = vmatprep.mubr.msk.f32.mxu0 %vm268_vm0, %v3093_v41 }
 0x3f5   : > { %3405 = vmatmul.mubr.msk.f32.gmra.mrb[66].mxu0 %vm268_vm0, %v3093_v41 }
 0x3f6   : > { %3406 = vmatprep.mubr.msk.f32.mxu0 %vm268_vm0, %v3094_v33 }
 0x3f9   : > { %3407 = vmatmul.mubr.msk.f32.gmra.mrb[68].mxu0 %vm268_vm0, %v3094_v33 }
 0x3fa   : > { %3408 = vmatprep.mubr.msk.f32.mxu0 %vm268_vm0, %v3095_v3 }
 0x3fd   : > { %3409 = vmatmul.mubr.msk.f32.gmra.mrb[70].mxu0 %vm268_vm0, %v3095_v3  ;;  %v1514_v3 = vmul.f32 %v5615_v9, %v918_v24 }
 0x3fe   : > { %3410 = vmatprep.mubr.msk.f32.mxu0 %vm268_vm0, %v3096_v10 }
 0x401   : > { %3411 = vmatmul.mubr.msk.f32.gmra.mrb[72].mxu0 %vm268_vm0, %v3096_v10  ;;  %v3111_v10 = vld [vmem:[%s6523_s2 + $0x198] sm:$0xff] }
 0x402   : > { %3412 = vmatprep.mubr.msk.f32.mxu0 %vm268_vm0, %v3097_v63  ;;  %2587 = vxpose.xlu1.b32.cont [4/16] (narrow) %v3111_v10, 64 }
 0x405   : > { %3413 = vmatmul.mubr.msk.f32.gmra.mrb[74].mxu0 %vm268_vm0, %v3097_v63  ;;  %v6697_v63 = vld [vmem:[#allocation49_spill] sm:$0xff] }
 0x406   : > { %3414 = vmatprep.mubr.msk.f32.mxu0 %vm268_vm0, %v3098_v50 }
 0x409   : > { %3415 = vmatmul.mubr.msk.f32.gmra.mrb[76].mxu0 %vm268_vm0, %v3098_v50 }
 0x40a   : > { %3416 = vmatprep.mubr.msk.f32.mxu0 %vm268_vm0, %v3099_v20 }
 0x40d   : > { %3417 = vmatmul.mubr.msk.f32.gmra.mrb[78].mxu0 %vm268_vm0, %v3099_v20 }
 0x40e   : > { %3418 = vmatprep.mubr.msk.f32.mxu0 %vm268_vm0, %v3100_v22 }
 0x411   : > { %3419 = vmatmul.mubr.msk.f32.gmra.mrb[80].mxu0 %vm268_vm0, %v3100_v22  ;;  %v6698_v22 = vld [vmem:[#allocation28_spill] sm:$0xff] }
 0x412   : > { %3420 = vmatprep.mubr.msk.f32.mxu0 %vm268_vm0, %v3101_v55 }
 0x415   : > { %3421 = vmatmul.mubr.msk.f32.gmra.mrb[82].mxu0 %vm268_vm0, %v3101_v55  ;;  %v920_v55 = vadd.f32 %v6698_v22, %v5606_v11 }
 0x416   : > { %3422 = vmatprep.mubr.msk.f32.mxu0 %vm268_vm0, %v3102_v21 }
 0x417   : > { %v1516_v59 = vmul.f32 %v5615_v9, %v920_v55 }
 0x419   : > { %3423 = vmatmul.mubr.msk.f32.gmra.mrb[84].mxu0 %vm268_vm0, %v3102_v21 }
 0x41a   : > { %3424 = vmatprep.mubr.msk.f32.mxu0 %vm268_vm0, %v3103_v39 }
 0x41d   : > { %3425 = vmatmul.mubr.msk.f32.gmra.mrb[86].mxu0 %vm268_vm0, %v3103_v39 }
 0x41e   : > { %3426 = vmatprep.mubr.msk.f32.mxu0 %vm268_vm0, %v3104_v12 }
 0x421   : > { %3427 = vmatmul.mubr.msk.f32.gmra.mrb[88].mxu0 %vm268_vm0, %v3104_v12 }
 0x422   : > { %3428 = vmatprep.mubr.msk.f32.mxu0 %vm268_vm0, %v3105_v35 }
 0x425   : > { %3429 = vmatmul.mubr.msk.f32.gmra.mrb[90].mxu0 %vm268_vm0, %v3105_v35  ;;  %v3112_v35 = vld [vmem:[%s6523_s2 + $0x1a0] sm:$0xff] }
 0x426   : > { %3430 = vmatprep.mubr.msk.f32.mxu0 %vm268_vm0, %v3106_v18  ;;  %2588 = vxpose.xlu1.b32.cont [5/16] (narrow) %v3112_v35, 64 }
 0x429   : > { %3431 = vmatmul.mubr.msk.f32.gmra.mrb[92].mxu0 %vm268_vm0, %v3106_v18  ;;  %v6699_v18 = vld [vmem:[#allocation50_spill] sm:$0xff] }
 0x42a   : > { %3432 = vmatprep.mubr.msk.f32.mxu0 %vm268_vm0, %v3107_v25  ;;  %2589 = vxpose.xlu1.b32.cont [6/16] (narrow) %v3113_v38, 64 }
 0x42d   : > { %3433 = vmatmul.mubr.msk.f32.gmra.mrb[94].mxu0 %vm268_vm0, %v3107_v25 }
 0x443   : > { %v1458_v32 = vpop.f32.mrb[32].mxu0 }
 0x444   : > { %v1521_v13 = vadd.f32 %v6689_v61, %v1458_v32  ;;  %v1460_v7 = vpop.f32.mrb[33].mxu0  ;;  %v922_v32 = vadd.f32 %v6700_v4, %v5606_v11 }
 0x445   : > { %v5912_v16 = vadd.f32 %v1506_v28, %v1460_v7 }
 0x446   : > { %v5915_v23 = vmul.f32 %v5623_v48, %v1521_v13  ;;  %v1518_v7 = vmul.f32 %v5615_v9, %v922_v32 }
 0x447   : > { %v1464_v37 = vpop.f32.mrb[34].mxu0  ;;  %v2118_v56 = vmul.f32 %v5766_v14, %v5912_v16 }
 0x448   : > { %v1523_v36 = vadd.f32 %v6691_v27, %v1464_v37  ;;  %v1466_v52 = vpop.f32.mrb[35].mxu0  ;;  %v6702_v27 = vld [vmem:[#allocation31_spill] sm:$0xff] }
 0x449   : > { %v5921_v46 = vadd.f32 %v1508_v42, %v1466_v52 }
 0x44a   : > { %v5924_v6 = vmul.f32 %v5623_v48, %v1523_v36  ;;  %v924_v36 = vadd.f32 %v6702_v27, %v5606_v11  ;;  %v3115_v11 = vld [vmem:[%s6523_s2 + $0x1b8] sm:$0xff] }
 0x44b   : > { %v1470_v58 = vpop.f32.mrb[36].mxu0 }
 0x44c   : > { %v1525_v54 = vadd.f32 %v6693_v30, %v1470_v58  ;;  %v1472_v5 = vpop.f32.mrb[37].mxu0  ;;  %v1520_v19 = vmul.f32 %v5615_v9, %v924_v36  ;;  %v3114_v58 = vld [vmem:[%s6523_s2 + $0x1b0] sm:$0xff]  ;;  %v3116_v9 = vld [vmem:[%s6523_s2 + $0x1c0] sm:$0xff] }
 0x44d   : > { %v5933_v62 = vadd.f32 %v1510_v26, %v1472_v5  ;;  %v6703_v26 = vld [vmem:[#allocation52_spill] sm:$0xff]  ;;  %2590 = vxpose.xlu1.b32.cont [7/16] (narrow) %v3114_v58, 64 }
 0x44e   : > { %v5936_v17 = vmul.f32 %v5623_v48, %v1525_v54 }
 0x44f   : > { %v1476_v57 = vpop.f32.mrb[38].mxu0  ;;  %v2122_v16 = vmul.f32 %v5766_v14, %v5933_v62 }
 0x450   : > { %v1527_v47 = vadd.f32 %v6695_v60, %v1476_v57  ;;  %v1478_v1 = vpop.f32.mrb[39].mxu0  ;;  %v3120_v57 = vld [vmem:[%s6523_s2 + $0x1e0] sm:$0xff]  ;;  %v3122_v60 = vld [vmem:[%s6523_s2 + $0x1f0] sm:$0xff] }
 0x451   : > { %v5945_v40 = vadd.f32 %v1512_v53, %v1478_v1  ;;  %2591 = vxpose.xlu1.b32.cont [8/16] (narrow) %v3115_v11, 64  ;;  %v3121_v53 = vld [vmem:[%s6523_s2 + $0x1e8] sm:$0xff] }
 0x452   : > { %v5948_v41 = vmul.f32 %v5623_v48, %v1527_v47  ;;  %v3123_v47 = vld [vmem:[%s6523_s2 + $0x1f8] sm:$0xff] }
 0x453   : > { %v1482_v33 = vpop.f32.mrb[40].mxu0 }
 0x454   : > { %v1529_v50 = vadd.f32 %v6697_v63, %v1482_v33  ;;  %v1484_v20 = vpop.f32.mrb[41].mxu0  ;;  %v2120_v63 = vmul.f32 %v5766_v14, %v5921_v46  ;;  %v2124_v46 = vmul.f32 %v5766_v14, %v5945_v40 }
 0x455   : > { %v5957_v21 = vadd.f32 %v1514_v3, %v1484_v20  ;;  %2592 = vxpose.xlu1.b32.cont [9/16] (narrow) %v3116_v9, 64 }
 0x456   : > { %v5960_v39 = vmul.f32 %v5623_v48, %v1529_v50 }
 0x457   : > { %v1488_v12 = vpop.f32.mrb[42].mxu0  ;;  %v2126_v62 = vmul.f32 %v5766_v14, %v5957_v21 }
 0x458   : > { %v1531_v25 = vadd.f32 %v6699_v18, %v1488_v12  ;;  %v1490_v8 = vpop.f32.mrb[43].mxu0 }
 0x459   : > { %v5969_v28 = vadd.f32 %v1516_v59, %v1490_v8  ;;  %2593 = vxpose.xlu1.b32.cont [10/16] (narrow) %v3117_v44, 64 }
 0x45a   : > { %v5972_v61 = vmul.f32 %v5623_v48, %v1531_v25 }
 0x45b   : > { %v1494_v13 = vpop.f32.mrb[44].mxu0  ;;  %v2128_v40 = vmul.f32 %v5766_v14, %v5969_v28 }
 0x45c   : > { %v1533_v37 = vadd.f32 %v6701_v31, %v1494_v13  ;;  %v1496_v42 = vpop.f32.mrb[45].mxu0 }
 0x45d   : > { %v1534_v52 = vadd.f32 %v1518_v7, %v1496_v42  ;;  %2594 = vxpose.xlu1.b32.cont [11/16] (narrow) %v3118_v43, 64 }
 0x45e   : > { %v2129_v2 = vmul.f32 %v5623_v48, %v1533_v37 }
 0x45f   : > { %v1500_v15 = vpop.f32.mrb[46].mxu0  ;;  %v2130_v37 = vmul.f32 %v5766_v14, %v1534_v52 }
 0x460   : > { %v1535_v30 = vadd.f32 %v6703_v26, %v1500_v15  ;;  %v1502_v54 = vpop.f32.mrb[47].mxu0 }
 0x461   : > { %v1536_v5 = vadd.f32 %v1520_v19, %v1502_v54 }
 0x462   : > { %v2131_v49 = vmul.f32 %v5623_v48, %v1535_v30  ;;  %v3119_v48 = vld [vmem:[%s6523_s2 + $0x1d8] sm:$0xff] }
 0x463   : > { %2595 = vxpose.xlu1.b32.cont [12/16] (narrow) %v3119_v48, 64  ;;  %v2132_v36 = vmul.f32 %v5766_v14, %v1536_v5 }
 0x467   : > { %2596 = vxpose.xlu1.b32.cont [13/16] (narrow) %v3120_v57, 64 }
 0x46b   : > { %2597 = vxpose.xlu1.b32.cont [14/16] (narrow) %v3121_v53, 64 }
 0x46f   : > { %2598 = vxpose.xlu1.b32.cont [15/16] (narrow) %v3122_v60, 64 }
 0x473   : > { %2599 = vxpose.xlu1.b32.end [16/16] (narrow) %v3123_v47, 64 }
 0x47f   : > { %v2070_v1 = vpop.f32.mrb[48].mxu0 }
 0x480   : > { %v6018_v24 = vadd.f32 %v5915_v23, %v2070_v1  ;;  %v2072_v33 = vpop.f32.mrb[49].mxu0 }
 0x481   : > { %v6020_v3 = vadd.f32 %v2118_v56, %v2072_v33 }
 0x483   : > { %6704 = vst [vmem:[#allocation36_spill] sm:$0xff] %v6020_v3  ;;  %v2076_v10 = vpop.f32.mrb[50].mxu0 }
 0x484   : > { %v6025_v50 = vadd.f32 %v5924_v6, %v2076_v10  ;;  %v2078_v20 = vpop.f32.mrb[51].mxu0 }
 0x485   : > { %v6027_v22 = vadd.f32 %v2120_v63, %v2078_v20 }
 0x487   : > { %6705 = vst [vmem:[#allocation32_spill] sm:$0xff] %v6027_v22  ;;  %v2082_v55 = vpop.f32.mrb[52].mxu0 }
 0x488   : > { %v6032_v23 = vadd.f32 %v5936_v17, %v2082_v55  ;;  %v2084_v12 = vpop.f32.mrb[53].mxu0 }
 0x489   : > { %v6034_v59 = vadd.f32 %v2122_v16, %v2084_v12 }
 0x48b   : > { %6706 = vst [vmem:[#allocation33_spill] sm:$0xff] %v6034_v59  ;;  %v2088_v35 = vpop.f32.mrb[54].mxu0 }
 0x48c   : > { %v6039_v6 = vadd.f32 %v5948_v41, %v2088_v35  ;;  %v2090_v18 = vpop.f32.mrb[55].mxu0 }
 0x48d   : > { %v6041_v25 = vadd.f32 %v2124_v46, %v2090_v18 }
 0x48f   : > { %6707 = vst [vmem:[#allocation34_spill] sm:$0xff] %v6041_v25  ;;  %v2094_v8 = vpop.f32.mrb[56].mxu0 }
 0x490   : > { %v6046_v17 = vadd.f32 %v5960_v39, %v2094_v8  ;;  %v2096_v4 = vpop.f32.mrb[57].mxu0 }
 0x491   : > { %v6048_v32 = vadd.f32 %v2126_v62, %v2096_v4 }
 0x493   : > { %6708 = vst [vmem:[#allocation37_spill] sm:$0xff] %v6048_v32  ;;  %v2100_v13 = vpop.f32.mrb[58].mxu0 }
 0x494   : > { %v6053_v41 = vadd.f32 %v5972_v61, %v2100_v13  ;;  %v2102_v7 = vpop.f32.mrb[59].mxu0 }
 0x495   : > { %v6055_v38 = vadd.f32 %v2128_v40, %v2102_v7 }
 0x497   : > { %6709 = vst [vmem:[#allocation38_spill] sm:$0xff] %v6055_v38  ;;  %v2106_v31 = vpop.f32.mrb[60].mxu0 }
 0x498   : > { %v6058_v21 = vadd.f32 %v2129_v2, %v2106_v31  ;;  %v2108_v39 = vpop.f32.mrb[61].mxu0 }
 0x499   : > { %v6060_v42 = vadd.f32 %v2130_v37, %v2108_v39 }
 0x49b   : > { %6710 = vst [vmem:[#allocation39_spill] sm:$0xff] %v6060_v42  ;;  %v2112_v27 = vpop.f32.mrb[62].mxu0 }
 0x49c   : > { %v6063_v15 = vadd.f32 %v2131_v49, %v2112_v27  ;;  %v2114_v28 = vpop.f32.mrb[63].mxu0 }
 0x49d   : > { %v6065_v19 = vadd.f32 %v2132_v36, %v2114_v28 }
 0x49f   : > { %6711 = vst [vmem:[#allocation40_spill] sm:$0xff] %v6065_v19 }
 0x4c4   : > { %v6067_v61 = vpop.f32.mrb[64].mxu0 }
 0x4c5   : > { %v6069_v58 = vpop.f32.mrb[65].mxu0 }
 0x4c8   : > { %v6071_v26 = vpop.f32.mrb[66].mxu0 }
 0x4c9   : > { %v6073_v52 = vpop.f32.mrb[67].mxu0 }
 0x4cc   : > { %v6075_v2 = vpop.f32.mrb[68].mxu0 }
 0x4cd   : > { %v2392_v30 = vmax.f32 %v6067_v61, %v6075_v2  ;;  %v6079_v54 = vpop.f32.mrb[69].mxu0 }
 0x4ce   : > { %v2413_v14 = vmax.f32 %v6069_v58, %v6079_v54 }
 0x4d0   : > { %v6083_v5 = vpop.f32.mrb[70].mxu0 }
 0x4d1   : > { %v2393_v49 = vmax.f32 %v6071_v26, %v6083_v5  ;;  %v6087_v11 = vpop.f32.mrb[71].mxu0 }
 0x4d2   : > { %v2414_v9 = vmax.f32 %v6073_v52, %v6087_v11 }
 0x4d4   : > { %v6091_v44 = vpop.f32.mrb[72].mxu0 }
 0x4d5   : > { %v2394_v43 = vmax.f32 %v2392_v30, %v6091_v44  ;;  %v6094_v48 = vpop.f32.mrb[73].mxu0 }
 0x4d6   : > { %v2415_v57 = vmax.f32 %v2413_v14, %v6094_v48 }
 0x4d8   : > { %v6097_v53 = vpop.f32.mrb[74].mxu0 }
 0x4d9   : > { %v2395_v60 = vmax.f32 %v2393_v49, %v6097_v53  ;;  %v6100_v47 = vpop.f32.mrb[75].mxu0 }
 0x4da   : > { %v2416_v1 = vmax.f32 %v2414_v9, %v6100_v47 }
 0x4dc   : > { %v6103_v56 = vpop.f32.mrb[76].mxu0 }
 0x4dd   : > { %v2396_v33 = vmax.f32 %v2394_v43, %v6103_v56  ;;  %v6106_v10 = vpop.f32.mrb[77].mxu0 }
 0x4de   : > { %v2417_v63 = vmax.f32 %v2415_v57, %v6106_v10 }
 0x4e0   : > { %v6109_v20 = vpop.f32.mrb[78].mxu0 }
 0x4e1   : > { %v2397_v55 = vmax.f32 %v2395_v60, %v6109_v20  ;;  %v6112_v16 = vpop.f32.mrb[79].mxu0 }
 0x4e2   : > { %v2418_v12 = vmax.f32 %v2416_v1, %v6112_v16 }
 0x4e4   : > { %v6115_v35 = vpop.f32.mrb[80].mxu0 }
 0x4e5   : > { %v2398_v46 = vmax.f32 %v2396_v33, %v6115_v35  ;;  %v6118_v18 = vpop.f32.mrb[81].mxu0 }
 0x4e6   : > { %v2419_v8 = vmax.f32 %v2417_v63, %v6118_v18 }
 0x4e8   : > { %v6121_v62 = vpop.f32.mrb[82].mxu0 }
 0x4e9   : > { %v2399_v4 = vmax.f32 %v2397_v55, %v6121_v62  ;;  %v6124_v13 = vpop.f32.mrb[83].mxu0 }
 0x4ea   : > { %v2420_v40 = vmax.f32 %v2418_v12, %v6124_v13 }
 0x4ec   : > { %v6127_v7 = vpop.f32.mrb[84].mxu0 }
 0x4ed   : > { %v2400_v31 = vmax.f32 %v2398_v46, %v6127_v7  ;;  %v6130_v37 = vpop.f32.mrb[85].mxu0 }
 0x4ee   : > { %v2421_v39 = vmax.f32 %v2419_v8, %v6130_v37 }
 0x4f0   : > { %v6133_v27 = vpop.f32.mrb[86].mxu0 }
 0x4f1   : > { %v2401_v36 = vmax.f32 %v2399_v4, %v6133_v27  ;;  %v6136_v28 = vpop.f32.mrb[87].mxu0 }
 0x4f2   : > { %v2422_v30 = vmax.f32 %v2420_v40, %v6136_v28 }
 0x4f4   : > { %v6139_v14 = vpop.f32.mrb[88].mxu0 }
 0x4f5   : > { %v2402_v49 = vmax.f32 %v2400_v31, %v6139_v14  ;;  %v6142_v9 = vpop.f32.mrb[89].mxu0 }
 0x4f6   : > { %v2423_v43 = vmax.f32 %v2421_v39, %v6142_v9 }
 0x4f8   : > { %v6145_v57 = vpop.f32.mrb[90].mxu0 }
 0x4f9   : > { %v2403_v60 = vmax.f32 %v2401_v36, %v6145_v57  ;;  %v6148_v1 = vpop.f32.mrb[91].mxu0 }
 0x4fa   : > { %v2424_v33 = vmax.f32 %v2422_v30, %v6148_v1 }
 0x4fc   : > { %v6151_v63 = vpop.f32.mrb[92].mxu0 }
 0x4fd   : > { %v2404_v55 = vmax.f32 %v2402_v49, %v6151_v63  ;;  %v6154_v12 = vpop.f32.mrb[93].mxu0 }
 0x4fe   : > { %v2425_v46 = vmax.f32 %v2423_v43, %v6154_v12 }
 0x500   : > { %v6157_v8 = vpop.f32.mrb[94].mxu0 }
 0x501   : > { %v2405_v4 = vmax.f32 %v2403_v60, %v6157_v8  ;;  %v6160_v40 = vpop.f32.mrb[95].mxu0 }
 0x502   : > { %v2426_v31 = vmax.f32 %v2424_v33, %v6160_v40 }
 0x503   : > { %v2406_v39 = vmax.f32 %v2404_v55, %v2405_v4 }
 0x504   : > { %v2427_v36 = vmax.f32 %v2425_v46, %v2426_v31 }
 0x505   : > { %v2407_v34 = vrot.slane %v2406_v39, 4 }
 0x506   : > { %v2428_v30 = vrot.slane %v2427_v36, 4 }
 0x507   : > { %v2408_v19 = vmax.f32 %v2406_v39, %v2407_v34 }
 0x508   : > { %v2429_v42 = vmax.f32 %v2427_v36, %v2428_v30 }
 0x509   : > { %v2409_v38 = vrot.slane %v2408_v19, 2 }
 0x50a   : > { %v2430_v49 = vrot.slane %v2429_v42, 2 }
 0x50b   : > { %v2410_v32 = vmax.f32 %v2408_v19, %v2409_v38 }
 0x50c   : > { %v2431_v25 = vmax.f32 %v2429_v42, %v2430_v49 }
 0x50d   : > { %v2411_v59 = vrot.slane %v2410_v32, 1 }
 0x50e   : > { %v2432_v43 = vrot.slane %v2431_v25, 1 }
 0x50f   : > { %v2412_v22 = vmax.f32 %v2410_v32, %v2411_v59 }
 0x510   : > { %v2433_v3 = vmax.f32 %v2431_v25, %v2432_v43 }
 0x511   : > { %v6164_v60 = vmax.f32 %v5573_v45, %v2412_v22 }
 0x512   : > { %v6167_v29 = vmax.f32 %v5613_v0, %v2433_v3 }
 0x513   : > { %v2436_v33 = vsub.f32 %v5573_v45, %v6164_v60  ;;  %v2442_v34 = vsub.f32 %v6067_v61, %v6164_v60  ;;  %v2444_v38 = vsub.f32 %v6071_v26, %v6164_v60  ;;  %v2446_v42 = vsub.f32 %v6075_v2, %v6164_v60 }
 0x514   : > { %v2448_v59 = vsub.f32 %v6083_v5, %v6164_v60  ;;  %v2450_v22 = vsub.f32 %v6091_v44, %v6164_v60  ;;  %v2452_v3 = vsub.f32 %v6097_v53, %v6164_v60  ;;  %v2454_v45 = vsub.f32 %v6103_v56, %v6164_v60 }
 0x515   : > { %v2438_v25 = vmul.f32 1.442695, %v2436_v33  ;;  %v2456_v32 = vsub.f32 %v6109_v20, %v6164_v60  ;;  %v2458_v19 = vsub.f32 %v6115_v35, %v6164_v60  ;;  %v2460_v61 = vsub.f32 %v6121_v62, %v6164_v60 }
 0x516   : > { %v2462_v26 = vsub.f32 %v6127_v7, %v6164_v60  ;;  %v2464_v2 = vsub.f32 %v6133_v27, %v6164_v60  ;;  %v2466_v5 = vsub.f32 %v6139_v14, %v6164_v60  ;;  %v2468_v44 = vsub.f32 %v6145_v57, %v6164_v60 }
 0x517   : > { %v2470_v53 = vsub.f32 %v6151_v63, %v6164_v60  ;;  %v2472_v56 = vsub.f32 %v6157_v8, %v6164_v60  ;;  %v2474_v20 = vmul.f32 1.442695, %v2442_v34  ;;  %4001 = vpow2.f32 %v2438_v25 }
 0x518   : > { %v2478_v35 = vmul.f32 1.442695, %v2444_v38  ;;  %v2482_v62 = vmul.f32 1.442695, %v2446_v42  ;;  %v2486_v7 = vmul.f32 1.442695, %v2448_v59  ;;  %v2437_v14 = vsub.f32 %v5613_v0, %v6167_v29 }
 0x519   : > { %4003 = vpow2.f32 %v2474_v20  ;;  %v2490_v55 = vmul.f32 1.442695, %v2450_v22  ;;  %v2494_v27 = vmul.f32 1.442695, %v2452_v3  ;;  %v2498_v57 = vmul.f32 1.442695, %v2454_v45 }
 0x51a   : > { %4005 = vpow2.f32 %v2478_v35  ;;  %v2502_v46 = vmul.f32 1.442695, %v2456_v32  ;;  %v2506_v4 = vmul.f32 1.442695, %v2458_v19  ;;  %v2510_v63 = vmul.f32 1.442695, %v2460_v61 }
 0x51b   : > { %4007 = vpow2.f32 %v2482_v62  ;;  %v2514_v31 = vmul.f32 1.442695, %v2462_v26  ;;  %v2518_v8 = vmul.f32 1.442695, %v2464_v2  ;;  %v2522_v39 = vmul.f32 1.442695, %v2466_v5 }
 0x51c   : > { %4009 = vpow2.f32 %v2486_v7  ;;  %v2443_v36 = vsub.f32 %v6069_v58, %v6167_v29  ;;  %v2445_v30 = vsub.f32 %v6073_v52, %v6167_v29  ;;  %v2447_v0 = vsub.f32 %v6079_v54, %v6167_v29 }
 0x51d   : > { %4011 = vpow2.f32 %v2490_v55  ;;  %v2449_v49 = vsub.f32 %v6087_v11, %v6167_v29  ;;  %v2451_v43 = vsub.f32 %v6094_v48, %v6167_v29  ;;  %v2453_v60 = vsub.f32 %v6100_v47, %v6167_v29 }
 0x51e   : > { %4013 = vpow2.f32 %v2494_v27  ;;  %v2455_v58 = vsub.f32 %v6106_v10, %v6167_v29  ;;  %v2457_v52 = vsub.f32 %v6112_v16, %v6167_v29  ;;  %v2459_v54 = vsub.f32 %v6118_v18, %v6167_v29 }
 0x51f   : > { %4015 = vpow2.f32 %v2498_v57  ;;  %v2461_v11 = vsub.f32 %v6124_v13, %v6167_v29  ;;  %v2463_v48 = vsub.f32 %v6130_v37, %v6167_v29  ;;  %v2465_v47 = vsub.f32 %v6136_v28, %v6167_v29 }
 0x520   : > { %4017 = vpow2.f32 %v2502_v46  ;;  %v2467_v10 = vsub.f32 %v6142_v9, %v6167_v29  ;;  %v2469_v16 = vsub.f32 %v6148_v1, %v6167_v29  ;;  %v2526_v34 = vmul.f32 1.442695, %v2468_v44 }
 0x521   : > { %4019 = vpow2.f32 %v2506_v4  ;;  %v4002_v33 = vpop.eup %4001  ;;  %v2471_v38 = vsub.f32 %v6154_v12, %v6167_v29  ;;  %v2473_v42 = vsub.f32 %v6160_v40, %v6167_v29  ;;  %v2530_v22 = vmul.f32 1.442695, %v2470_v53  ;;  %v6714_v12 = vld [vmem:[#allocation32_spill] sm:$0xff]  ;;  %v6715_v29 = vld [vmem:[#allocation33_spill] sm:$0xff] }
 0x522   : > { %4021 = vpow2.f32 %v2510_v63  ;;  %v2534_v45 = vmul.f32 1.442695, %v2472_v56  ;;  %v2440_v19 = vmul.f32 1.442695, %v2437_v14  ;;  %v2476_v61 = vmul.f32 1.442695, %v2443_v36 }
 0x523   : > { %v6237_v59 = vpop.eup %4003  ;;  %4023 = vpow2.f32 %v2514_v31  ;;  %v2480_v2 = vmul.f32 1.442695, %v2445_v30  ;;  %v2484_v5 = vmul.f32 1.442695, %v2447_v0  ;;  %v2488_v44 = vmul.f32 1.442695, %v2449_v49 }
 0x524   : > { %v6239_v3 = vpop.eup %4005  ;;  %4025 = vpow2.f32 %v2518_v8  ;;  %v2492_v56 = vmul.f32 1.442695, %v2451_v43  ;;  %v2496_v35 = vmul.f32 1.442695, %v2453_v60  ;;  %v2500_v7 = vmul.f32 1.442695, %v2455_v58 }
 0x525   : > { %v6241_v25 = vpop.eup %4007  ;;  %4027 = vpow2.f32 %v2522_v39  ;;  %v2540_v32 = vadd.f32 %v6239_v3, %v6237_v59  ;;  %v2504_v55 = vmul.f32 1.442695, %v2457_v52  ;;  %v3724_v27 = vpack.c.bf16 %v6239_v3, %v6237_v59 }
 0x526   : > { %v6245_v26 = vpop.eup %4009  ;;  %4029 = vpow2.f32 %v2526_v34  ;;  %v6264_v31 = vmul.f32 %v4002_v33, %v5754_v51  ;;  %v6267_v8 = vmul.f32 %v4002_v33, %v6018_v24  ;;  %v6270_v39 = vmul.f32 %v4002_v33, %v6025_v50 }
 0x527   : > { %v6247_v20 = vpop.eup %4011  ;;  %4031 = vpow2.f32 %v2530_v22  ;;  %v2541_v53 = vadd.f32 %v6241_v25, %v2540_v32  ;;  %v3728_v46 = vpack.c.bf16 %v6245_v26, %v6241_v25  ;;  %v6278_v49 = vmul.f32 %v4002_v33, %v6032_v23 }
 0x528   : > { %v6250_v62 = vpop.eup %4013  ;;  %4033 = vpow2.f32 %v2534_v45  ;;  %v6283_v51 = vmul.f32 %v4002_v33, %v6039_v6  ;;  %v6286_v24 = vmul.f32 %v4002_v33, %v6046_v17  ;;  %v6289_v50 = vmul.f32 %v4002_v33, %v6053_v41 }
 0x529   : > { %v6254_v14 = vpop.eup %4015  ;;  %v2542_v57 = vadd.f32 %v6245_v26, %v2541_v53  ;;  %4035 = vpow2.f32 %v2440_v19  ;;  %v3732_v4 = vpack.c.bf16 %v6250_v62, %v6247_v20  ;;  %v6297_v52 = vmul.f32 %v4002_v33, %v6058_v21 }
 0x52a   : > { %v6261_v63 = vpop.eup %4017  ;;  %4037 = vpow2.f32 %v2476_v61  ;;  %v2508_v6 = vmul.f32 1.442695, %v2459_v54  ;;  %v6305_v17 = vmul.f32 %v4002_v33, %v6063_v15  ;;  %v2512_v21 = vmul.f32 1.442695, %v2461_v11 }
 0x52b   : > { %v6272_v36 = vpop.eup %4019  ;;  %v2543_v30 = vadd.f32 %v6247_v20, %v2542_v57  ;;  %4039 = vpow2.f32 %v2480_v2  ;;  %v3736_v0 = vpack.c.bf16 %v6261_v63, %v6254_v14  ;;  %v2516_v15 = vmul.f32 1.442695, %v2463_v48  ;;  %v6712_v2 = vld [vmem:[#allocation22_spill] sm:$0xff]  ;;  %v6717_v57 = vld [vmem:[#allocation37_spill] sm:$0xff] }
 0x52c   : > { %v6280_v43 = vpop.eup %4021  ;;  %4041 = vpow2.f32 %v2484_v5  ;;  %v2520_v13 = vmul.f32 1.442695, %v2465_v47  ;;  %v2524_v37 = vmul.f32 1.442695, %v2467_v10  ;;  %v2528_v48 = vmul.f32 1.442695, %v2469_v16 }
 0x52d   : > { %v6291_v60 = vpop.eup %4023  ;;  %v2544_v58 = vadd.f32 %v6250_v62, %v2543_v30  ;;  %4043 = vpow2.f32 %v2488_v44  ;;  %v3740_v23 = vpack.c.bf16 %v6280_v43, %v6272_v36  ;;  %v2532_v19 = vmul.f32 1.442695, %v2471_v38  ;;  %v6713_v16 = vld [vmem:[#allocation36_spill] sm:$0xff] }
 0x52e   : > { %v6299_v34 = vpop.eup %4025  ;;  %4045 = vpow2.f32 %v2492_v56  ;;  %v2536_v61 = vmul.f32 1.442695, %v2473_v42  ;;  %v6716_v42 = vld [vmem:[#allocation34_spill] sm:$0xff] }
 0x52f   : > { %v6307_v41 = vpop.eup %4027  ;;  %v2545_v22 = vadd.f32 %v6254_v14, %v2544_v58  ;;  %4047 = vpow2.f32 %v2496_v35  ;;  %v3744_v45 = vpack.c.bf16 %v6299_v34, %v6291_v60 }
 0x530   : > { %v6315_v32 = vpop.eup %4029  ;;  %4049 = vpow2.f32 %v2500_v7 }
 0x531   : > { %v6320_v18 = vpop.eup %4031  ;;  %v2546_v54 = vadd.f32 %v6261_v63, %v2545_v22  ;;  %4051 = vpow2.f32 %v2504_v55  ;;  %v3748_v11 = vpack.c.bf16 %v6315_v32, %v6307_v41  ;;  %v6718_v22 = vld [vmem:[#allocation38_spill] sm:$0xff] }
 0x532   : > { %v6328_v33 = vpop.eup %4033  ;;  %4053 = vpow2.f32 %v2508_v6 }
 0x533   : > { %v4036_v28 = vpop.eup %4035  ;;  %v2547_v47 = vadd.f32 %v6272_v36, %v2546_v54  ;;  %4055 = vpow2.f32 %v2512_v21  ;;  %v3752_v9 = vpack.c.bf16 %v6328_v33, %v6320_v18 }
 0x534   : > { %v4038_v10 = vpop.eup %4037  ;;  %4057 = vpow2.f32 %v2516_v15  ;;  %v6346_v1 = vmul.f32 %v4036_v28, %v6712_v2  ;;  %v6349_v5 = vmul.f32 %v4036_v28, %v6713_v16  ;;  %v6352_v38 = vmul.f32 %v4036_v28, %v6714_v12  ;;  %v6719_v15 = vld [vmem:[#allocation39_spill] sm:$0xff]  ;;  %v6720_v2 = vld [vmem:[#allocation40_spill] sm:$0xff] }
 0x535   : > { %v4040_v44 = vpop.eup %4039  ;;  %v2548_v53 = vadd.f32 %v6280_v43, %v2547_v47  ;;  %4059 = vpow2.f32 %v2520_v13  ;;  %v6356_v40 = vmul.f32 %v4036_v28, %v6715_v29  ;;  %v6359_v56 = vmul.f32 %v4036_v28, %v6716_v42 }
 0x536   : > { %v4042_v35 = vpop.eup %4041  ;;  %4061 = vpow2.f32 %v2524_v37  ;;  %v2561_v7 = vadd.f32 %v4040_v44, %v4038_v10  ;;  %v3722_v55 = vpack.c.bf16 %v4040_v44, %v4038_v10  ;;  %v6362_v30 = vmul.f32 %v4036_v28, %v6717_v57 }
 0x537   : > { %v4044_v58 = vpop.eup %4043  ;;  %v2549_v6 = vadd.f32 %v6291_v60, %v2548_v53  ;;  %4063 = vpow2.f32 %v2528_v48  ;;  %v6366_v21 = vmul.f32 %v4036_v28, %v6718_v22  ;;  %v6369_v54 = vmul.f32 %v4036_v28, %v6719_v15 }
 0x538   : > { %v4046_v13 = vpop.eup %4045  ;;  %4065 = vpow2.f32 %v2532_v19  ;;  %v2562_v47 = vadd.f32 %v4042_v35, %v2561_v7  ;;  %3723 = vmatprep.subr.bf16.mxu1 %v3722_v55  ;;  %v3726_v37 = vpack.c.bf16 %v4044_v58, %v4042_v35  ;;  %v6372_v10 = vmul.f32 %v4036_v28, %v6720_v2 }
 0x539   : > { %v4048_v16 = vpop.eup %4047  ;;  %v2550_v12 = vadd.f32 %v6299_v34, %v2549_v6  ;;  %4067 = vpow2.f32 %v2536_v61  ;;  %3725 = vmatpush1.bf16.msra.mxu1 %v3724_v27 }
 0x53a   : > { %v4050_v48 = vpop.eup %4049  ;;  %v2563_v44 = vadd.f32 %v4044_v58, %v2562_v47  ;;  %3727 = vmatprep.subr.bf16.mxu1 %v3726_v37  ;;  %v3730_v53 = vpack.c.bf16 %v4048_v16, %v4046_v13 }
 0x53b   : > { %v4052_v29 = vpop.eup %4051  ;;  %v2551_v19 = vadd.f32 %v6307_v41, %v2550_v12 }
 0x53c   : > { %v4054_v42 = vpop.eup %4053  ;;  %v2564_v35 = vadd.f32 %v4046_v13, %v2563_v44  ;;  %v3734_v7 = vpack.c.bf16 %v4052_v29, %v4050_v48 }
 0x53d   : > { %v4056_v28 = vpop.eup %4055  ;;  %v2552_v55 = vadd.f32 %v6315_v32, %v2551_v19  ;;  %3729 = vmatpush1.bf16.msra.mxu1 %v3728_v46 }
 0x53e   : > { %v4058_v61 = vpop.eup %4057  ;;  %v2565_v59 = vadd.f32 %v4048_v16, %v2564_v35  ;;  %3731 = vmatprep.subr.bf16.mxu1 %v3730_v53  ;;  %v3738_v3 = vpack.c.bf16 %v4056_v28, %v4054_v42  ;;  %v2600_v53 = vpop.trf.xlu1 }
 0x53f   : > { %v4060_v27 = vpop.eup %4059  ;;  %v2553_v57 = vadd.f32 %v6320_v18, %v2552_v55 }
 0x540   : > { %v4062_v58 = vpop.eup %4061  ;;  %v2566_v6 = vadd.f32 %v4050_v48, %v2565_v59  ;;  %v3742_v22 = vpack.c.bf16 %v4060_v27, %v4058_v61 }
 0x541   : > { %v4064_v15 = vpop.eup %4063  ;;  %v2554_v13 = vadd.f32 %v6328_v33, %v2553_v57  ;;  %3733 = vmatpush1.bf16.msra.mxu1 %v3732_v4 }
 0x542   : > { %v4066_v47 = vpop.eup %4065  ;;  %v2567_v25 = vadd.f32 %v4052_v29, %v2566_v6  ;;  %3735 = vmatprep.subr.bf16.mxu1 %v3734_v7  ;;  %v3746_v26 = vpack.c.bf16 %v4064_v15, %v4062_v58  ;;  %v2601_v14 = vpop.trf.xlu1 }
 0x543   : > { %v4068_v46 = vpop.eup %4067  ;;  %v2555_v37 = vrot.slane %v2554_v13, 4 }
 0x544   : > { %v2568_v2 = vadd.f32 %v4054_v42, %v2567_v25  ;;  %v3750_v16 = vpack.c.bf16 %v4068_v46, %v4066_v47 }
 0x545   : > { %v2556_v12 = vadd.f32 %v2555_v37, %v2554_v13  ;;  %3737 = vmatpush1.bf16.msra.mxu1 %v3736_v0 }
 0x546   : > { %v2569_v48 = vadd.f32 %v4056_v28, %v2568_v2  ;;  %3739 = vmatprep.subr.bf16.mxu1 %v3738_v3  ;;  %v2602_v43 = vpop.trf.xlu1 }
 0x547   : > { %v2557_v44 = vrot.slane %v2556_v12, 2 }
 0x548   : > { %v2570_v19 = vadd.f32 %v4058_v61, %v2569_v48 }
 0x549   : > { %v2558_v20 = vadd.f32 %v2557_v44, %v2556_v12  ;;  %3741 = vmatpush1.bf16.msra.mxu1 %v3740_v23 }
 0x54a   : > { %v2571_v62 = vadd.f32 %v4060_v27, %v2570_v19  ;;  %3743 = vmatprep.subr.bf16.mxu1 %v3742_v22  ;;  %v2603_v7 = vpop.trf.xlu1 }
 0x54b   : > { %v2559_v4 = vrot.slane %v2558_v20, 1 }
 0x54c   : > { %v2572_v29 = vadd.f32 %v4062_v58, %v2571_v62 }
 0x54d   : > { %v2560_v42 = vadd.f32 %v2559_v4, %v2558_v20  ;;  %3745 = vmatpush1.bf16.msra.mxu1 %v3744_v45  ;;  %v6721_v45 = vmov 0.0  }
 0x54e   : > { %v2573_v63 = vadd.f32 %v4064_v15, %v2572_v29  ;;  %3747 = vmatprep.subr.bf16.mxu1 %v3746_v26  ;;  %v2604_v32 = vpop.trf.xlu1 }
 0x54f   : > { %v2582_v0 = vadd.f32 %v2560_v42, %v6264_v31 }
 0x550   : > { %v2574_v35 = vadd.f32 %v4066_v47, %v2573_v63 }
 0x551   : > { %3749 = vmatpush1.bf16.msra.mxu1 %v3748_v11  ;;  %4069 = vrcp.f32 %v2582_v0 }
 0x552   : > { %v2575_v36 = vadd.f32 %v4068_v46, %v2574_v35  ;;  %3751 = vmatprep.subr.bf16.mxu1 %v3750_v16  ;;  %v2605_v18 = vpop.trf.xlu1 }
 0x554   : > { %v2576_v23 = vrot.slane %v2575_v36, 4 }
 0x555   : > { %3753 = vmatpush1.bf16.msra.mxu1 %v3752_v9 }
 0x556   : > { %v2577_v60 = vadd.f32 %v2576_v23, %v2575_v36  ;;  %v2606_v33 = vpop.trf.xlu1 }
 0x558   : > { %v2578_v34 = vrot.slane %v2577_v60, 2  ;;  %2681 = vmatmul.mubr.f32.vlgmr.msra.gmra.mrb[80].mxu1 %v2600_v53 }
 0x559   : > { %2686 = vmatprep.mubr.f32.mxu1 %v6721_v45 }
 0x55a   : > { %v2579_v31 = vadd.f32 %v2578_v34, %v2577_v60  ;;  %v2607_v9 = vpop.trf.xlu1 }
 0x55c   : > { %v2580_v28 = vrot.slane %v2579_v31, 1  ;;  %2687 = vmatmul.mubr.f32.gmra.mrb[82].mxu1 %v2601_v14 }
 0x55d   : > { %2692 = vmatprep.mubr.f32.mxu1 %v6721_v45 }
 0x55e   : > { %v2581_v41 = vadd.f32 %v2580_v28, %v2579_v31 }
 0x560   : > { %2693 = vmatmul.mubr.f32.gmra.mrb[84].mxu1 %v2602_v43  ;;  %v2583_v11 = vadd.f32 %v2581_v41, %v6346_v1  ;;  %v4070_v1 = vpop.eup %4069 }
 0x561   : > { %2698 = vmatprep.mubr.f32.mxu1 %v6721_v45  ;;  %v2763_v61 = vmul.f32 %v4070_v1, %v2582_v0 }
 0x562   : > { %4071 = vrcp.f32 %v2583_v11 }
 0x563   : > { %v2765_v3 = vsub.f32 2.0, %v2763_v61 }
 0x564   : > { %2699 = vmatmul.mubr.f32.gmra.mrb[86].mxu1 %v2603_v7 }
 0x565   : > { %2704 = vmatprep.mubr.f32.mxu1 %v6721_v45  ;;  %v6416_v6 = vmul.f32 %v4070_v1, %v2765_v3 }
 0x568   : > { %2705 = vmatmul.mubr.f32.gmra.mrb[88].mxu1 %v2604_v32 }
 0x569   : > { %2710 = vmatprep.mubr.f32.mxu1 %v6721_v45 }
 0x56c   : > { %2711 = vmatmul.mubr.f32.gmra.mrb[90].mxu1 %v2605_v18  ;;  %v4072_v55 = vpop.eup %4071 }
 0x56d   : > { %2716 = vmatprep.mubr.f32.mxu1 %v6721_v45  ;;  %v2764_v59 = vmul.f32 %v4072_v55, %v2583_v11 }
 0x56f   : > { %v2766_v27 = vsub.f32 2.0, %v2764_v59 }
 0x570   : > { %2717 = vmatmul.mubr.f32.gmra.mrb[92].mxu1 %v2606_v33 }
 0x571   : > { %2722 = vmatprep.mubr.f32.mxu1 %v6721_v45  ;;  %v6419_v13 = vmul.f32 %v4072_v55, %v2766_v27 }
 0x574   : > { %2723 = vmatmul.mubr.f32.gmra.mrb[94].mxu1 %v2607_v9 }
 0x62b   : > { %v2682_v57 = vpop.f32.mrb[80].mxu1 }
 0x62c   : > { %v2745_v58 = vadd.f32 %v6267_v8, %v2682_v57  ;;  %v2684_v22 = vpop.f32.mrb[81].mxu1 }
 0x62d   : > { %v2746_v15 = vadd.f32 %v6349_v5, %v2684_v22 }
 0x62e   : > { %v2769_v47 = vmul.f32 %v6416_v6, %v2745_v58 }
 0x62f   : > { %v2770_v25 = vmul.f32 %v6419_v13, %v2746_v15  ;;  %v2688_v26 = vpop.f32.mrb[82].mxu1 }
 0x630   : > { %2785 = vst [vmem:[%s6423_s8] sm:$0xff] %v2769_v47  ;;  %v2747_v8 = vadd.f32 %v6270_v39, %v2688_v26  ;;  %v2690_v46 = vpop.f32.mrb[83].mxu1 }
 0x631   : > { %2786 = vst [vmem:[%s6423_s8 + $0x8] sm:$0xff] %v2770_v25  ;;  %v2748_v5 = vadd.f32 %v6352_v38, %v2690_v46 }
 0x632   : > { %v2771_v37 = vmul.f32 %v6416_v6, %v2747_v8 }
 0x633   : > { %v2772_v2 = vmul.f32 %v6419_v13, %v2748_v5  ;;  %v2694_v16 = vpop.f32.mrb[84].mxu1 }
 0x634   : > { %2787 = vst [vmem:[%s6423_s8 + $0x10] sm:$0xff] %v2771_v37  ;;  %v2749_v12 = vadd.f32 %v6278_v49, %v2694_v16  ;;  %v2696_v48 = vpop.f32.mrb[85].mxu1 }
 0x635   : > { %2788 = vst [vmem:[%s6423_s8 + $0x18] sm:$0xff] %v2772_v2  ;;  %v2750_v44 = vadd.f32 %v6356_v40, %v2696_v48 }
 0x636   : > { %v2773_v39 = vmul.f32 %v6416_v6, %v2749_v12 }
 0x637   : > { %v2774_v53 = vmul.f32 %v6419_v13, %v2750_v44  ;;  %v2700_v19 = vpop.f32.mrb[86].mxu1 }
 0x638   : > { %2789 = vst [vmem:[%s6423_s8 + $0x20] sm:$0xff] %v2773_v39  ;;  %v2751_v38 = vadd.f32 %v6283_v51, %v2700_v19  ;;  %v2702_v20 = vpop.f32.mrb[87].mxu1 }
 0x639   : > { %2790 = vst [vmem:[%s6423_s8 + $0x28] sm:$0xff] %v2774_v53  ;;  %v2752_v62 = vadd.f32 %v6359_v56, %v2702_v20 }
 0x63a   : > { %v2775_v49 = vmul.f32 %v6416_v6, %v2751_v38 }
 0x63b   : > { %v2776_v4 = vmul.f32 %v6419_v13, %v2752_v62  ;;  %v2706_v29 = vpop.f32.mrb[88].mxu1 }
 0x63c   : > { %2791 = vst [vmem:[%s6423_s8 + $0x30] sm:$0xff] %v2775_v49  ;;  %v2753_v40 = vadd.f32 %v6286_v24, %v2706_v29  ;;  %v2708_v42 = vpop.f32.mrb[89].mxu1 }
 0x63d   : > { %2792 = vst [vmem:[%s6423_s8 + $0x38] sm:$0xff] %v2776_v4  ;;  %v2754_v14 = vadd.f32 %v6362_v30, %v2708_v42 }
 0x63e   : > { %v2777_v51 = vmul.f32 %v6416_v6, %v2753_v40 }
 0x63f   : > { %v2778_v63 = vmul.f32 %v6419_v13, %v2754_v14  ;;  %v2712_v56 = vpop.f32.mrb[90].mxu1 }
 0x640   : > { %2793 = vst [vmem:[%s6423_s8 + $0x40] sm:$0xff] %v2777_v51  ;;  %v2755_v0 = vadd.f32 %v6289_v50, %v2712_v56  ;;  %v2714_v35 = vpop.f32.mrb[91].mxu1 }
 0x641   : > { %2794 = vst [vmem:[%s6423_s8 + $0x48] sm:$0xff] %v2778_v63  ;;  %v2756_v24 = vadd.f32 %v6366_v21, %v2714_v35 }
 0x642   : > { %v2779_v36 = vmul.f32 %v6416_v6, %v2755_v0 }
 0x643   : > { %v2780_v30 = vmul.f32 %v6419_v13, %v2756_v24  ;;  %v2718_v43 = vpop.f32.mrb[92].mxu1 }
 0x644   : > { %2795 = vst [vmem:[%s6423_s8 + $0x50] sm:$0xff] %v2779_v36  ;;  %v2757_v23 = vadd.f32 %v6297_v52, %v2718_v43  ;;  %v2720_v60 = vpop.f32.mrb[93].mxu1 }
 0x645   : > { %2796 = vst [vmem:[%s6423_s8 + $0x58] sm:$0xff] %v2780_v30  ;;  %v2758_v50 = vadd.f32 %v6369_v54, %v2720_v60 }
 0x646   : > { %v2781_v34 = vmul.f32 %v6416_v6, %v2757_v23 }
 0x647   : > { %v2782_v21 = vmul.f32 %v6419_v13, %v2758_v50  ;;  %v2724_v45 = vpop.f32.mrb[94].mxu1 }
 0x648   : > { %2797 = vst [vmem:[%s6423_s8 + $0x60] sm:$0xff] %v2781_v34  ;;  %v2759_v7 = vadd.f32 %v6305_v17, %v2724_v45  ;;  %v2726_v31 = vpop.f32.mrb[95].mxu1 }
 0x649   : > { %2798 = vst [vmem:[%s6423_s8 + $0x68] sm:$0xff] %v2782_v21  ;;  %v2760_v52 = vadd.f32 %v6372_v10, %v2726_v31 }
 0x64a   : > { %v2783_v54 = vmul.f32 %v6416_v6, %v2759_v7 }
 0x64b   : > { %v2784_v28 = vmul.f32 %v6419_v13, %v2760_v52 }
 0x64c   : > { %2799 = vst [vmem:[%s6423_s8 + $0x70] sm:$0xff] %v2783_v54 }
 0x64d   : > { %2800 = vst [vmem:[%s6423_s8 + $0x78] sm:$0xff] %v2784_v28 }
 0x64e   : > { %4086 = shalt.err (!%p4083_p3)
}
 0x64f   : > { %s4087_s27 = scalar_lea.hbm %s6470_s19, 2048  ;;  %s4091_s30 = scalar_lea.hbm %s6524_s3, 4096 }
 0x650   : > { %p4088_p4 = scmp.ne.s32.totalorder %s6470_s19, %s4087_s27  ;;  %p4092_p9 = scmp.lt.u32.totalorder %s6470_s19, %s6524_s3 }
 0x651   : > { %p4093_p10 = scmp.lt.u32.totalorder %s4091_s30, %s4087_s27  ;;  %p4095_p12 = scmp.lt.u32.totalorder %s4087_s27, %s6470_s19 }
 0x652   : > { %p4089_p7 = pnand %p4088_p4, %p4200_p5 }
 0x653   : > { %p4094_p11 = por %p4093_p10, %p4092_p9 }
 0x654   : > { %p4090_p8 = pneg %p4089_p7 }
 0x655   : > { %p4096_p13 = por %p4095_p12, %p4094_p11 }
 0x657   : > { %p4097_p0 = pnand %p4096_p13, %p4090_p8 }
 0x659   : > { %4100 = shalt.err (!%p4097_p0)
}
 0x65a   : > { %s4139_s6 = smov 256   ;;  %s4140_s7 = smov 512  }
 0x65b   : > { %s4141_s8 = smov 16  }
 0x65c   : > { %3754 = dma.vmem_to_hbm [thread:$0]  (%p4200_p5), %s6473_s10, 2048, %s6470_s19, %s6480_s16, %s4139_s6, %s4140_s7, %s4141_s8  }
 0x65d PF: > { %p3760_p1 = scmp.ge.s32.totalorder %s4135_s15, 2  ;;  %s2830_s9 = sand.u32 1, %s4123_s12  }
 0x65e   : > { %s2831_s11 = scalar_lea.sflag [#allocation3], %s2830_s9 }
 0x65f   : > { %p3757_p2 = pnand %p3760_p1, %p4204_p6 }
 0x661   : > { %4118 = dma.done.wait (!%p3757_p2), %s2831_s11, 2048  }
 0x662   : > { %4120 = vsyncadd (!%p3757_p2), %s2831_s11, 4294965248  ;;  %p13_p3 = scmp.ge.s32.totalorder %s4187_s18, 4   ;;  %s6722_s12 = smov %s4127_s13 }
 0x663   : > { %s6723_s13 = smov %s4131_s14  ;;  %s6724_s14 = smov %s4198_s21 }
 0x664   : > { %s6725_s15 = smov %s4187_s18  ;;  %15 = sbr.rel (!%p13_p3) target bundleno = 3 (0x3), region = 73 }
 0x66b   :  { %2836 = vsyncpa [#allocation3], 1 }
 0x66c   :  { %2838 = vsyncpa [#allocation3 + $0x1], 1 }

</bundles_post_ra>
